<compile_context>
chip_gen: v5e
topology: v5e:2x2
jax: 0.10.0
libtpu: 0.0.40
codegen_flags: <defaults>
</compile_context>

<pallas_src>
import functools

import jax
import jax.numpy as jnp
import numpy as np
from jax import lax
from jax.experimental import pallas as pl
from jax.experimental.pallas import tpu as pltpu

_NEG_BIG = -1e30  # padded-class bias: out of max / exp-sum / argmax


def teacher_kernel(x_ref, w1_ref, b1_ref, w2_ref, b2_ref, y_ref, out_ref):
    # ---- encoder: Linear -> ReLU -> Linear (bf16 MXU inputs, f32 accum) ----
    x = x_ref[...].astype(w1_ref.dtype)            # f32 -> bf16 cast in-kernel
    h = jnp.dot(x, w1_ref[...],
                preferred_element_type=jnp.float32) + b1_ref[...]
    h = jnp.maximum(h, 0.0)
    logits = jnp.dot(h.astype(w2_ref.dtype), w2_ref[...],
                     preferred_element_type=jnp.float32) + b2_ref[...]

    tile_n, c_pad = logits.shape

    # ---- stable log_softmax; padded classes pinned at -1e30 by b2 padding ----
    m = jnp.max(logits, axis=-1, keepdims=True)
    lse = m + jnp.log(jnp.sum(jnp.exp(logits - m), axis=-1, keepdims=True))
    logp = logits - lse

    # ---- lane-dense masked partial reductions ------------------------------
    cls = lax.broadcasted_iota(jnp.int32, (tile_n, c_pad), 1)
    y = y_ref[...]                                  # (tile_n, 1) int32, -1 = masked/pad
    onehot = (cls == y).astype(jnp.float32)         # zero row when y == -1

    # first-max argmax (torch tie-break); padded lanes never equal m
    is_max = logits == m
    first_max = jnp.min(jnp.where(is_max, cls, c_pad), axis=-1, keepdims=True)
    correct = onehot * (cls == first_max).astype(jnp.float32)

    loss_lanes = jnp.sum(-logp * onehot, axis=0, keepdims=True)   # (1, c_pad)
    corr_lanes = jnp.sum(correct, axis=0, keepdims=True)          # (1, c_pad)
    cnt_lanes = jnp.sum(onehot, axis=0, keepdims=True)            # (1, c_pad)

    # one lane-dense store per tile: (1, 3, c_pad)
    out_ref[...] = jnp.concatenate(
        [loss_lanes, corr_lanes, cnt_lanes], axis=0)[None, :, :]


def _round_up(v, m):
    return m * ((v + m - 1) // m)


def _vmem_budget_bytes(tile_n, feat, hidden, c_pad):
    """Derive a vmem limit from actual usage, with headroom (<= 48 MiB for v7x)."""
    f32, bf16 = 4, 2
    x_bufs = 2 * tile_n * feat * f32                       # streamed x (double-buffered)
    y_bufs = 2 * tile_n * 128 * f32                        # (tile_n,1) int32 lane-pads to 128
    w_bufs = 2 * (feat * hidden + hidden * c_pad) * bf16   # resident weights (2 bufs)
    b_bufs = 2 * 8 * (_round_up(hidden, 128) + c_pad) * f32
    out_bufs = 2 * 8 * c_pad * f32
    interm = tile_n * (feat + hidden + 3 * c_pad) * f32    # h / logits / logp / masks
    total = x_bufs + y_bufs + w_bufs + b_bufs + out_bufs + interm
    return int(min(48 << 20, max(16 << 20, 2 * total)))


def teacher_forward(x, w1, b1, w2, b2, train_mask, y, *,
                    tile_n=512, mxu_dtype=jnp.bfloat16):
    """Returns (loss_train, acc_train) exactly like TeacherModel.forward."""
    N, F = x.shape
    H = w1.shape[1]
    C = w2.shape[1]

    # Lane-dense class axis: pad C to a multiple of 128; padded logits = -1e30.
    c_pad = _round_up(C, 128)
    w2p = jnp.pad(w2, ((0, 0), (0, c_pad - C)))
    b2p = jnp.pad(b2, ((0, 0), (0, c_pad - C)), constant_values=_NEG_BIG)

    # Node tiling: keep tile_n a multiple of 16 (bf16 sublane packing) and no
    # larger than the (16-aligned) problem, so small problems run in 1 step.
    tile_n = max(16, (int(tile_n) // 16) * 16)
    tile_n = min(tile_n, _round_up(N, 16))
    num_tiles = pl.cdiv(N, tile_n)
    n_pad = tile_n * num_tiles

    # y = -1 encodes both non-train rows and padded rows; mask derived in-kernel.
    y_enc = jnp.where(train_mask, y.astype(jnp.int32), -1).reshape(N, 1)
    if n_pad != N:
        # Keep zero-padded x so padded rows produce finite logits (no NaN risk).
        x = jnp.pad(x, ((0, n_pad - N), (0, 0)))
        y_enc = jnp.pad(y_enc, ((0, n_pad - N), (0, 0)), constant_values=-1)

    # Weights (small, resident) cast once in the wrapper; x stays f32 and is
    # cast to bf16 inside the kernel.
    w1_c = w1.astype(mxu_dtype)
    w2_c = w2p.astype(mxu_dtype)

    cost = pl.CostEstimate(
        flops=2 * n_pad * (F * H + H * c_pad),
        transcendentals=n_pad * (c_pad + 1),
        bytes_accessed=(n_pad * F * 4                         # streamed f32 x
                        + n_pad * 4                           # y
                        + (F * H + H * c_pad) * 2             # bf16 weights
                        + (H + c_pad) * 4                     # biases
                        + num_tiles * 3 * c_pad * 4),         # partial outputs
    )

    partials = pl.pallas_call(
        teacher_kernel,
        out_shape=jax.ShapeDtypeStruct((num_tiles, 3, c_pad), jnp.float32),
        grid=(num_tiles,),
        in_specs=[
            pl.BlockSpec((tile_n, F), lambda i: (i, 0)),   # x   f32  (streamed)
            pl.BlockSpec((F, H), lambda i: (0, 0)),        # w1  bf16 (resident)
            pl.BlockSpec((1, H), lambda i: (0, 0)),        # b1  f32  (resident)
            pl.BlockSpec((H, c_pad), lambda i: (0, 0)),    # w2  bf16 (resident)
            pl.BlockSpec((1, c_pad), lambda i: (0, 0)),    # b2  f32  (resident)
            pl.BlockSpec((tile_n, 1), lambda i: (i, 0)),   # y   int32 (streamed)
        ],
        out_specs=pl.BlockSpec((1, 3, c_pad), lambda i: (i, 0, 0)),
        compiler_params=pltpu.CompilerParams(
            dimension_semantics=("parallel",),             # v7x: shard tiles on both TCs
            vmem_limit_bytes=_vmem_budget_bytes(tile_n, F, H, c_pad),
        ),
        cost_estimate=cost,
    )(x, w1_c, b1, w2_c, b2p, y_enc)

    # Tiny final reduction + EXACT divides in plain JAX.
    # n_train == 0 gives 0/0 = NaN, matching the PyTorch reference behaviour.
    sums = jnp.sum(partials, axis=(0, 2))                  # (3,)
    n_train = sums[2]
    loss = sums[0] / n_train
    acc = sums[1] / n_train
    return loss, acc


def reference_forward(x, w1, b1, w2, b2, train_mask, y, *,
                      mxu_dtype=jnp.bfloat16):
    """Pure-JAX reference mirroring TeacherModel.forward (same bf16 matmul inputs)."""
    h = jnp.dot(x.astype(mxu_dtype), w1.astype(mxu_dtype),
                preferred_element_type=jnp.float32) + b1
    h = jnp.maximum(h, 0.0)
    logits = jnp.dot(h.astype(mxu_dtype), w2.astype(mxu_dtype),
                     preferred_element_type=jnp.float32) + b2
    out = logits[train_mask]
    y_m = y[train_mask]
    logp = jax.nn.log_softmax(out, axis=-1)
    loss = -jnp.mean(logp[jnp.arange(out.shape[0]), y_m])
    acc = jnp.mean((jnp.argmax(out, axis=-1) == y_m).astype(jnp.float32))
    return loss, acc


if __name__ == "__main__":
    # Small but MXU/lane-aligned synthetic node-classification problem.
    N, F, H, C = 512, 128, 128, 10

    key = jax.random.PRNGKey(0)
    kx, kw1, kb1, kw2, kb2, ky = jax.random.split(key, 6)

    x = jax.random.normal(kx, (N, F), dtype=jnp.float32)
    # Encoder parameters stored pre-transposed as (in, out): kernel does x@W+b.
    w1 = jax.random.normal(kw1, (F, H), dtype=jnp.float32) * 0.1
    b1 = jax.random.normal(kb1, (1, H), dtype=jnp.float32) * 0.1
    w2 = jax.random.normal(kw2, (H, C), dtype=jnp.float32) * 0.1
    b2 = jax.random.normal(kb2, (1, C), dtype=jnp.float32) * 0.1
    y = jax.random.randint(ky, (N,), 0, C, dtype=jnp.int32)
    # First half of the nodes are training nodes.
    train_mask = jnp.arange(N) < (N // 2)

    ref_loss, ref_acc = reference_forward(x, w1, b1, w2, b2, train_mask, y)
    ref_loss, ref_acc = np.asarray(ref_loss), np.asarray(ref_acc)

    # Default (large-tile) path: single grid step at this size.
    loss, acc = teacher_forward(x, w1, b1, w2, b2, train_mask, y)
    loss, acc = jax.block_until_ready((loss, acc))
    assert np.allclose(np.asarray(loss), ref_loss, rtol=2e-3, atol=2e-3), (loss, ref_loss)
    assert np.allclose(np.asarray(acc), ref_acc, rtol=2e-3, atol=2e-3), (acc, ref_acc)

    # Multi-tile path (exercises the "parallel" per-tile partial outputs).
    loss2, acc2 = teacher_forward(x, w1, b1, w2, b2, train_mask, y, tile_n=128)
    loss2, acc2 = jax.block_until_ready((loss2, acc2))
    assert np.allclose(np.asarray(loss2), ref_loss, rtol=2e-3, atol=2e-3), (loss2, ref_loss)
    assert np.allclose(np.asarray(acc2), ref_acc, rtol=2e-3, atol=2e-3), (acc2, ref_acc)

    print("KERNEL_OK")
</pallas_src>

<mosaic_0001>
module attributes {stable_mosaic.version = 11 : i64} {
  func.func @teacher_kernel(%arg0: i32, %arg1: memref<512x128xf32, #tpu.memory_space<vmem>>, %arg2: memref<128x128xbf16, #tpu.memory_space<vmem>>, %arg3: memref<1x128xf32, #tpu.memory_space<vmem>>, %arg4: memref<128x128xbf16, #tpu.memory_space<vmem>>, %arg5: memref<1x128xf32, #tpu.memory_space<vmem>>, %arg6: memref<512x1xi32, #tpu.memory_space<vmem>>, %arg7: memref<1x3x128xf32, #tpu.memory_space<vmem>>) attributes {dimension_semantics = [#tpu.dimension_semantics<parallel>], iteration_bounds = array<i64: 1>, scalar_prefetch = 0 : i64, scratch_operands = 0 : i64, tpu.core_type = #tpu.core_type<tc>, window_params = [{transform_indices = @transform_0, window_bounds = array<i64: 512, 128>}, {pipeline_mode = #tpu.pipeline_mode<synchronous>, transform_indices = @transform_1, window_bounds = array<i64: 128, 128>}, {pipeline_mode = #tpu.pipeline_mode<synchronous>, transform_indices = @transform_2, window_bounds = array<i64: 1, 128>}, {pipeline_mode = #tpu.pipeline_mode<synchronous>, transform_indices = @transform_3, window_bounds = array<i64: 128, 128>}, {pipeline_mode = #tpu.pipeline_mode<synchronous>, transform_indices = @transform_4, window_bounds = array<i64: 1, 128>}, {transform_indices = @transform_5, window_bounds = array<i64: 512, 1>}, {transform_indices = @transform_6, window_bounds = array<i64: 1, 3, 128>}]} {
    %c0 = arith.constant 0 : index
    %c0_0 = arith.constant 0 : index
    %0 = vector.load %arg1[%c0, %c0_0] : memref<512x128xf32, #tpu.memory_space<vmem>>, vector<512x128xf32>
    %1 = arith.truncf %0 : vector<512x128xf32> to vector<512x128xbf16>
    %c0_1 = arith.constant 0 : index
    %c0_2 = arith.constant 0 : index
    %2 = vector.load %arg2[%c0_1, %c0_2] : memref<128x128xbf16, #tpu.memory_space<vmem>>, vector<128x128xbf16>
    %cst = arith.constant dense<0.000000e+00> : vector<512x128xf32>
    %3 = tpu.matmul %1, %2, %cst {dimension_numbers = #tpu.dot_dimension_numbers<[1], [0], [0], [1], [0, 0, 1, 1], [], []>} : vector<512x128xbf16>, vector<128x128xbf16>, vector<512x128xf32> -> vector<512x128xf32>
    %c0_3 = arith.constant 0 : index
    %c0_4 = arith.constant 0 : index
    %4 = vector.load %arg3[%c0_3, %c0_4] : memref<1x128xf32, #tpu.memory_space<vmem>>, vector<1x128xf32>
    %5 = vector.broadcast %4 : vector<1x128xf32> to vector<512x128xf32>
    %6 = arith.addf %3, %5 : vector<512x128xf32>
    %cst_5 = arith.constant 0.000000e+00 : f32
    %7 = vector.broadcast %cst_5 : f32 to vector<512x128xf32>
    %8 = arith.maximumf %6, %7 : vector<512x128xf32>
    %9 = arith.truncf %8 : vector<512x128xf32> to vector<512x128xbf16>
    %c0_6 = arith.constant 0 : index
    %c0_7 = arith.constant 0 : index
    %10 = vector.load %arg4[%c0_6, %c0_7] : memref<128x128xbf16, #tpu.memory_space<vmem>>, vector<128x128xbf16>
    %cst_8 = arith.constant dense<0.000000e+00> : vector<512x128xf32>
    %11 = tpu.matmul %9, %10, %cst_8 {dimension_numbers = #tpu.dot_dimension_numbers<[1], [0], [0], [1], [0, 0, 1, 1], [], []>} : vector<512x128xbf16>, vector<128x128xbf16>, vector<512x128xf32> -> vector<512x128xf32>
    %c0_9 = arith.constant 0 : index
    %c0_10 = arith.constant 0 : index
    %12 = vector.load %arg5[%c0_9, %c0_10] : memref<1x128xf32, #tpu.memory_space<vmem>>, vector<1x128xf32>
    %13 = vector.broadcast %12 : vector<1x128xf32> to vector<512x128xf32>
    %14 = arith.addf %11, %13 : vector<512x128xf32>
    %cst_11 = arith.constant dense<0xFF800000> : vector<512xf32>
    %15 = vector.multi_reduction <maximumf>, %14, %cst_11 [1] : vector<512x128xf32> to vector<512xf32>
    %16 = vector.shape_cast %15 : vector<512xf32> to vector<512x1xf32>
    %17 = vector.broadcast %16 : vector<512x1xf32> to vector<512x128xf32>
    %18 = arith.subf %14, %17 : vector<512x128xf32>
    %19 = math.exp %18 : vector<512x128xf32>
    %cst_12 = arith.constant dense<0.000000e+00> : vector<512xf32>
    %20 = vector.multi_reduction <add>, %19, %cst_12 [1] : vector<512x128xf32> to vector<512xf32>
    %21 = vector.shape_cast %20 : vector<512xf32> to vector<512x1xf32>
    %22 = math.log %21 : vector<512x1xf32>
    %23 = arith.addf %16, %22 : vector<512x1xf32>
    %24 = vector.broadcast %23 : vector<512x1xf32> to vector<512x128xf32>
    %25 = arith.subf %14, %24 : vector<512x128xf32>
    %26 = tpu.iota {dimensions = array<i32: 1>} : vector<512x128xi32>
    %c0_13 = arith.constant 0 : index
    %c0_14 = arith.constant 0 : index
    %27 = vector.load %arg6[%c0_13, %c0_14] : memref<512x1xi32, #tpu.memory_space<vmem>>, vector<512x1xi32>
    %28 = vector.broadcast %27 : vector<512x1xi32> to vector<512x128xi32>
    %29 = arith.cmpi eq, %26, %28 : vector<512x128xi32>
    %30 = arith.extui %29 : vector<512x128xi1> to vector<512x128xi32>
    %31 = arith.sitofp %30 : vector<512x128xi32> to vector<512x128xf32>
    %32 = vector.broadcast %16 : vector<512x1xf32> to vector<512x128xf32>
    %33 = arith.cmpf oeq, %14, %32 : vector<512x128xf32>
    %c128_i32 = arith.constant 128 : i32
    %34 = vector.broadcast %c128_i32 : i32 to vector<512x128xi32>
    %35 = arith.select %33, %26, %34 : vector<512x128xi1>, vector<512x128xi32>
    %cst_15 = arith.constant dense<2147483647> : vector<512xi32>
    %36 = vector.multi_reduction <minsi>, %35, %cst_15 [1] : vector<512x128xi32> to vector<512xi32>
    %37 = vector.shape_cast %36 : vector<512xi32> to vector<512x1xi32>
    %38 = vector.broadcast %37 : vector<512x1xi32> to vector<512x128xi32>
    %39 = arith.cmpi eq, %26, %38 : vector<512x128xi32>
    %40 = arith.extui %39 : vector<512x128xi1> to vector<512x128xi32>
    %41 = arith.sitofp %40 : vector<512x128xi32> to vector<512x128xf32>
    %42 = arith.mulf %31, %41 : vector<512x128xf32>
    %cst_16 = arith.constant 0.000000e+00 : f32
    %43 = vector.broadcast %cst_16 : f32 to vector<512x128xf32>
    %44 = arith.subf %43, %25 : vector<512x128xf32>
    %45 = arith.mulf %44, %31 : vector<512x128xf32>
    %cst_17 = arith.constant dense<0.000000e+00> : vector<128xf32>
    %46 = vector.multi_reduction <add>, %45, %cst_17 [0] : vector<512x128xf32> to vector<128xf32>
    %47 = vector.shape_cast %46 : vector<128xf32> to vector<1x128xf32>
    %cst_18 = arith.constant dense<0.000000e+00> : vector<128xf32>
    %48 = vector.multi_reduction <add>, %42, %cst_18 [0] : vector<512x128xf32> to vector<128xf32>
    %49 = vector.shape_cast %48 : vector<128xf32> to vector<1x128xf32>
    %cst_19 = arith.constant dense<0.000000e+00> : vector<128xf32>
    %50 = vector.multi_reduction <add>, %31, %cst_19 [0] : vector<512x128xf32> to vector<128xf32>
    %51 = vector.shape_cast %50 : vector<128xf32> to vector<1x128xf32>
    %52 = tpu.concatenate %47, %49, %51 in 0 : vector<1x128xf32>, vector<1x128xf32>, vector<1x128xf32> -> vector<3x128xf32>
    %53 = vector.shape_cast %52 : vector<3x128xf32> to vector<1x3x128xf32>
    %c0_20 = arith.constant 0 : index
    %c0_21 = arith.constant 0 : index
    %c0_22 = arith.constant 0 : index
    %54 = vector.load %arg7[%c0_20, %c0_21, %c0_22] : memref<1x3x128xf32, #tpu.memory_space<vmem>>, vector<1x3x128xf32>
    tpu.vector_store %arg7[%c0_20, %c0_21, %c0_22], %53 {strides = array<i32>} : memref<1x3x128xf32, #tpu.memory_space<vmem>>, vector<1x3x128xf32>,
    return
  }
  func.func @transform_0(%arg0: i32) -> (i32, i32) {
    %c0_i32 = arith.constant 0 : i32
    %c0_i32_0 = arith.constant 0 : i32
    return %arg0, %c0_i32 : i32, i32
  }
  func.func @transform_1(%arg0: i32) -> (i32, i32) {
    %c0_i32 = arith.constant 0 : i32
    %c0_i32_0 = arith.constant 0 : i32
    %c0_i32_1 = arith.constant 0 : i32
    return %c0_i32, %c0_i32_0 : i32, i32
  }
  func.func @transform_2(%arg0: i32) -> (i32, i32) {
    %c0_i32 = arith.constant 0 : i32
    %c0_i32_0 = arith.constant 0 : i32
    %c0_i32_1 = arith.constant 0 : i32
    return %c0_i32, %c0_i32_0 : i32, i32
  }
  func.func @transform_3(%arg0: i32) -> (i32, i32) {
    %c0_i32 = arith.constant 0 : i32
    %c0_i32_0 = arith.constant 0 : i32
    %c0_i32_1 = arith.constant 0 : i32
    return %c0_i32, %c0_i32_0 : i32, i32
  }
  func.func @transform_4(%arg0: i32) -> (i32, i32) {
    %c0_i32 = arith.constant 0 : i32
    %c0_i32_0 = arith.constant 0 : i32
    %c0_i32_1 = arith.constant 0 : i32
    return %c0_i32, %c0_i32_0 : i32, i32
  }
  func.func @transform_5(%arg0: i32) -> (i32, i32) {
    %c0_i32 = arith.constant 0 : i32
    %c0_i32_0 = arith.constant 0 : i32
    return %arg0, %c0_i32 : i32, i32
  }
  func.func @transform_6(%arg0: i32) -> (i32, i32, i32) {
    %c0_i32 = arith.constant 0 : i32
    %c0_i32_0 = arith.constant 0 : i32
    %c0_i32_1 = arith.constant 0 : i32
    return %arg0, %c0_i32, %c0_i32_0 : i32, i32, i32
  }
}

</mosaic_0001>

<bundles_post_ra>
// kernel: tpu_custom_call.1
= control target key start
LH: loop header
LB: loop body
LE: loop exit
PB: predicated region body
PF: predicated region fallthrough
CT: control target
= control target key end

     0   :  { %11 = vsyncpa [#allocation3], 0  ;;  %s7374_s0 = inlined_call_operand.vmem [shape: f32[512,128], index: 0, kind: input, shape index: {}]   ;;  %s7375_s1 = inlined_call_operand.hbm [shape: bf16[128,128], index: 1, kind: input, shape index: {}]   ;;  %s7376_s2 = inlined_call_operand.vmem [shape: f32[1,128], index: 2, kind: input, shape index: {}]   ;;  %s7377_s3 = inlined_call_operand.hbm [shape: bf16[128,128], index: 3, kind: input, shape index: {}]   ;;  %s7378_s4 = inlined_call_operand.vmem [shape: f32[1,128], index: 4, kind: input, shape index: {}]   ;;  %s7379_s5 = inlined_call_operand.vmem [shape: s32[512,1], index: 5, kind: input, shape index: {}]   ;;  %s7380_s6 = inlined_call_operand.vmem [shape: f32[1,3,128], index: 6, kind: output, shape index: {}]  }
   0x1   :  { %s19_s23 = sshll.u32 %s7375_s1, 4  ;;  %s20_s23 = int_to_ptr.hbm [resolvable:$true] %s19_s23 }
   0x2   :  { %12 = vsyncpa [#allocation5], 0  ;;  %s4046_s24 = smov [#allocation2]   ;;  %s34_s28 = sshll.u32 %s7377_s3, 4  ;;  %s35_s28 = int_to_ptr.hbm [resolvable:$true] %s34_s28 }
   0x3   :  { %s21_s25 = sshll.u32 %s4046_s24, 4  ;;  %s4047_s29 = smov 64   ;;  %s22_s25 = int_to_ptr.vmem [resolvable:$true] %s21_s25 }
   0x4   :  { %s4048_s30 = smov 4   ;;  %s4049_s7 = smov [#allocation4]  }
   0x5   :  { %27 = dma.hbm_to_vmem [thread:$0]  %s20_s23, 1024, %s22_s25, [#allocation3], %s4047_s29, %s4047_s29, %s4048_s30  }
   0x6   :  { %s36_s8 = sshll.u32 %s4049_s7, 4  ;;  %s37_s8 = int_to_ptr.vmem [resolvable:$true] %s36_s8 }
   0x7   :  { %42 = dma.hbm_to_vmem [thread:$0]  %s35_s28, 1024, %s37_s8, [#allocation5], %s4047_s29, %s4047_s29, %s4048_s30  }
   0x8   :  { %4042 = dma.done.wait [#allocation3], 1024  }
   0x9   :  { %4043 = vsyncadd [#allocation3], 4294966272 }
   0xa   :  { %4044 = dma.done.wait [#allocation5], 1024  }
   0xb   :  { %4045 = vsyncadd [#allocation5], 4294966272  ;;  %v4050_v0 = vmov 0   ;;  %v1429_v1 = vld [vmem:[%s7379_s5 + $0x10] sm:$0xff]  ;;  %v1428_v2 = vld [vmem:[%s7379_s5 + $0x8] sm:$0xff] }
   0xc   :  { %3733 = vset.pattern.permute.xlu1 %v4050_v0  ;;  %3732 = vset.pattern.permute.xlu0 %v4050_v0  ;;  %v1427_v3 = vld [vmem:[%s7379_s5] sm:$0xff]  ;;  %v3700_v4 = vld [vmem:[#allocation2 + $0x38] sm:$0xff]  ;;  %v3699_v5 = vld [vmem:[#allocation2 + $0x30] sm:$0xff] }
   0xd   :  { %3731 = vset.pattern.permute.xlu2 %v4050_v0  ;;  %1498 = vperm.xlu1 %3733, %v1429_v1   ;;  %v1432_v6 = vld [vmem:[%s7379_s5 + $0x28] sm:$0xff]  ;;  %v1435_v7 = vld [vmem:[%s7379_s5 + $0x40] sm:$0xff]  ;;  %v1430_v8 = vld [vmem:[%s7379_s5 + $0x18] sm:$0xff] }
   0xe   :  { %1495 = vperm.xlu0 %3732, %v1428_v2   ;;  %1492 = vperm.xlu2 %3731, %v1427_v3   ;;  %v3698_v9 = vld [vmem:[#allocation2 + $0x28] sm:$0xff]  ;;  %v3697_v10 = vld [vmem:[#allocation2 + $0x20] sm:$0xff]  ;;  %v1434_v11 = vld [vmem:[%s7379_s5 + $0x38] sm:$0xff] }
   0xf   :  { %219 = vmatpush.bf16.msra.mxu0 %v3700_v4  ;;  %3709 = vmatpush.bf16.msra.mxu2 %v3700_v4  ;;  %v1438_v12 = vld [vmem:[%s7379_s5 + $0x58] sm:$0xff]  ;;  %v1431_v13 = vld [vmem:[%s7379_s5 + $0x20] sm:$0xff]  ;;  %v3695_v15 = vld [vmem:[#allocation2 + $0x10] sm:$0xff] }
  0x10   :  { %v3696_v14 = vld [vmem:[#allocation2 + $0x18] sm:$0xff]  ;;  %v1437_v16 = vld [vmem:[%s7379_s5 + $0x50] sm:$0xff]  ;;  %v3694_v19 = vld [vmem:[#allocation2 + $0x8] sm:$0xff] }
  0x11   :  { %v1441_v17 = vld [vmem:[%s7379_s5 + $0x70] sm:$0xff]  ;;  %v3693_v20 = vld [vmem:[#allocation2] sm:$0xff]  ;;  %v56_v22 = vld [vmem:[%s7374_s0 + $0x8] sm:$0xff] }
  0x12   :  { %v1433_v18 = vld [vmem:[%s7379_s5 + $0x30] sm:$0xff]  ;;  %v55_v21 = vld [vmem:[%s7374_s0] sm:$0xff]  ;;  %v88_v24 = vld [vmem:[%s7374_s0 + $0x108] sm:$0xff] }
  0x13   :  { %220 = vmatpush.bf16.msra.mxu0 %v3699_v5  ;;  %3710 = vmatpush.bf16.msra.mxu2 %v3699_v5  ;;  %v87_v23 = vld [vmem:[%s7374_s0 + $0x100] sm:$0xff]  ;;  %v1440_v25 = vld [vmem:[%s7379_s5 + $0x68] sm:$0xff]  ;;  %v119_v27 = vpack.c.bf16 %v56_v22, %v55_v21  ;;  %v57_v33 = vld [vmem:[%s7374_s0 + $0x10] sm:$0xff] }
  0x14   :  { %v1444_v26 = vld [vmem:[%s7379_s5 + $0x88] sm:$0xff]  ;;  %v135_v29 = vpack.c.bf16 %v88_v24, %v87_v23  ;;  %v1443_v30 = vld [vmem:[%s7379_s5 + $0x80] sm:$0xff]  ;;  %v58_v34 = vld [vmem:[%s7374_s0 + $0x18] sm:$0xff] }
  0x15   :  { %1507 = vperm.xlu1 %3733, %v1432_v6   ;;  %v1436_v28 = vld [vmem:[%s7379_s5 + $0x48] sm:$0xff]  ;;  %v1447_v31 = vld [vmem:[%s7379_s5 + $0xa0] sm:$0xff]  ;;  %v89_v35 = vld [vmem:[%s7374_s0 + $0x110] sm:$0xff]  ;;  %v120_v39 = vpack.c.bf16 %v58_v34, %v57_v33 }
  0x16   :  { %1516 = vperm.xlu0 %3732, %v1435_v7   ;;  %1501 = vperm.xlu2 %3731, %v1430_v8   ;;  %v1439_v32 = vld [vmem:[%s7379_s5 + $0x60] sm:$0xff]  ;;  %v90_v36 = vld [vmem:[%s7374_s0 + $0x118] sm:$0xff]  ;;  %v1449_v42 = vld [vmem:[%s7379_s5 + $0xb0] sm:$0xff] }
  0x17   :  { %221 = vmatpush.bf16.msra.mxu0 %v3698_v9  ;;  %3711 = vmatpush.bf16.msra.mxu2 %v3698_v9  ;;  %v1446_v37 = vld [vmem:[%s7379_s5 + $0x98] sm:$0xff]  ;;  %v136_v41 = vpack.c.bf16 %v90_v36, %v89_v35  ;;  %v1453_v43 = vld [vmem:[%s7379_s5 + $0xd0] sm:$0xff]  ;;  %v59_v45 = vld [vmem:[%s7374_s0 + $0x20] sm:$0xff] }
  0x18   :  { %v1450_v38 = vld [vmem:[%s7379_s5 + $0xb8] sm:$0xff]  ;;  %v1445_v44 = vld [vmem:[%s7379_s5 + $0x90] sm:$0xff]  ;;  %v60_v46 = vld [vmem:[%s7374_s0 + $0x28] sm:$0xff] }
  0x19   :  { %v1442_v40 = vld [vmem:[%s7379_s5 + $0x78] sm:$0xff]  ;;  %v91_v47 = vld [vmem:[%s7374_s0 + $0x120] sm:$0xff]  ;;  %v92_v48 = vld [vmem:[%s7374_s0 + $0x128] sm:$0xff]  ;;  %v121_v51 = vpack.c.bf16 %v60_v46, %v59_v45 }
  0x1a   :  { %v1452_v49 = vld [vmem:[%s7379_s5 + $0xc8] sm:$0xff]  ;;  %v137_v53 = vpack.c.bf16 %v92_v48, %v91_v47  ;;  %v1455_v54 = vld [vmem:[%s7379_s5 + $0xe0] sm:$0xff]  ;;  %v61_v57 = vld [vmem:[%s7374_s0 + $0x30] sm:$0xff] }
  0x1b   :  { %222 = vmatpush.bf16.msra.mxu0 %v3697_v10  ;;  %3712 = vmatpush.bf16.msra.mxu2 %v3697_v10  ;;  %v1456_v50 = vld [vmem:[%s7379_s5 + $0xe8] sm:$0xff]  ;;  %v1459_v55 = vld [vmem:[%s7379_s5 + $0x100] sm:$0xff]  ;;  %v62_v58 = vld [vmem:[%s7374_s0 + $0x38] sm:$0xff] }
  0x1c   :  { %v1448_v52 = vld [vmem:[%s7379_s5 + $0xa8] sm:$0xff]  ;;  %v1451_v56 = vld [vmem:[%s7379_s5 + $0xc0] sm:$0xff]  ;;  %v93_v59 = vld [vmem:[%s7374_s0 + $0x130] sm:$0xff]  ;;  %v122_v63 = vpack.c.bf16 %v62_v58, %v61_v57 }
  0x1d   :  { %1513 = vperm.xlu1 %3733, %v1434_v11   ;;  %v94_v60 = vld [vmem:[%s7374_s0 + $0x138] sm:$0xff]  ;;  %v1461_v2 = vld [vmem:[%s7379_s5 + $0x110] sm:$0xff]  ;;  %v63_v5 = vld [vmem:[%s7374_s0 + $0x40] sm:$0xff] }
  0x1e   :  { %1525 = vperm.xlu0 %3732, %v1438_v12   ;;  %1504 = vperm.xlu2 %3731, %v1431_v13   ;;  %v1458_v61 = vld [vmem:[%s7379_s5 + $0xf8] sm:$0xff]  ;;  %v138_v1 = vpack.c.bf16 %v94_v60, %v93_v59  ;;  %v1465_v3 = vld [vmem:[%s7379_s5 + $0x130] sm:$0xff]  ;;  %v64_v6 = vld [vmem:[%s7374_s0 + $0x48] sm:$0xff] }
  0x1f   :  { %223 = vmatpush.bf16.msra.mxu0 %v3696_v14  ;;  %3713 = vmatpush.bf16.msra.mxu2 %v3696_v14  ;;  %v1462_v62 = vld [vmem:[%s7379_s5 + $0x118] sm:$0xff]  ;;  %v1457_v4 = vld [vmem:[%s7379_s5 + $0xf0] sm:$0xff]  ;;  %v95_v7 = vld [vmem:[%s7374_s0 + $0x140] sm:$0xff]  ;;  %v123_v11 = vpack.c.bf16 %v64_v6, %v63_v5 }
  0x20   :  { %v1454_v0 = vld [vmem:[%s7379_s5 + $0xd8] sm:$0xff]  ;;  %v96_v8 = vld [vmem:[%s7374_s0 + $0x148] sm:$0xff]  ;;  %v1467_v14 = vld [vmem:[%s7379_s5 + $0x140] sm:$0xff] }
  0x21   :  { %v1464_v9 = vld [vmem:[%s7379_s5 + $0x128] sm:$0xff]  ;;  %v139_v13 = vpack.c.bf16 %v96_v8, %v95_v7  ;;  %v1470_v21 = vld [vmem:[%s7379_s5 + $0x158] sm:$0xff]  ;;  %v67_v33 = vld [vmem:[%s7374_s0 + $0x60] sm:$0xff] }
  0x22   :  { %v1468_v10 = vld [vmem:[%s7379_s5 + $0x148] sm:$0xff]  ;;  %v1474_v22 = vld [vmem:[%s7379_s5 + $0x178] sm:$0xff]  ;;  %v99_v35 = vld [vmem:[%s7374_s0 + $0x160] sm:$0xff] }
  0x23   :  { %224 = vmatpush.bf16.msra.mxu0 %v3695_v15  ;;  %3714 = vmatpush.bf16.msra.mxu2 %v3695_v15  ;;  %v1460_v12 = vld [vmem:[%s7379_s5 + $0x108] sm:$0xff]  ;;  %v1471_v15 = vld [vmem:[%s7379_s5 + $0x160] sm:$0xff]  ;;  %v3708_v24 = vld [vmem:[#allocation4 + $0x38] sm:$0xff] }
  0x24   :  { %552 = vmatpush.bf16.msra.mxu1 %v3708_v24  ;;  %3717 = vmatpush.bf16.msra.mxu3 %v3708_v24  ;;  %v68_v34 = vld [vmem:[%s7374_s0 + $0x68] sm:$0xff]  ;;  %v1483_v45 = vld [vmem:[%s7379_s5 + $0x1c0] sm:$0xff]  ;;  %v1485_v58 = vld [vmem:[%s7379_s5 + $0x1d0] sm:$0xff] }
  0x25   :  { %1522 = vperm.xlu1 %3733, %v1437_v16   ;;  %v1463_v16 = vld [vmem:[%s7379_s5 + $0x120] sm:$0xff]  ;;  %v100_v36 = vld [vmem:[%s7374_s0 + $0x168] sm:$0xff]  ;;  %v1489_v59 = vld [vmem:[%s7379_s5 + $0x1f0] sm:$0xff] }
  0x26   :  { %1534 = vperm.xlu0 %3732, %v1441_v17   ;;  %1510 = vperm.xlu2 %3731, %v1433_v18   ;;  %v65_v17 = vld [vmem:[%s7374_s0 + $0x50] sm:$0xff]  ;;  %v66_v18 = vld [vmem:[%s7374_s0 + $0x58] sm:$0xff]  ;;  %v3702_v46 = vld [vmem:[#allocation4 + $0x8] sm:$0xff] }
  0x27   :  { %225 = vmatpush.bf16.msra.mxu0 %v3694_v19  ;;  %3715 = vmatpush.bf16.msra.mxu2 %v3694_v19  ;;  %v97_v19 = vld [vmem:[%s7374_s0 + $0x150] sm:$0xff]  ;;  %v124_v23 = vpack.c.bf16 %v66_v18, %v65_v17  ;;  %v1475_v47 = vld [vmem:[%s7379_s5 + $0x180] sm:$0xff]  ;;  %v106_v18 = vld [vmem:[%s7374_s0 + $0x198] sm:$0xff] }
  0x28   :  { %v3701_v48 = vld [vmem:[#allocation4] sm:$0xff]  ;;  %v1481_v60 = vld [vmem:[%s7379_s5 + $0x1b0] sm:$0xff]  ;;  %v1490_v24 = vld [vmem:[%s7379_s5 + $0x1f8] sm:$0xff] }
  0x29   :  { %v4390_v6 = vld [vmem:[%s7376_s2] ss:$0 sm:$0xff]  ;;  %v105_v17 = vld [vmem:[%s7374_s0 + $0x190] sm:$0xff] }
  0x2b   :  { %226 = vmatpush.bf16.msra.mxu0 %v3693_v20  ;;  %3716 = vmatpush.bf16.msra.mxu2 %v3693_v20  ;;  %v98_v20 = vld [vmem:[%s7374_s0 + $0x158] sm:$0xff] }
  0x2d   :  { %1531 = vperm.xlu1 %3733, %v1440_v25   ;;  %v1466_v25 = vld [vmem:[%s7379_s5 + $0x138] sm:$0xff] }
  0x2e   :  { %1543 = vperm.xlu0 %3732, %v1444_v26   ;;  %1519 = vperm.xlu2 %3731, %v1436_v28   ;;  %v140_v26 = vpack.c.bf16 %v98_v20, %v97_v19  ;;  %v1473_v28 = vld [vmem:[%s7379_s5 + $0x170] sm:$0xff] }
  0x2f   :  { %227 = vmatmul.bf16.vlgmr.msra.gmra.mxu0 %v119_v27  ;;  %307 = vmatmul.bf16.vlgmr.msra.gmra.mxu2 %v135_v29  ;;  %v3707_v27 = vld [vmem:[#allocation4 + $0x30] sm:$0xff] }
  0x30   :  { %553 = vmatpush.bf16.msra.mxu1 %v3707_v27  ;;  %3718 = vmatpush.bf16.msra.mxu3 %v3707_v27  ;;  %v1477_v29 = vld [vmem:[%s7379_s5 + $0x190] sm:$0xff] }
  0x35   :  { %1540 = vperm.xlu1 %3733, %v1443_v30   ;;  %v3706_v30 = vld [vmem:[#allocation4 + $0x28] sm:$0xff] }
  0x36   :  { %1552 = vperm.xlu0 %3732, %v1447_v31   ;;  %1528 = vperm.xlu2 %3731, %v1439_v32   ;;  %v1469_v31 = vld [vmem:[%s7379_s5 + $0x150] sm:$0xff]  ;;  %v3705_v32 = vld [vmem:[#allocation4 + $0x20] sm:$0xff] }
  0x37   :  { %554 = vmatpush.bf16.msra.mxu1 %v3706_v30  ;;  %3719 = vmatpush.bf16.msra.mxu3 %v3706_v30 }
  0x3b   :  { %555 = vmatpush.bf16.msra.mxu1 %v3705_v32  ;;  %3720 = vmatpush.bf16.msra.mxu3 %v3705_v32 }
  0x3d   :  { %1549 = vperm.xlu1 %3733, %v1446_v37   ;;  %v1476_v37 = vld [vmem:[%s7379_s5 + $0x188] sm:$0xff] }
  0x3e   :  { %1561 = vperm.xlu0 %3732, %v1450_v38   ;;  %1537 = vperm.xlu2 %3731, %v1442_v40   ;;  %v1480_v38 = vld [vmem:[%s7379_s5 + $0x1a8] sm:$0xff]  ;;  %v3704_v40 = vld [vmem:[#allocation4 + $0x18] sm:$0xff] }
  0x3f   :  { %232 = vmatmul.bf16.gmra.mxu0 %v120_v39  ;;  %312 = vmatmul.bf16.gmra.mxu2 %v136_v41  ;;  %v125_v39 = vpack.c.bf16 %v68_v34, %v67_v33  ;;  %v1472_v41 = vld [vmem:[%s7379_s5 + $0x168] sm:$0xff] }
  0x40   :  { %556 = vmatpush.bf16.msra.mxu1 %v3704_v40  ;;  %3721 = vmatpush.bf16.msra.mxu3 %v3704_v40 }
  0x45   :  { %1558 = vperm.xlu1 %3733, %v1449_v42   ;;  %v141_v42 = vpack.c.bf16 %v100_v36, %v99_v35  ;;  %v75_v35 = vld [vmem:[%s7374_s0 + $0xa0] sm:$0xff]  ;;  %v76_v36 = vld [vmem:[%s7374_s0 + $0xa8] sm:$0xff] }
  0x46   :  { %1570 = vperm.xlu0 %3732, %v1453_v43   ;;  %1546 = vperm.xlu2 %3731, %v1445_v44   ;;  %v3703_v43 = vld [vmem:[#allocation4 + $0x10] sm:$0xff]  ;;  %v1479_v44 = vld [vmem:[%s7379_s5 + $0x1a0] sm:$0xff] }
  0x47   :  { %557 = vmatpush.bf16.msra.mxu1 %v3703_v43  ;;  %3722 = vmatpush.bf16.msra.mxu3 %v3703_v43 }
  0x4b   :  { %558 = vmatpush.bf16.msra.mxu1 %v3702_v46  ;;  %3723 = vmatpush.bf16.msra.mxu3 %v3702_v46 }
  0x4d   :  { %1567 = vperm.xlu1 %3733, %v1452_v49   ;;  %v69_v49 = vld [vmem:[%s7374_s0 + $0x70] sm:$0xff] }
  0x4e   :  { %1579 = vperm.xlu0 %3732, %v1456_v50   ;;  %1555 = vperm.xlu2 %3731, %v1448_v52   ;;  %v70_v50 = vld [vmem:[%s7374_s0 + $0x78] sm:$0xff] }
  0x4f   :  { %237 = vmatmul.bf16.gmra.mxu0 %v121_v51  ;;  %317 = vmatmul.bf16.gmra.mxu2 %v137_v53  ;;  %v101_v51 = vld [vmem:[%s7374_s0 + $0x170] sm:$0xff]  ;;  %v102_v52 = vld [vmem:[%s7374_s0 + $0x178] sm:$0xff] }
  0x50   :  { %559 = vmatpush.bf16.msra.mxu1 %v3701_v48  ;;  %3724 = vmatpush.bf16.msra.mxu3 %v3701_v48  ;;  %v1482_v53 = vld [vmem:[%s7379_s5 + $0x1b8] sm:$0xff]  ;;  %v142_v57 = vpack.c.bf16 %v102_v52, %v101_v51 }
  0x55   :  { %1576 = vperm.xlu1 %3733, %v1455_v54   ;;  %v1486_v54 = vld [vmem:[%s7379_s5 + $0x1d8] sm:$0xff] }
  0x56   :  { %1588 = vperm.xlu0 %3732, %v1459_v55   ;;  %1564 = vperm.xlu2 %3731, %v1451_v56   ;;  %v126_v55 = vpack.c.bf16 %v70_v50, %v69_v49  ;;  %v1478_v56 = vld [vmem:[%s7379_s5 + $0x198] sm:$0xff] }
  0x5d   :  { %1585 = vperm.xlu1 %3733, %v1458_v61   ;;  %v71_v61 = vld [vmem:[%s7374_s0 + $0x80] sm:$0xff] }
  0x5e   :  { %1597 = vperm.xlu0 %3732, %v1462_v62   ;;  %1573 = vperm.xlu2 %3731, %v1454_v0   ;;  %v72_v62 = vld [vmem:[%s7374_s0 + $0x88] sm:$0xff] }
  0x5f   :  { %242 = vmatmul.bf16.gmra.mxu0 %v122_v63  ;;  %322 = vmatmul.bf16.gmra.mxu2 %v138_v1  ;;  %v103_v63 = vld [vmem:[%s7374_s0 + $0x180] sm:$0xff]  ;;  %v104_v0 = vld [vmem:[%s7374_s0 + $0x188] sm:$0xff] }
  0x60   :  { %v1488_v1 = vld [vmem:[%s7379_s5 + $0x1e8] sm:$0xff]  ;;  %v143_v5 = vpack.c.bf16 %v104_v0, %v103_v63  ;;  %v77_v63 = vld [vmem:[%s7374_s0 + $0xb0] sm:$0xff]  ;;  %v78_v0 = vld [vmem:[%s7374_s0 + $0xb8] sm:$0xff] }
  0x65   :  { %1594 = vperm.xlu1 %3733, %v1461_v2   ;;  %v127_v2 = vpack.c.bf16 %v72_v62, %v71_v61 }
  0x66   :  { %1606 = vperm.xlu0 %3732, %v1465_v3   ;;  %1582 = vperm.xlu2 %3731, %v1457_v4   ;;  %v1484_v4 = vld [vmem:[%s7379_s5 + $0x1c8] sm:$0xff] }
  0x6d   :  { %1603 = vperm.xlu1 %3733, %v1464_v9  }
  0x6e   :  { %1615 = vperm.xlu0 %3732, %v1468_v10   ;;  %1591 = vperm.xlu2 %3731, %v1460_v12   ;;  %v1487_v10 = vld [vmem:[%s7379_s5 + $0x1e0] sm:$0xff] }
  0x6f   :  { %247 = vmatmul.bf16.gmra.mxu0 %v123_v11  ;;  %327 = vmatmul.bf16.gmra.mxu2 %v139_v13 }
  0x75   :  { %1612 = vperm.xlu1 %3733, %v1467_v14   ;;  %v73_v14 = vld [vmem:[%s7374_s0 + $0x90] sm:$0xff] }
  0x76   :  { %1624 = vperm.xlu0 %3732, %v1471_v15   ;;  %1600 = vperm.xlu2 %3731, %v1463_v16   ;;  %v74_v15 = vld [vmem:[%s7374_s0 + $0x98] sm:$0xff] }
  0x7d   :  { %1621 = vperm.xlu1 %3733, %v1470_v21   ;;  %v128_v21 = vpack.c.bf16 %v74_v15, %v73_v14 }
  0x7e   :  { %1633 = vperm.xlu0 %3732, %v1474_v22   ;;  %1609 = vperm.xlu2 %3731, %v1466_v25   ;;  %v144_v25 = vpack.c.bf16 %v106_v18, %v105_v17 }
  0x7f   :  { %252 = vmatmul.bf16.gmra.mxu0 %v124_v23  ;;  %332 = vmatmul.bf16.gmra.mxu2 %v140_v26 }
  0x80   :  { %v4452_v14 = vpop.permute.xlu0 %1495 }
  0x81   :  { %7818 = vst [vmem:[#allocation10_spill] sm:$0xff] %v4452_v14 }
  0x85   :  { %1630 = vperm.xlu1 %3733, %v1473_v28  }
  0x86   :  { %1642 = vperm.xlu0 %3732, %v1477_v29   ;;  %1618 = vperm.xlu2 %3731, %v1469_v31  }
  0x8d   :  { %1639 = vperm.xlu1 %3733, %v1476_v37  }
  0x8e   :  { %1651 = vperm.xlu0 %3732, %v1480_v38   ;;  %1627 = vperm.xlu2 %3731, %v1472_v41   ;;  %v107_v38 = vld [vmem:[%s7374_s0 + $0x1a0] sm:$0xff] }
  0x8f   :  { %257 = vmatmul.bf16.gmra.mxu0 %v125_v39  ;;  %337 = vmatmul.bf16.gmra.mxu2 %v141_v42  ;;  %v108_v39 = vld [vmem:[%s7374_s0 + $0x1a8] sm:$0xff]  ;;  %v129_v42 = vpack.c.bf16 %v76_v36, %v75_v35 }
  0x95   :  { %1648 = vperm.xlu1 %3733, %v1479_v44  }
  0x96   :  { %1660 = vperm.xlu0 %3732, %v1483_v45   ;;  %1636 = vperm.xlu2 %3731, %v1475_v47   ;;  %v145_v45 = vpack.c.bf16 %v108_v39, %v107_v38 }
  0x9d   :  { %1657 = vperm.xlu1 %3733, %v1482_v53  }
  0x9e   :  { %1669 = vperm.xlu0 %3732, %v1486_v54   ;;  %1645 = vperm.xlu2 %3731, %v1478_v56   ;;  %v4432_v54 = vpop.permute.xlu2 %1492 }
  0x9f   :  { %262 = vmatmul.bf16.gmra.mxu0 %v126_v55  ;;  %342 = vmatmul.bf16.gmra.mxu2 %v142_v57  ;;  %7816 = vst [vmem:[#allocation8_spill] sm:$0xff] %v4432_v54 }
  0xa5   :  { %1666 = vperm.xlu1 %3733, %v1485_v58  }
  0xa6   :  { %1678 = vperm.xlu0 %3732, %v1489_v59   ;;  %1654 = vperm.xlu2 %3731, %v1481_v60  }
  0xac   :  { %v228_v3 = vpop.f32.mrf.mxu0 }
  0xad   :  { %1675 = vperm.xlu1 %3733, %v1488_v1   ;;  %v229_v7 = vadd.f32 %v4390_v6, %v228_v3  ;;  %v4442_v3 = vpop.permute.xlu2 %1501 }
  0xae   :  { %1663 = vperm.xlu2 %3731, %v1484_v4   ;;  %7817 = vst [vmem:[#allocation9_spill] sm:$0xff] %v4442_v3 }
  0xaf   :  { %267 = vmatmul.bf16.gmra.mxu0 %v127_v2  ;;  %347 = vmatmul.bf16.gmra.mxu2 %v143_v5  ;;  %v388_v12 = vmax.f32 %v229_v7, 0.0  ;;  %v130_v2 = vpack.c.bf16 %v78_v0, %v77_v63  ;;  %v109_v7 = vld [vmem:[%s7374_s0 + $0x1b0] sm:$0xff] }
  0xb2   :  { %v308_v8 = vpop.f32.mrf.mxu2 }
  0xb3   :  { %v309_v19 = vadd.f32 %v4390_v6, %v308_v8  ;;  %v110_v8 = vld [vmem:[%s7374_s0 + $0x1b8] sm:$0xff] }
  0xb4   :  { %v230_v9 = vpop.f32.mrf.mxu0 }
  0xb5   :  { %v231_v11 = vadd.f32 %v4390_v6, %v230_v9  ;;  %v420_v26 = vmax.f32 %v309_v19, 0.0  ;;  %v4455_v17 = vpop.permute.xlu2 %1504 }
  0xb6   :  { %1672 = vperm.xlu2 %3731, %v1487_v10   ;;  %v146_v10 = vpack.c.bf16 %v110_v8, %v109_v7  ;;  %7819 = vst [vmem:[#allocation11_spill] sm:$0xff] %v4455_v17 }
  0xb7   :  { %v389_v13 = vmax.f32 %v231_v11, 0.0 }
  0xb9   :  { %v452_v16 = vpack.c.bf16 %v389_v13, %v388_v12 }
  0xba   :  { %v310_v20 = vpop.f32.mrf.mxu2 }
  0xbb   :  { %560 = vmatmul.bf16.vlgmr.msra.gmra.mxu1 %v452_v16  ;;  %v311_v22 = vadd.f32 %v4390_v6, %v310_v20 }
  0xbc   :  { %v233_v23 = vpop.f32.mrf.mxu0 }
  0xbd   :  { %v421_v27 = vmax.f32 %v311_v22, 0.0  ;;  %v234_v29 = vadd.f32 %v4390_v6, %v233_v23 }
  0xbe   :  { %1681 = vperm.xlu2 %3731, %v1490_v24  }
  0xbf   :  { %272 = vmatmul.bf16.gmra.mxu0 %v128_v21  ;;  %v468_v28 = vpack.c.bf16 %v421_v27, %v420_v26  ;;  %352 = vmatmul.bf16.gmra.mxu2 %v144_v25  ;;  %v390_v32 = vmax.f32 %v234_v29, 0.0  ;;  %v4458_v21 = vpop.permute.xlu1 %1498  ;;  %v4461_v26 = vpop.permute.xlu0 %1516 }
  0xc0   :  { %7820 = vst [vmem:[#allocation12_spill] sm:$0xff] %v4458_v21  ;;  %v4463_v29 = vpop.permute.xlu2 %1510 }
  0xc1   :  { %640 = vmatmul.bf16.vlgmr.msra.gmra.mxu3 %v468_v28  ;;  %7821 = vst [vmem:[#allocation13_spill] sm:$0xff] %v4461_v26 }
  0xc2   :  { %v313_v30 = vpop.f32.mrf.mxu2  ;;  %7822 = vst [vmem:[#allocation14_spill] sm:$0xff] %v4463_v29 }
  0xc3   :  { %v314_v40 = vadd.f32 %v4390_v6, %v313_v30 }
  0xc4   :  { %v235_v31 = vpop.f32.mrf.mxu0 }
  0xc5   :  { %v236_v33 = vadd.f32 %v4390_v6, %v235_v31  ;;  %v422_v46 = vmax.f32 %v314_v40, 0.0 }
  0xc7   :  { %v391_v34 = vmax.f32 %v236_v33, 0.0  ;;  %v112_v33 = vld [vmem:[%s7374_s0 + $0x1c8] sm:$0xff]  ;;  %v4472_v35 = vpop.permute.xlu1 %1507  ;;  %v4475_v40 = vpop.permute.xlu0 %1525 }
  0xc8   :  { %7823 = vst [vmem:[#allocation15_spill] sm:$0xff] %v4472_v35 }
  0xc9   :  { %v453_v37 = vpack.c.bf16 %v391_v34, %v390_v32  ;;  %v111_v32 = vld [vmem:[%s7374_s0 + $0x1c0] sm:$0xff]  ;;  %7824 = vst [vmem:[#allocation16_spill] sm:$0xff] %v4475_v40 }
  0xca   :  { %v315_v41 = vpop.f32.mrf.mxu2  ;;  %v147_v34 = vpack.c.bf16 %v112_v33, %v111_v32 }
  0xcb   :  { %565 = vmatmul.bf16.gmra.mxu1 %v453_v37  ;;  %v316_v43 = vadd.f32 %v4390_v6, %v315_v41 }
  0xcc   :  { %v238_v44 = vpop.f32.mrf.mxu0 }
  0xcd   :  { %v423_v47 = vmax.f32 %v316_v43, 0.0  ;;  %v239_v49 = vadd.f32 %v4390_v6, %v238_v44 }
  0xcf   :  { %277 = vmatmul.bf16.gmra.mxu0 %v129_v42  ;;  %v469_v48 = vpack.c.bf16 %v423_v47, %v422_v46  ;;  %357 = vmatmul.bf16.gmra.mxu2 %v145_v45  ;;  %v392_v52 = vmax.f32 %v239_v49, 0.0  ;;  %v4478_v45 = vpop.permute.xlu2 %1519  ;;  %v79_v46 = vld [vmem:[%s7374_s0 + $0xc0] sm:$0xff]  ;;  %v80_v47 = vld [vmem:[%s7374_s0 + $0xc8] sm:$0xff] }
  0xd0   :  { %7825 = vst [vmem:[#allocation17_spill] sm:$0xff] %v4478_v45  ;;  %v131_v49 = vpack.c.bf16 %v80_v47, %v79_v46 }
  0xd1   :  { %645 = vmatmul.bf16.gmra.mxu3 %v469_v48 }
  0xd2   :  { %v318_v50 = vpop.f32.mrf.mxu2 }
  0xd3   :  { %v319_v57 = vadd.f32 %v4390_v6, %v318_v50  ;;  %v4486_v50 = vpop.permute.xlu1 %1513 }
  0xd4   :  { %v240_v51 = vpop.f32.mrf.mxu0  ;;  %7826 = vst [vmem:[#allocation18_spill] sm:$0xff] %v4486_v50 }
  0xd5   :  { %v241_v53 = vadd.f32 %v4390_v6, %v240_v51  ;;  %v424_v61 = vmax.f32 %v319_v57, 0.0  ;;  %v4490_v57 = vpop.permute.xlu0 %1534 }
  0xd6   :  { %7827 = vst [vmem:[#allocation19_spill] sm:$0xff] %v4490_v57 }
  0xd7   :  { %v393_v55 = vmax.f32 %v241_v53, 0.0 }
  0xd9   :  { %v454_v56 = vpack.c.bf16 %v393_v55, %v392_v52 }
  0xda   :  { %v320_v58 = vpop.f32.mrf.mxu2 }
  0xdb   :  { %570 = vmatmul.bf16.gmra.mxu1 %v454_v56  ;;  %v321_v59 = vadd.f32 %v4390_v6, %v320_v58 }
  0xdc   :  { %v243_v60 = vpop.f32.mrf.mxu0 }
  0xdd   :  { %v425_v62 = vmax.f32 %v321_v59, 0.0  ;;  %v244_v4 = vadd.f32 %v4390_v6, %v243_v60  ;;  %v4492_v59 = vpop.permute.xlu2 %1528 }
  0xde   :  { %7828 = vst [vmem:[#allocation20_spill] sm:$0xff] %v4492_v59 }
  0xdf   :  { %v470_v1 = vpack.c.bf16 %v425_v62, %v424_v61  ;;  %282 = vmatmul.bf16.gmra.mxu0 %v130_v2  ;;  %v394_v11 = vmax.f32 %v244_v4, 0.0  ;;  %362 = vmatmul.bf16.gmra.mxu2 %v146_v10  ;;  %v4495_v62 = vpop.permute.xlu1 %1522  ;;  %v82_v10 = vld [vmem:[%s7374_s0 + $0xd8] sm:$0xff] }
  0xe0   :  { %7829 = vst [vmem:[#allocation21_spill] sm:$0xff] %v4495_v62 }
  0xe1   :  { %650 = vmatmul.bf16.gmra.mxu3 %v470_v1 }
  0xe2   :  { %v323_v5 = vpop.f32.mrf.mxu2 }
  0xe3   :  { %v324_v16 = vadd.f32 %v4390_v6, %v323_v5  ;;  %v4498_v5 = vpop.permute.xlu0 %1543 }
  0xe4   :  { %v245_v9 = vpop.f32.mrf.mxu0  ;;  %7830 = vst [vmem:[#allocation22_spill] sm:$0xff] %v4498_v5 }
  0xe5   :  { %v246_v12 = vadd.f32 %v4390_v6, %v245_v9  ;;  %v426_v22 = vmax.f32 %v324_v16, 0.0  ;;  %v81_v9 = vld [vmem:[%s7374_s0 + $0xd0] sm:$0xff]  ;;  %v114_v16 = vld [vmem:[%s7374_s0 + $0x1d8] sm:$0xff] }
  0xe7   :  { %v395_v13 = vmax.f32 %v246_v12, 0.0  ;;  %v4507_v12 = vpop.permute.xlu2 %1537 }
  0xe8   :  { %7831 = vst [vmem:[#allocation23_spill] sm:$0xff] %v4507_v12 }
  0xe9   :  { %v455_v15 = vpack.c.bf16 %v395_v13, %v394_v11  ;;  %v132_v11 = vpack.c.bf16 %v82_v10, %v81_v9  ;;  %v115_v10 = vld [vmem:[%s7374_s0 + $0x1e0] sm:$0xff] }
  0xea   :  { %v325_v18 = vpop.f32.mrf.mxu2 }
  0xeb   :  { %575 = vmatmul.bf16.gmra.mxu1 %v455_v15  ;;  %v326_v19 = vadd.f32 %v4390_v6, %v325_v18  ;;  %v113_v15 = vld [vmem:[%s7374_s0 + $0x1d0] sm:$0xff] }
  0xec   :  { %v248_v20 = vpop.f32.mrf.mxu0 }
  0xed   :  { %v427_v23 = vmax.f32 %v326_v19, 0.0  ;;  %v249_v25 = vadd.f32 %v4390_v6, %v248_v20  ;;  %v148_v19 = vpack.c.bf16 %v114_v16, %v113_v15  ;;  %v4515_v20 = vpop.permute.xlu1 %1531 }
  0xee   :  { %7832 = vst [vmem:[#allocation24_spill] sm:$0xff] %v4515_v20 }
  0xef   :  { %v471_v24 = vpack.c.bf16 %v427_v23, %v426_v22  ;;  %v396_v30 = vmax.f32 %v249_v25, 0.0  ;;  %367 = vmatmul.bf16.gmra.mxu2 %v147_v34  ;;  %287 = vmatmul.bf16.gmra.mxu0 %v131_v49  ;;  %v4522_v33 = vpop.permute.xlu2 %1546 }
  0xf0   :  { %7834 = vst [vmem:[#allocation26_spill] sm:$0xff] %v4522_v33 }
  0xf1   :  { %655 = vmatmul.bf16.gmra.mxu3 %v471_v24 }
  0xf2   :  { %v328_v27 = vpop.f32.mrf.mxu2 }
  0xf3   :  { %v329_v38 = vadd.f32 %v4390_v6, %v328_v27  ;;  %v4518_v27 = vpop.permute.xlu0 %1552 }
  0xf4   :  { %v250_v28 = vpop.f32.mrf.mxu0  ;;  %7833 = vst [vmem:[#allocation25_spill] sm:$0xff] %v4518_v27 }
  0xf5   :  { %v251_v31 = vadd.f32 %v4390_v6, %v250_v28  ;;  %v428_v43 = vmax.f32 %v329_v38, 0.0 }
  0xf7   :  { %v397_v36 = vmax.f32 %v251_v31, 0.0  ;;  %v4530_v47 = vpop.permute.xlu2 %1555 }
  0xf8   :  { %7837 = vst [vmem:[#allocation29_spill] sm:$0xff] %v4530_v47 }
  0xf9   :  { %v456_v37 = vpack.c.bf16 %v397_v36, %v396_v30 }
  0xfa   :  { %v330_v39 = vpop.f32.mrf.mxu2 }
  0xfb   :  { %580 = vmatmul.bf16.gmra.mxu1 %v456_v37  ;;  %v331_v41 = vadd.f32 %v4390_v6, %v330_v39  ;;  %v4524_v37 = vpop.permute.xlu1 %1540 }
  0xfc   :  { %v253_v42 = vpop.f32.mrf.mxu0  ;;  %7835 = vst [vmem:[#allocation27_spill] sm:$0xff] %v4524_v37 }
  0xfd   :  { %v429_v44 = vmax.f32 %v331_v41, 0.0  ;;  %v254_v51 = vadd.f32 %v4390_v6, %v253_v42  ;;  %v4527_v42 = vpop.permute.xlu0 %1561 }
  0xfe   :  { %7836 = vst [vmem:[#allocation28_spill] sm:$0xff] %v4527_v42 }
  0xff   :  { %v472_v48 = vpack.c.bf16 %v429_v44, %v428_v43  ;;  %v398_v55 = vmax.f32 %v254_v51, 0.0  ;;  %292 = vmatmul.bf16.gmra.mxu0 %v132_v11  ;;  %372 = vmatmul.bf16.gmra.mxu2 %v148_v19  ;;  %v116_v11 = vld [vmem:[%s7374_s0 + $0x1e8] sm:$0xff]  ;;  %v4559_v19 = vld [vmem:[%s7378_s4] ss:$0 sm:$0xff] }
 0x100   :  { %v149_v15 = vpack.c.bf16 %v116_v11, %v115_v10 }
 0x101   :  { %660 = vmatmul.bf16.gmra.mxu3 %v472_v48 }
 0x102   :  { %v333_v52 = vpop.f32.mrf.mxu2 }
 0x103   :  { %v334_v61 = vadd.f32 %v4390_v6, %v333_v52  ;;  %v4532_v49 = vpop.permute.xlu1 %1549 }
 0x104   :  { %v255_v53 = vpop.f32.mrf.mxu0  ;;  %7838 = vst [vmem:[#allocation30_spill] sm:$0xff] %v4532_v49 }
 0x105   :  { %v256_v56 = vadd.f32 %v4390_v6, %v255_v53  ;;  %v430_v2 = vmax.f32 %v334_v61, 0.0 }
 0x107   :  { %v399_v58 = vmax.f32 %v256_v56, 0.0 }
 0x109   :  { %v457_v60 = vpack.c.bf16 %v399_v58, %v398_v55  ;;  %v4536_v58 = vpop.permute.xlu0 %1570 }
 0x10a   :  { %v335_v63 = vpop.f32.mrf.mxu2  ;;  %7839 = vst [vmem:[#allocation31_spill] sm:$0xff] %v4536_v58 }
 0x10b   :  { %585 = vmatmul.bf16.gmra.mxu1 %v457_v60  ;;  %v336_v0 = vadd.f32 %v4390_v6, %v335_v63  ;;  %v83_v63 = vld [vmem:[%s7374_s0 + $0xe0] sm:$0xff] }
 0x10c   :  { %v258_v1 = vpop.f32.mrf.mxu0 }
 0x10d   :  { %v431_v4 = vmax.f32 %v336_v0, 0.0  ;;  %v259_v8 = vadd.f32 %v4390_v6, %v258_v1  ;;  %v84_v0 = vld [vmem:[%s7374_s0 + $0xe8] sm:$0xff] }
 0x10f   :  { %v473_v7 = vpack.c.bf16 %v431_v4, %v430_v2  ;;  %v400_v22 = vmax.f32 %v259_v8, 0.0  ;;  %v133_v2 = vpack.c.bf16 %v84_v0, %v83_v63  ;;  %v4544_v4 = vpop.permute.xlu2 %1564  ;;  %v4547_v8 = vpop.permute.xlu1 %1558  ;;  %377 = vmatmul.bf16.gmra.mxu2 %v149_v15  ;;  %v117_v63 = vld [vmem:[%s7374_s0 + $0x1f0] sm:$0xff]  ;;  %v118_v0 = vld [vmem:[%s7374_s0 + $0x1f8] sm:$0xff] }
 0x110   :  { %7840 = vst [vmem:[#allocation32_spill] sm:$0xff] %v4544_v4 }
 0x111   :  { %665 = vmatmul.bf16.gmra.mxu3 %v473_v7  ;;  %297 = vmatmul.bf16.gmra.mxu0 %v133_v2  ;;  %7841 = vst [vmem:[#allocation33_spill] sm:$0xff] %v4547_v8  ;;  %v150_v2 = vpack.c.bf16 %v118_v0, %v117_v63 }
 0x112   :  { %v338_v13 = vpop.f32.mrf.mxu2 }
 0x113   :  { %v339_v28 = vadd.f32 %v4390_v6, %v338_v13 }
 0x114   :  { %v260_v18 = vpop.f32.mrf.mxu0 }
 0x115   :  { %v261_v23 = vadd.f32 %v4390_v6, %v260_v18  ;;  %v432_v34 = vmax.f32 %v339_v28, 0.0 }
 0x117   :  { %v401_v24 = vmax.f32 %v261_v23, 0.0  ;;  %v4561_v23 = vpop.permute.xlu0 %1579 }
 0x118   :  { %7842 = vst [vmem:[#allocation34_spill] sm:$0xff] %v4561_v23 }
 0x119   :  { %v458_v25 = vpack.c.bf16 %v401_v24, %v400_v22 }
 0x11a   :  { %v340_v30 = vpop.f32.mrf.mxu2 }
 0x11b   :  { %590 = vmatmul.bf16.gmra.mxu1 %v458_v25  ;;  %v341_v31 = vadd.f32 %v4390_v6, %v340_v30 }
 0x11c   :  { %v263_v32 = vpop.f32.mrf.mxu0 }
 0x11d   :  { %v433_v36 = vmax.f32 %v341_v31, 0.0  ;;  %v264_v39 = vadd.f32 %v4390_v6, %v263_v32  ;;  %v4567_v31 = vpop.permute.xlu2 %1573 }
 0x11e   :  { %7844 = vst [vmem:[#allocation36_spill] sm:$0xff] %v4567_v31 }
 0x11f   :  { %v474_v38 = vpack.c.bf16 %v433_v36, %v432_v34  ;;  %v402_v44 = vmax.f32 %v264_v39, 0.0  ;;  %v4571_v39 = vpop.permute.xlu1 %1567  ;;  %382 = vmatmul.bf16.gmra.mxu2 %v150_v2 }
 0x120   :  { %7845 = vst [vmem:[#allocation37_spill] sm:$0xff] %v4571_v39 }
 0x121   :  { %670 = vmatmul.bf16.gmra.mxu3 %v474_v38 }
 0x122   :  { %v343_v41 = vpop.f32.mrf.mxu2 }
 0x123   :  { %v344_v52 = vadd.f32 %v4390_v6, %v343_v41 }
 0x124   :  { %v265_v43 = vpop.f32.mrf.mxu0 }
 0x125   :  { %v266_v46 = vadd.f32 %v4390_v6, %v265_v43  ;;  %v434_v60 = vmax.f32 %v344_v52, 0.0 }
 0x127   :  { %v403_v48 = vmax.f32 %v266_v46, 0.0 }
 0x129   :  { %v459_v51 = vpack.c.bf16 %v403_v48, %v402_v44 }
 0x12a   :  { %v345_v53 = vpop.f32.mrf.mxu2 }
 0x12b   :  { %595 = vmatmul.bf16.gmra.mxu1 %v459_v51  ;;  %v346_v55 = vadd.f32 %v4390_v6, %v345_v53  ;;  %v4577_v51 = vpop.permute.xlu0 %1588 }
 0x12c   :  { %v268_v56 = vpop.f32.mrf.mxu0  ;;  %7847 = vst [vmem:[#allocation39_spill] sm:$0xff] %v4577_v51 }
 0x12d   :  { %v435_v61 = vmax.f32 %v346_v55, 0.0  ;;  %v269_v7 = vadd.f32 %v4390_v6, %v268_v56  ;;  %v4580_v55 = vpop.permute.xlu2 %1582 }
 0x12e   :  { %7848 = vst [vmem:[#allocation40_spill] sm:$0xff] %v4580_v55 }
 0x12f   :  { %v475_v1 = vpack.c.bf16 %v435_v61, %v434_v60  ;;  %v404_v16 = vmax.f32 %v269_v7, 0.0  ;;  %v4592_v7 = vpop.permute.xlu1 %1576 }
 0x130   :  { %7850 = vst [vmem:[#allocation42_spill] sm:$0xff] %v4592_v7 }
 0x131   :  { %675 = vmatmul.bf16.gmra.mxu3 %v475_v1 }
 0x132   :  { %v348_v9 = vpop.f32.mrf.mxu2 }
 0x133   :  { %v349_v24 = vadd.f32 %v4390_v6, %v348_v9 }
 0x134   :  { %v270_v13 = vpop.f32.mrf.mxu0 }
 0x135   :  { %v271_v18 = vadd.f32 %v4390_v6, %v270_v13  ;;  %v436_v34 = vmax.f32 %v349_v24, 0.0 }
 0x137   :  { %v405_v22 = vmax.f32 %v271_v18, 0.0  ;;  %v4600_v18 = vpop.permute.xlu0 %1597 }
 0x138   :  { %v561_v25 = vpop.f32.mrf.mxu1  ;;  %7852 = vst [vmem:[#allocation44_spill] sm:$0xff] %v4600_v18 }
 0x139   :  { %v4565_v28 = vadd.f32 %v4559_v19, %v561_v25  ;;  %v460_v30 = vpack.c.bf16 %v405_v22, %v404_v16 }
 0x13a   :  { %v350_v32 = vpop.f32.mrf.mxu2 }
 0x13b   :  { %7843 = vst [vmem:[#allocation35_spill] sm:$0xff] %v4565_v28  ;;  %721 = vmax.xlane.f32.xlu0 %v4565_v28  ;;  %600 = vmatmul.bf16.gmra.mxu1 %v460_v30  ;;  %v351_v36 = vadd.f32 %v4390_v6, %v350_v32 }
 0x13c   :  { %v273_v38 = vpop.f32.mrf.mxu0 }
 0x13d   :  { %v437_v41 = vmax.f32 %v351_v36, 0.0  ;;  %v274_v48 = vadd.f32 %v4390_v6, %v273_v38  ;;  %v4606_v36 = vpop.permute.xlu2 %1591  ;;  %v85_v38 = vld [vmem:[%s7374_s0 + $0xf0] sm:$0xff] }
 0x13e   :  { %7854 = vst [vmem:[#allocation46_spill] sm:$0xff] %v4606_v36 }
 0x13f   :  { %v476_v44 = vpack.c.bf16 %v437_v41, %v436_v34  ;;  %v406_v60 = vmax.f32 %v274_v48, 0.0  ;;  %v86_v41 = vld [vmem:[%s7374_s0 + $0xf8] sm:$0xff] }
 0x140   :  { %v563_v43 = vpop.f32.mrf.mxu1  ;;  %v134_v48 = vpack.c.bf16 %v86_v41, %v85_v38 }
 0x141   :  { %v4574_v46 = vadd.f32 %v4559_v19, %v563_v43  ;;  %680 = vmatmul.bf16.gmra.mxu3 %v476_v44 }
 0x142   :  { %v353_v52 = vpop.f32.mrf.mxu2  ;;  %302 = vmatmul.bf16.gmra.mxu0 %v134_v48 }
 0x143   :  { %7846 = vst [vmem:[#allocation38_spill] sm:$0xff] %v4574_v46  ;;  %723 = vmax.xlane.f32.xlu0 %v4574_v46  ;;  %v354_v11 = vadd.f32 %v4390_v6, %v353_v52  ;;  %v4615_v52 = vpop.permute.xlu1 %1585 }
 0x144   :  { %v275_v53 = vpop.f32.mrf.mxu0  ;;  %v641_v56 = vpop.f32.mrf.mxu3  ;;  %7855 = vst [vmem:[#allocation47_spill] sm:$0xff] %v4615_v52 }
 0x145   :  { %v276_v61 = vadd.f32 %v4390_v6, %v275_v53  ;;  %v4590_v1 = vadd.f32 %v4559_v19, %v641_v56  ;;  %v438_v22 = vmax.f32 %v354_v11, 0.0 }
 0x147   :  { %7849 = vst [vmem:[#allocation41_spill] sm:$0xff] %v4590_v1  ;;  %v407_v9 = vmax.f32 %v276_v61, 0.0  ;;  %785 = vmax.xlane.f32.xlu2 %v4590_v1 }
 0x148   :  { %v566_v10 = vpop.f32.mrf.mxu1 }
 0x149   :  { %v4597_v13 = vadd.f32 %v4559_v19, %v566_v10  ;;  %v461_v15 = vpack.c.bf16 %v407_v9, %v406_v60  ;;  %v4623_v9 = vpop.permute.xlu0 %1606 }
 0x14a   :  { %v355_v16 = vpop.f32.mrf.mxu2  ;;  %7857 = vst [vmem:[#allocation49_spill] sm:$0xff] %v4623_v9 }
 0x14b   :  { %7851 = vst [vmem:[#allocation43_spill] sm:$0xff] %v4597_v13  ;;  %725 = vmax.xlane.f32.xlu1 %v4597_v13  ;;  %605 = vmatmul.bf16.gmra.mxu1 %v461_v15  ;;  %v356_v24 = vadd.f32 %v4390_v6, %v355_v16  ;;  %v4626_v16 = vpop.permute.xlu2 %1600 }
 0x14c   :  { %v278_v25 = vpop.f32.mrf.mxu0  ;;  %v643_v30 = vpop.f32.mrf.mxu3  ;;  %7858 = vst [vmem:[#allocation50_spill] sm:$0xff] %v4626_v16 }
 0x14d   :  { %v4604_v32 = vadd.f32 %v4559_v19, %v643_v30  ;;  %v439_v34 = vmax.f32 %v356_v24, 0.0  ;;  %v279_v56 = vadd.f32 %v4390_v6, %v278_v25  ;;  %v4634_v30 = vpop.permute.xlu1 %1594 }
 0x14e   :  { %7861 = vst [vmem:[#allocation53_spill] sm:$0xff] %v4634_v30 }
 0x14f   :  { %7853 = vst [vmem:[#allocation45_spill] sm:$0xff] %v4604_v32  ;;  %787 = vmax.xlane.f32.xlu0 %v4604_v32  ;;  %v477_v44 = vpack.c.bf16 %v439_v34, %v438_v22  ;;  %v408_v0 = vmax.f32 %v279_v56, 0.0 }
 0x150   :  { %v568_v43 = vpop.f32.mrf.mxu1 }
 0x151   :  { %v4618_v53 = vadd.f32 %v4559_v19, %v568_v43  ;;  %685 = vmatmul.bf16.gmra.mxu3 %v477_v44  ;;  %v4639_v56 = vpop.permute.xlu0 %1615 }
 0x152   :  { %v358_v60 = vpop.f32.mrf.mxu2  ;;  %7862 = vst [vmem:[#allocation54_spill] sm:$0xff] %v4639_v56 }
 0x153   :  { %7856 = vst [vmem:[#allocation48_spill] sm:$0xff] %v4618_v53  ;;  %727 = vmax.xlane.f32.xlu1 %v4618_v53  ;;  %v359_v15 = vadd.f32 %v4390_v6, %v358_v60 }
 0x154   :  { %v280_v61 = vpop.f32.mrf.mxu0  ;;  %v646_v63 = vpop.f32.mrf.mxu3 }
 0x155   :  { %v281_v2 = vadd.f32 %v4390_v6, %v280_v61  ;;  %v4629_v22 = vadd.f32 %v4559_v19, %v646_v63  ;;  %v440_v38 = vmax.f32 %v359_v15, 0.0 }
 0x157   :  { %v409_v10 = vmax.f32 %v281_v2, 0.0  ;;  %7859 = vst [vmem:[#allocation51_spill] sm:$0xff] %v4629_v22 }
 0x158   :  { %v571_v11 = vpop.f32.mrf.mxu1 }
 0x159   :  { %v4632_v24 = vadd.f32 %v4559_v19, %v571_v11  ;;  %v462_v25 = vpack.c.bf16 %v409_v10, %v408_v0  ;;  %v4644_v0 = vpop.permute.xlu2 %1609  ;;  %v4648_v10 = vpop.permute.xlu1 %1603 }
 0x15a   :  { %v360_v34 = vpop.f32.mrf.mxu2  ;;  %7864 = vst [vmem:[#allocation56_spill] sm:$0xff] %v4644_v0 }
 0x15b   :  { %7860 = vst [vmem:[#allocation52_spill] sm:$0xff] %v4632_v24  ;;  %729 = vmax.xlane.f32.xlu2 %v4632_v24  ;;  %789 = vmax.xlane.f32.xlu1 %v4629_v22  ;;  %v361_v41 = vadd.f32 %v4390_v6, %v360_v34 }
 0x15c   :  { %610 = vmatmul.bf16.gmra.mxu1 %v462_v25  ;;  %v648_v43 = vpop.f32.mrf.mxu3  ;;  %v283_v48 = vpop.f32.mrf.mxu0  ;;  %7865 = vst [vmem:[#allocation57_spill] sm:$0xff] %v4648_v10 }
 0x15d   :  { %v441_v44 = vmax.f32 %v361_v41, 0.0  ;;  %v4642_v63 = vadd.f32 %v4559_v19, %v648_v43  ;;  %v284_v2 = vadd.f32 %v4390_v6, %v283_v48 }
 0x15f   :  { %v478_v61 = vpack.c.bf16 %v441_v44, %v440_v38  ;;  %7863 = vst [vmem:[#allocation55_spill] sm:$0xff] %v4642_v63  ;;  %v410_v38 = vmax.f32 %v284_v2, 0.0 }
 0x160   :  { %v573_v60 = vpop.f32.mrf.mxu1 }
 0x161   :  { %690 = vmatmul.bf16.gmra.mxu3 %v478_v61  ;;  %v4656_v43 = vadd.f32 %v4559_v19, %v573_v60  ;;  %v4658_v61 = vpop.permute.xlu0 %1624  ;;  %v4661_v10 = vpop.permute.xlu2 %1618 }
 0x162   :  { %v363_v44 = vpop.f32.mrf.mxu2  ;;  %7868 = vst [vmem:[#allocation60_spill] sm:$0xff] %v4658_v61  ;;  %v4670_v60 = vpop.permute.xlu1 %1612 }
 0x163   :  { %791 = vmax.xlane.f32.xlu2 %v4642_v63  ;;  %7867 = vst [vmem:[#allocation59_spill] sm:$0xff] %v4656_v43 }
 0x164   :  { %v651_v11 = vpop.f32.mrf.mxu3  ;;  %v285_v25 = vpop.f32.mrf.mxu0  ;;  %7869 = vst [vmem:[#allocation61_spill] sm:$0xff] %v4661_v10 }
 0x165   :  { %v4651_v15 = vadd.f32 %v4559_v19, %v651_v11  ;;  %v286_v41 = vadd.f32 %v4390_v6, %v285_v25  ;;  %v364_v25 = vadd.f32 %v4390_v6, %v363_v44  ;;  %7872 = vst [vmem:[#allocation64_spill] sm:$0xff] %v4670_v60 }
 0x167   :  { %7866 = vst [vmem:[#allocation58_spill] sm:$0xff] %v4651_v15  ;;  %793 = vmax.xlane.f32.xlu0 %v4651_v15  ;;  %v411_v48 = vmax.f32 %v286_v41, 0.0 }
 0x168   :  { %v576_v34 = vpop.f32.mrf.mxu1 }
 0x169   :  { %v463_v56 = vpack.c.bf16 %v411_v48, %v410_v38  ;;  %v4664_v0 = vadd.f32 %v4559_v19, %v576_v34  ;;  %v442_v48 = vmax.f32 %v364_v25, 0.0  ;;  %v4675_v10 = vpop.permute.xlu0 %1633  ;;  %v4683_v60 = vpop.permute.xlu2 %1627 }
 0x16a   :  { %v365_v38 = vpop.f32.mrf.mxu2  ;;  %7873 = vst [vmem:[#allocation65_spill] sm:$0xff] %v4675_v10  ;;  %v4687_v30 = vpop.permute.xlu1 %1621 }
 0x16b   :  { %731 = vmax.xlane.f32.xlu2 %v4656_v43  ;;  %7870 = vst [vmem:[#allocation62_spill] sm:$0xff] %v4664_v0  ;;  %v366_v61 = vadd.f32 %v4390_v6, %v365_v38 }
 0x16c   :  { %v653_v11 = vpop.f32.mrf.mxu3  ;;  %615 = vmatmul.bf16.gmra.mxu1 %v463_v56  ;;  %7876 = vst [vmem:[#allocation68_spill] sm:$0xff] %v4683_v60 }
 0x16d   :  { %v4667_v2 = vadd.f32 %v4559_v19, %v653_v11  ;;  %v443_v34 = vmax.f32 %v366_v61, 0.0  ;;  %7877 = vst [vmem:[#allocation69_spill] sm:$0xff] %v4687_v30 }
 0x16f   :  { %7871 = vst [vmem:[#allocation63_spill] sm:$0xff] %v4667_v2  ;;  %795 = vmax.xlane.f32.xlu1 %v4667_v2  ;;  %733 = vmax.xlane.f32.xlu0 %v4664_v0  ;;  %v479_v44 = vpack.c.bf16 %v443_v34, %v442_v48  ;;  %v288_v48 = vpop.f32.mrf.mxu0 }
 0x170   :  { %v578_v41 = vpop.f32.mrf.mxu1 }
 0x171   :  { %v4678_v11 = vadd.f32 %v4559_v19, %v578_v41  ;;  %695 = vmatmul.bf16.gmra.mxu3 %v479_v44  ;;  %v4689_v10 = vpop.permute.xlu0 %1642  ;;  %v4700_v30 = vpop.permute.xlu2 %1636 }
 0x172   :  { %v368_v38 = vpop.f32.mrf.mxu2  ;;  %7878 = vst [vmem:[#allocation70_spill] sm:$0xff] %v4689_v10  ;;  %v4702_v44 = vpop.permute.xlu1 %1630 }
 0x173   :  { %7874 = vst [vmem:[#allocation66_spill] sm:$0xff] %v4678_v11  ;;  %v369_v60 = vadd.f32 %v4390_v6, %v368_v38 }
 0x174   :  { %v656_v9 = vpop.f32.mrf.mxu3  ;;  %7881 = vst [vmem:[#allocation73_spill] sm:$0xff] %v4700_v30 }
 0x175   :  { %v4681_v56 = vadd.f32 %v4559_v19, %v656_v9  ;;  %7882 = vst [vmem:[#allocation74_spill] sm:$0xff] %v4702_v44  ;;  %v444_v10 = vmax.f32 %v369_v60, 0.0 }
 0x177   :  { %7875 = vst [vmem:[#allocation67_spill] sm:$0xff] %v4681_v56  ;;  %797 = vmax.xlane.f32.xlu2 %v4681_v56  ;;  %735 = vmax.xlane.f32.xlu1 %v4678_v11  ;;  %v290_v7 = vpop.f32.mrf.mxu0 }
 0x178   :  { %v581_v25 = vpop.f32.mrf.mxu1 }
 0x179   :  { %v4692_v41 = vadd.f32 %v4559_v19, %v581_v25  ;;  %v289_v25 = vadd.f32 %v4390_v6, %v288_v48  ;;  %v4712_v38 = vpop.permute.xlu0 %1651 }
 0x17a   :  { %v370_v16 = vpop.f32.mrf.mxu2  ;;  %7885 = vst [vmem:[#allocation77_spill] sm:$0xff] %v4712_v38 }
 0x17b   :  { %7879 = vst [vmem:[#allocation71_spill] sm:$0xff] %v4692_v41  ;;  %v371_v18 = vadd.f32 %v4390_v6, %v370_v16  ;;  %v412_v44 = vmax.f32 %v289_v25, 0.0  ;;  %v291_v16 = vadd.f32 %v4390_v6, %v290_v7 }
 0x17c   :  { %v658_v61 = vpop.f32.mrf.mxu3 }
 0x17d   :  { %v4695_v9 = vadd.f32 %v4559_v19, %v658_v61  ;;  %v445_v51 = vmax.f32 %v371_v18, 0.0  ;;  %v413_v30 = vmax.f32 %v291_v16, 0.0 }
 0x17f   :  { %7880 = vst [vmem:[#allocation72_spill] sm:$0xff] %v4695_v9  ;;  %737 = vmax.xlane.f32.xlu2 %v4692_v41  ;;  %799 = vmax.xlane.f32.xlu0 %v4695_v9  ;;  %v480_v48 = vpack.c.bf16 %v445_v51, %v444_v10  ;;  %v464_v55 = vpack.c.bf16 %v413_v30, %v412_v44  ;;  %v293_v7 = vpop.f32.mrf.mxu0 }
 0x180   :  { %v583_v34 = vpop.f32.mrf.mxu1 }
 0x181   :  { %v4707_v52 = vadd.f32 %v4559_v19, %v583_v34  ;;  %700 = vmatmul.bf16.gmra.mxu3 %v480_v48  ;;  %v4717_v34 = vpop.permute.xlu2 %1645  ;;  %620 = vmatmul.bf16.gmra.mxu1 %v464_v55  ;;  %v4729_v10 = vpop.permute.xlu0 %1660  ;;  %v294_v48 = vadd.f32 %v4390_v6, %v293_v7 }
 0x182   :  { %7886 = vst [vmem:[#allocation78_spill] sm:$0xff] %v4717_v34 }
 0x183   :  { %7883 = vst [vmem:[#allocation75_spill] sm:$0xff] %v4707_v52 }
 0x184   :  { %v661_v61 = vpop.f32.mrf.mxu3  ;;  %7890 = vst [vmem:[#allocation82_spill] sm:$0xff] %v4729_v10  ;;  %v373_v10 = vpop.f32.mrf.mxu2 }
 0x185   :  { %v4710_v36 = vadd.f32 %v4559_v19, %v661_v61  ;;  %v4719_v61 = vpop.permute.xlu1 %1639  ;;  %v374_v58 = vadd.f32 %v4390_v6, %v373_v10 }
 0x186   :  { %7887 = vst [vmem:[#allocation79_spill] sm:$0xff] %v4719_v61  ;;  %v414_v61 = vmax.f32 %v294_v48, 0.0 }
 0x187   :  { %7884 = vst [vmem:[#allocation76_spill] sm:$0xff] %v4710_v36  ;;  %801 = vmax.xlane.f32.xlu1 %v4710_v36  ;;  %739 = vmax.xlane.f32.xlu0 %v4707_v52 }
 0x188   :  { %v586_v60 = vpop.f32.mrf.mxu1 }
 0x189   :  { %v4722_v23 = vadd.f32 %v4559_v19, %v586_v60  ;;  %v4731_v25 = vpop.permute.xlu2 %1654  ;;  %v4745_v34 = vpop.permute.xlu0 %1669 }
 0x18a   :  { %7891 = vst [vmem:[#allocation83_spill] sm:$0xff] %v4731_v25 }
 0x18b   :  { %7888 = vst [vmem:[#allocation80_spill] sm:$0xff] %v4722_v23 }
 0x18c   :  { %v663_v18 = vpop.f32.mrf.mxu3  ;;  %7895 = vst [vmem:[#allocation87_spill] sm:$0xff] %v4745_v34  ;;  %v446_v34 = vmax.f32 %v374_v58, 0.0 }
 0x18d   :  { %v4725_v38 = vadd.f32 %v4559_v19, %v663_v18  ;;  %v4740_v55 = vpop.permute.xlu1 %1648  ;;  %v295_v18 = vpop.f32.mrf.mxu0 }
 0x18e   :  { %7894 = vst [vmem:[#allocation86_spill] sm:$0xff] %v4740_v55  ;;  %v296_v25 = vadd.f32 %v4390_v6, %v295_v18 }
 0x18f   :  { %7889 = vst [vmem:[#allocation81_spill] sm:$0xff] %v4725_v38  ;;  %803 = vmax.xlane.f32.xlu2 %v4725_v38  ;;  %741 = vmax.xlane.f32.xlu1 %v4722_v23 }
 0x190   :  { %v588_v51 = vpop.f32.mrf.mxu1 }
 0x191   :  { %v4734_v44 = vadd.f32 %v4559_v19, %v588_v51  ;;  %v415_v51 = vmax.f32 %v296_v25, 0.0  ;;  %v4754_v39 = vpop.permute.xlu2 %1663  ;;  %v375_v25 = vpop.f32.mrf.mxu2 }
 0x192   :  { %7898 = vst [vmem:[#allocation90_spill] sm:$0xff] %v4754_v39  ;;  %v4761_v42 = vpop.permute.xlu0 %1678 }
 0x193   :  { %7892 = vst [vmem:[#allocation84_spill] sm:$0xff] %v4734_v44  ;;  %v465_v55 = vpack.c.bf16 %v415_v51, %v414_v61 }
 0x194   :  { %v666_v30 = vpop.f32.mrf.mxu3  ;;  %7900 = vst [vmem:[#allocation92_spill] sm:$0xff] %v4761_v42 }
 0x195   :  { %v4737_v60 = vadd.f32 %v4559_v19, %v666_v30  ;;  %v4758_v18 = vpop.permute.xlu1 %1657  ;;  %625 = vmatmul.bf16.gmra.mxu1 %v465_v55 }
 0x196   :  { %7899 = vst [vmem:[#allocation91_spill] sm:$0xff] %v4758_v18 }
 0x197   :  { %7893 = vst [vmem:[#allocation85_spill] sm:$0xff] %v4737_v60  ;;  %743 = vmax.xlane.f32.xlu2 %v4734_v44  ;;  %805 = vmax.xlane.f32.xlu0 %v4737_v60 }
 0x198   :  { %v591_v16 = vpop.f32.mrf.mxu1 }
 0x199   :  { %v4748_v30 = vadd.f32 %v4559_v19, %v591_v16  ;;  %v376_v16 = vadd.f32 %v4390_v6, %v375_v25  ;;  %v4771_v55 = vpop.permute.xlu2 %1672  ;;  %v1425_v25 = vlaneseq  ;;  %v378_v33 = vpop.f32.mrf.mxu2 }
 0x19a   :  { %7903 = vst [vmem:[#allocation95_spill] sm:$0xff] %v4771_v55 }
 0x19b   :  { %7896 = vst [vmem:[#allocation88_spill] sm:$0xff] %v4748_v30  ;;  %v447_v4 = vmax.f32 %v376_v16, 0.0  ;;  %v4778_v39 = vand.u32 127, %v1425_v25 }
 0x19c   :  { %v668_v31 = vpop.f32.mrf.mxu3 }
 0x19d   :  { %v4751_v7 = vadd.f32 %v4559_v19, %v668_v31  ;;  %v481_v51 = vpack.c.bf16 %v447_v4, %v446_v34  ;;  %v4773_v16 = vpop.permute.xlu1 %1666  ;;  %v298_v34 = vpop.f32.mrf.mxu0 }
 0x19e   :  { %7904 = vst [vmem:[#allocation96_spill] sm:$0xff] %v4773_v16  ;;  %v299_v16 = vadd.f32 %v4390_v6, %v298_v34 }
 0x19f   :  { %7897 = vst [vmem:[#allocation89_spill] sm:$0xff] %v4751_v7  ;;  %807 = vmax.xlane.f32.xlu1 %v4751_v7  ;;  %745 = vmax.xlane.f32.xlu0 %v4748_v30 }
 0x1a0   :  { %v593_v48 = vpop.f32.mrf.mxu1  ;;  %705 = vmatmul.bf16.gmra.mxu3 %v481_v51 }
 0x1a1   :  { %v4764_v61 = vadd.f32 %v4559_v19, %v593_v48  ;;  %v4793_v25 = vpop.permute.xlu2 %1681 }
 0x1a2   :  { %7908 = vst [vmem:[#allocation100_spill] sm:$0xff] %v4793_v25  ;;  %v416_v25 = vmax.f32 %v299_v16, 0.0 }
 0x1a3   :  { %7901 = vst [vmem:[#allocation93_spill] sm:$0xff] %v4764_v61 }
 0x1a4   :  { %v671_v31 = vpop.f32.mrf.mxu3 }
 0x1a5   :  { %v4767_v10 = vadd.f32 %v4559_v19, %v671_v31  ;;  %v4798_v18 = vpop.permute.xlu1 %1675 }
 0x1a6   :  { %7909 = vst [vmem:[#allocation101_spill] sm:$0xff] %v4798_v18 }
 0x1a7   :  { %7902 = vst [vmem:[#allocation94_spill] sm:$0xff] %v4767_v10  ;;  %809 = vmax.xlane.f32.xlu2 %v4767_v10  ;;  %747 = vmax.xlane.f32.xlu1 %v4764_v61 }
 0x1a8   :  { %v596_v58 = vpop.f32.mrf.mxu1 }
 0x1a9   :  { %v4776_v42 = vadd.f32 %v4559_v19, %v596_v58 }
 0x1ab   :  { %7905 = vst [vmem:[#allocation97_spill] sm:$0xff] %v4776_v42 }
 0x1ac   :  { %v673_v48 = vpop.f32.mrf.mxu3 }
 0x1ad   :  { %v4781_v31 = vadd.f32 %v4559_v19, %v673_v48 }
 0x1ae   :  { %v4783_v4 = vpop.xlane.xlu0 %721 }
 0x1af   :  { %7906 = vst [vmem:[#allocation98_spill] sm:$0xff] %v4781_v31  ;;  %vm1875_vm0 = vcmp.eq.f32.partialorder %v4565_v28, %v4783_v4  ;;  %749 = vmax.xlane.f32.xlu2 %v4776_v42  ;;  %811 = vmax.xlane.f32.xlu0 %v4781_v31  ;;  %v849_v8 = vsub.f32 %v4565_v28, %v4783_v4 }
 0x1b0   :  { %7907 = vst [vmem:[#allocation99_spill] sm:$0xff] %v4783_v4  ;;  %v4790_v51 = vsel %vm1875_vm0, %v4778_v39, 128  ;;  %v598_v55 = vpop.f32.mrf.mxu1 }
 0x1b1   :  { %v2004_v58 = vshra.s32 %v4790_v51, 16  ;;  %v4804_v47 = vadd.f32 %v4559_v19, %v598_v55  ;;  %v913_v55 = vmul.f32 1.442695, %v849_v8 }
 0x1b3   :  { %v4795_v48 = vcvt.s32.f32 %v2004_v58  ;;  %7910 = vst [vmem:[#allocation102_spill] sm:$0xff] %v4804_v47  ;;  %v300_v58 = vpop.f32.mrf.mxu0  ;;  %3736 = vpow2.f32 %v913_v55 }
 0x1b4   :  { %v676_v27 = vpop.f32.mrf.mxu3  ;;  %v301_v18 = vadd.f32 %v4390_v6, %v300_v58  ;;  %v380_v58 = vpop.f32.mrf.mxu2 }
 0x1b5   :  { %2007 = vmin.xlane.f32.xlu1 %v4795_v48  ;;  %v4817_v20 = vadd.f32 %v4559_v19, %v676_v27  ;;  %v379_v27 = vadd.f32 %v4390_v6, %v378_v33 }
 0x1b6   :  { %v4806_v49 = vpop.xlane.xlu0 %723  ;;  %v417_v5 = vmax.f32 %v301_v18, 0.0 }
 0x1b7   :  { %7911 = vst [vmem:[#allocation103_spill] sm:$0xff] %v4806_v49  ;;  %vm1876_vm1 = vcmp.eq.f32.partialorder %v4574_v46, %v4806_v49  ;;  %751 = vmax.xlane.f32.xlu0 %v4804_v47  ;;  %v850_v16 = vsub.f32 %v4574_v46, %v4806_v49 }
 0x1b8   :  { %v4812_v34 = vsel %vm1876_vm1, %v4778_v39, 128  ;;  %7912 = vst [vmem:[#allocation104_spill] sm:$0xff] %v4817_v20  ;;  %v466_v62 = vpack.c.bf16 %v417_v5, %v416_v25  ;;  %v381_v5 = vadd.f32 %v4390_v6, %v380_v58  ;;  %v601_v55 = vpop.f32.mrf.mxu1 }
 0x1b9   :  { %v2018_v37 = vshra.s32 %v4812_v34, 16  ;;  %v915_v4 = vmul.f32 1.442695, %v850_v16  ;;  %v4844_v6 = vadd.f32 %v4559_v19, %v601_v55  ;;  %v3992_v55 = vld [vmem:[%s7376_s2] ss:$0 sm:$0xff] }
 0x1ba   :  { %v4819_v12 = vpop.xlane.xlu2 %785  ;;  %630 = vmatmul.bf16.gmra.mxu1 %v466_v62  ;;  %v449_v59 = vmax.f32 %v381_v5, 0.0 }
 0x1bb   :  { %7913 = vst [vmem:[#allocation105_spill] sm:$0xff] %v4819_v12  ;;  %v4821_v28 = vcvt.s32.f32 %v2018_v37  ;;  %v881_v57 = vsub.f32 %v4590_v1, %v4819_v12  ;;  %v448_v1 = vmax.f32 %v379_v27, 0.0  ;;  %v3737_v12 = vpop.eup %3736 }
 0x1bc   :  { %v678_v37 = vpop.f32.mrf.mxu3  ;;  %7917 = vst [vmem:[#allocation109_spill] sm:$0xff] %v4844_v6  ;;  %v383_v27 = vpop.f32.mrf.mxu2 }
 0x1bd   :  { %813 = vmax.xlane.f32.xlu1 %v4817_v20  ;;  %2021 = vmin.xlane.f32.xlu2 %v4821_v28  ;;  %v977_v8 = vmul.f32 1.442695, %v881_v57  ;;  %v4834_v25 = vadd.f32 %v4559_v19, %v678_v37  ;;  %v482_v62 = vpack.c.bf16 %v449_v59, %v448_v1 }
 0x1be   :  { %v4829_v18 = vpop.xlane.xlu1 %725 }
 0x1bf   :  { %7914 = vst [vmem:[#allocation106_spill] sm:$0xff] %v4829_v18  ;;  %3738 = vpow2.f32 %v977_v8  ;;  %v851_v33 = vsub.f32 %v4597_v13, %v4829_v18  ;;  %710 = vmatmul.bf16.gmra.mxu3 %v482_v62  ;;  %v303_v5 = vpop.f32.mrf.mxu0  ;;  %v384_v62 = vadd.f32 %v3992_v55, %v383_v27  ;;  %vm1877_vm3 = vcmp.eq.f32.partialorder %v4597_v13, %v4829_v18 }
 0x1c0   :  { %7915 = vst [vmem:[#allocation107_spill] sm:$0xff] %v4834_v25  ;;  %3740 = vpow2.f32 %v915_v4  ;;  %v304_v50 = vadd.f32 %v3992_v55, %v303_v5 }
 0x1c1   :  { %v917_v59 = vmul.f32 1.442695, %v851_v33  ;;  %v450_v40 = vmax.f32 %v384_v62, 0.0 }
 0x1c2   :  { %v418_v26 = vmax.f32 %v304_v50, 0.0 }
 0x1c3   :  { %3742 = vpow2.f32 %v917_v59  ;;  %v4874_v59 = vsel %vm1877_vm3, %v4778_v39, 128 }
 0x1c4   :  { %v681_v16 = vpop.f32.mrf.mxu3  ;;  %v385_v49 = vpop.f32.mrf.mxu2 }
 0x1c5   :  { %1041 = vadd.xlane.f32.xlu1 %v3737_v12  ;;  %815 = vmax.xlane.f32.xlu2 %v4834_v25  ;;  %v3739_v57 = vpop.eup %3738  ;;  %v4846_v12 = vpop.xlane.xlu0 %787  ;;  %v4849_v8 = vadd.f32 %v4559_v19, %v681_v16  ;;  %v386_v27 = vadd.f32 %v3992_v55, %v385_v49 }
 0x1c6   :  { %v4837_v46 = vpop.xlane.xlu1 %727  ;;  %1105 = vadd.xlane.f32.xlu0 %v3739_v57  ;;  %7918 = vst [vmem:[#allocation110_spill] sm:$0xff] %v4846_v12  ;;  %v3741_v4 = vpop.eup %3740  ;;  %v882_v37 = vsub.f32 %v4604_v32, %v4846_v12 }
 0x1c7   :  { %7916 = vst [vmem:[#allocation108_spill] sm:$0xff] %v4837_v46  ;;  %vm1878_vm2 = vcmp.eq.f32.partialorder %v4618_v53, %v4837_v46  ;;  %v603_v57 = vpop.f32.mrf.mxu1  ;;  %v451_v13 = vmax.f32 %v386_v27, 0.0  ;;  %v305_v18 = vpop.f32.mrf.mxu0 }
 0x1c8   :  { %7919 = vst [vmem:[#allocation111_spill] sm:$0xff] %v4849_v8  ;;  %v4852_v1 = vsel %vm1878_vm2, %v4778_v39, 128  ;;  %v979_v33 = vmul.f32 1.442695, %v882_v37  ;;  %v306_v62 = vadd.f32 %v3992_v55, %v305_v18 }
 0x1c9   :  { %v2046_v58 = vshra.s32 %v4852_v1, 16  ;;  %v3743_v37 = vpop.eup %3742  ;;  %v483_v35 = vpack.c.bf16 %v451_v13, %v450_v40  ;;  %v852_v40 = vsub.f32 %v4618_v53, %v4837_v46 }
 0x1ca   :  { %3744 = vpow2.f32 %v979_v33  ;;  %v419_v49 = vmax.f32 %v306_v62, 0.0 }
 0x1cb   :  { %v4871_v12 = vcvt.s32.f32 %v2046_v58  ;;  %v2032_v58 = vshra.s32 %v4874_v59, 16  ;;  %v919_v13 = vmul.f32 1.442695, %v852_v40 }
 0x1cc   :  { %v467_v27 = vpack.c.bf16 %v419_v49, %v418_v26 }
 0x1cd   :  { %753 = vmax.xlane.f32.xlu1 %v4844_v6  ;;  %1043 = vadd.xlane.f32.xlu2 %v3741_v4  ;;  %v4867_v4 = vadd.f32 %v4559_v19, %v603_v57  ;;  %v4884_v14 = vcvt.s32.f32 %v2032_v58 }
 0x1ce   :  { %817 = vmax.xlane.f32.xlu0 %v4849_v8  ;;  %v4864_v16 = vpop.xlane.xlu2 %729  ;;  %v4869_v32 = vpop.xlane.xlu1 %789  ;;  %635 = vmatmul.bf16.gmra.mxu1 %v467_v27 }
 0x1cf   :  { %7920 = vst [vmem:[#allocation112_spill] sm:$0xff] %v4864_v16  ;;  %v883_v57 = vsub.f32 %v4629_v22, %v4869_v32  ;;  %v606_v45 = vpop.f32.mrf.mxu1  ;;  %715 = vmatmul.bf16.gmra.mxu3 %v483_v35  ;;  %vm1879_vm4 = vcmp.eq.f32.partialorder %v4632_v24, %v4864_v16 }
 0x1d0   :  { %7921 = vst [vmem:[#allocation113_spill] sm:$0xff] %v4867_v4  ;;  %v4882_v29 = vadd.f32 %v4559_v19, %v606_v45  ;;  %v3745_v33 = vpop.eup %3744  ;;  %v4894_v35 = vsel %vm1879_vm4, %v4778_v39, 128  ;;  %v683_v45 = vpop.f32.mrf.mxu3 }
 0x1d1   :  { %7922 = vst [vmem:[#allocation114_spill] sm:$0xff] %v4869_v32  ;;  %v981_v5 = vmul.f32 1.442695, %v883_v57  ;;  %v2060_v26 = vshra.s32 %v4894_v35, 16  ;;  %v4901_v18 = vadd.f32 %v4559_v19, %v683_v45 }
 0x1d2   :  { %7923 = vst [vmem:[#allocation115_spill] sm:$0xff] %v4882_v29 }
 0x1d3   :  { %3746 = vpow2.f32 %v981_v5  ;;  %7925 = vst [vmem:[#allocation117_spill] sm:$0xff] %v4901_v18  ;;  %v4906_v62 = vcvt.s32.f32 %v2060_v26  ;;  %v853_v5 = vsub.f32 %v4632_v24, %v4864_v16 }
 0x1d4   :  { %3748 = vpow2.f32 %v919_v13 }
 0x1d5   :  { %2049 = vmin.xlane.f32.xlu1 %v4871_v12  ;;  %755 = vmax.xlane.f32.xlu2 %v4867_v4 }
 0x1d6   :  { %1045 = vadd.xlane.f32.xlu0 %v3743_v37  ;;  %v4888_v37 = vpop.xlane.xlu2 %791 }
 0x1d7   :  { %7924 = vst [vmem:[#allocation116_spill] sm:$0xff] %v4888_v37  ;;  %v884_v50 = vsub.f32 %v4642_v63, %v4888_v37 }
 0x1d8   :  { %v686_v49 = vpop.f32.mrf.mxu3 }
 0x1d9   :  { %v3747_v55 = vpop.eup %3746  ;;  %v983_v57 = vmul.f32 1.442695, %v884_v50  ;;  %v4912_v27 = vadd.f32 %v4559_v19, %v686_v49 }
 0x1da   :  { %v4903_v58 = vpop.xlane.xlu0 %793  ;;  %v3749_v40 = vpop.eup %3748 }
 0x1db   :  { %7926 = vst [vmem:[#allocation118_spill] sm:$0xff] %v4903_v58  ;;  %3750 = vpow2.f32 %v983_v57 }
 0x1dc   :  { %7927 = vst [vmem:[#allocation119_spill] sm:$0xff] %v4912_v27 }
 0x1dd   :  { %2035 = vmin.xlane.f32.xlu2 %v4884_v14  ;;  %1107 = vadd.xlane.f32.xlu1 %v3745_v33  ;;  %v921_v33 = vmul.f32 1.442695, %v853_v5 }
 0x1de   :  { %757 = vmax.xlane.f32.xlu0 %v4882_v29  ;;  %v4914_v45 = vpop.xlane.xlu2 %731 }
 0x1df   :  { %7928 = vst [vmem:[#allocation120_spill] sm:$0xff] %v4914_v45  ;;  %3752 = vpow2.f32 %v921_v33  ;;  %v854_v13 = vsub.f32 %v4656_v43, %v4914_v45  ;;  %vm1880_vm6 = vcmp.eq.f32.partialorder %v4656_v43, %v4914_v45 }
 0x1e0   :  { %v688_v5 = vpop.f32.mrf.mxu3 }
 0x1e1   :  { %v3751_v50 = vpop.eup %3750  ;;  %v4932_v33 = vadd.f32 %v4559_v19, %v688_v5 }
 0x1e2   :  { %v4917_v26 = vpop.xlane.xlu0 %733  ;;  %v4923_v57 = vpop.xlane.xlu1 %795 }
 0x1e3   :  { %7929 = vst [vmem:[#allocation121_spill] sm:$0xff] %v4917_v26  ;;  %vm1881_vm5 = vcmp.eq.f32.partialorder %v4664_v0, %v4917_v26 }
 0x1e4   :  { %7930 = vst [vmem:[#allocation122_spill] sm:$0xff] %v4923_v57  ;;  %v4929_v37 = vsel %vm1881_vm5, %v4778_v39, 128 }
 0x1e5   :  { %1109 = vadd.xlane.f32.xlu2 %v3747_v55  ;;  %819 = vmax.xlane.f32.xlu1 %v4901_v18  ;;  %v608_v55 = vpop.f32.mrf.mxu1  ;;  %v3753_v63 = vpop.eup %3752  ;;  %7932 = vst [vmem:[#allocation124_spill] sm:$0xff] %v4932_v33  ;;  %v2088_v22 = vshra.s32 %v4929_v37, 16 }
 0x1e6   :  { %2063 = vmin.xlane.f32.xlu0 %v4906_v62  ;;  %v4926_v49 = vadd.f32 %v4559_v19, %v608_v55 }
 0x1e8   :  { %7931 = vst [vmem:[#allocation123_spill] sm:$0xff] %v4926_v49 }
 0x1ea   :  { %v4939_v32 = vpop.xlane.xlu2 %797  ;;  %v4948_v24 = vpop.xlane.xlu1 %735 }
 0x1eb   :  { %7933 = vst [vmem:[#allocation125_spill] sm:$0xff] %v4939_v32  ;;  %vm1882_vm7 = vcmp.eq.f32.partialorder %v4678_v11, %v4948_v24 }
 0x1ec   :  { %7936 = vst [vmem:[#allocation128_spill] sm:$0xff] %v4948_v24 }
 0x1ed   :  { %821 = vmax.xlane.f32.xlu2 %v4912_v27  ;;  %1047 = vadd.xlane.f32.xlu1 %v3749_v40  ;;  %v923_v40 = vmul.f32 1.442695, %v854_v13  ;;  %v611_v55 = vpop.f32.mrf.mxu1 }
 0x1ee   :  { %1111 = vadd.xlane.f32.xlu0 %v3751_v50  ;;  %v885_v50 = vsub.f32 %v4651_v15, %v4903_v58  ;;  %v4944_v5 = vadd.f32 %v4559_v19, %v611_v55  ;;  %v4951_v15 = vsel %vm1880_vm6, %v4778_v39, 128  ;;  %v886_v58 = vsub.f32 %v4667_v2, %v4923_v57 }
 0x1ef   :  { %3754 = vpow2.f32 %v923_v40 }
 0x1f0   :  { %v985_v13 = vmul.f32 1.442695, %v885_v50  ;;  %7934 = vst [vmem:[#allocation126_spill] sm:$0xff] %v4944_v5  ;;  %v2074_v50 = vshra.s32 %v4951_v15, 16  ;;  %v987_v55 = vmul.f32 1.442695, %v886_v58  ;;  %v855_v58 = vsub.f32 %v4664_v0, %v4917_v26 }
 0x1f1   :  { %v856_v26 = vsub.f32 %v4678_v11, %v4948_v24 }
 0x1f2   :  { %3756 = vpow2.f32 %v985_v13  ;;  %v4958_v43 = vpop.xlane.xlu2 %737  ;;  %v4960_v45 = vcvt.s32.f32 %v2074_v50  ;;  %v4964_v53 = vpop.xlane.xlu0 %799  ;;  %v887_v50 = vsub.f32 %v4681_v56, %v4939_v32 }
 0x1f3   :  { %7937 = vst [vmem:[#allocation129_spill] sm:$0xff] %v4958_v43  ;;  %v691_v13 = vpop.f32.mrf.mxu3  ;;  %3758 = vpow2.f32 %v987_v55  ;;  %vm1883_vm9 = vcmp.eq.f32.partialorder %v4692_v41, %v4958_v43 }
 0x1f4   :  { %7938 = vst [vmem:[#allocation130_spill] sm:$0xff] %v4964_v53  ;;  %v4982_v21 = vadd.f32 %v4559_v19, %v691_v13  ;;  %v989_v0 = vmul.f32 1.442695, %v887_v50  ;;  %v927_v13 = vmul.f32 1.442695, %v856_v26 }
 0x1f5   :  { %1049 = vadd.xlane.f32.xlu2 %v3753_v63  ;;  %759 = vmax.xlane.f32.xlu1 %v4926_v49  ;;  %v4946_v63 = vcvt.s32.f32 %v2088_v22  ;;  %v3755_v40 = vpop.eup %3754  ;;  %v613_v22 = vpop.f32.mrf.mxu1 }
 0x1f6   :  { %823 = vmax.xlane.f32.xlu0 %v4932_v33  ;;  %v4969_v2 = vadd.f32 %v4559_v19, %v613_v22  ;;  %v925_v22 = vmul.f32 1.442695, %v855_v58  ;;  %7942 = vst [vmem:[#allocation134_spill] sm:$0xff] %v4982_v21 }
 0x1f7   :  { %7935 = vst [vmem:[#allocation127_spill] sm:$0xff] %v4946_v63 }
 0x1f8   :  { %v3757_v16 = vpop.eup %3756  ;;  %7940 = vst [vmem:[#allocation132_spill] sm:$0xff] %v4969_v2  ;;  %3760 = vpow2.f32 %v925_v22 }
 0x1f9   :  { %v3759_v17 = vpop.eup %3758  ;;  %3762 = vpow2.f32 %v989_v0  ;;  %v857_v0 = vsub.f32 %v4692_v41, %v4958_v43 }
 0x1fa   :  { %v4966_v46 = vpop.xlane.xlu1 %801  ;;  %v4991_v3 = vpop.xlane.xlu0 %739  ;;  %3764 = vpow2.f32 %v927_v13 }
 0x1fb   :  { %7939 = vst [vmem:[#allocation131_spill] sm:$0xff] %v4966_v46  ;;  %v693_v58 = vpop.f32.mrf.mxu3  ;;  %vm1884_vm8 = vcmp.eq.f32.partialorder %v4707_v52, %v4991_v3 }
 0x1fc   :  { %7945 = vst [vmem:[#allocation137_spill] sm:$0xff] %v4991_v3  ;;  %v4997_v50 = vadd.f32 %v4559_v19, %v693_v58 }
 0x1fd   :  { %761 = vmax.xlane.f32.xlu2 %v4944_v5  ;;  %2091 = vmin.xlane.f32.xlu1 %v4946_v63  ;;  %v616_v32 = vpop.f32.mrf.mxu1 }
 0x1fe   :  { %1051 = vadd.xlane.f32.xlu0 %v3755_v40  ;;  %v4975_v40 = vsel %vm1882_vm7, %v4778_v39, 128  ;;  %7947 = vst [vmem:[#allocation139_spill] sm:$0xff] %v4997_v50  ;;  %v5011_v22 = vadd.f32 %v4559_v19, %v616_v32 }
 0x1ff   :  { %7941 = vst [vmem:[#allocation133_spill] sm:$0xff] %v4975_v40  ;;  %v2102_v57 = vshra.s32 %v4975_v40, 16 }
 0x200   :  { %7951 = vst [vmem:[#allocation143_spill] sm:$0xff] %v5011_v22 }
 0x201   :  { %v4987_v55 = vcvt.s32.f32 %v2102_v57 }
 0x202   :  { %v4993_v56 = vpop.xlane.xlu1 %741 }
 0x203   :  { %7944 = vst [vmem:[#allocation136_spill] sm:$0xff] %v4987_v55  ;;  %v696_v26 = vpop.f32.mrf.mxu3  ;;  %vm1885_vm10 = vcmp.eq.f32.partialorder %v4722_v23, %v4993_v56 }
 0x204   :  { %7946 = vst [vmem:[#allocation138_spill] sm:$0xff] %v4993_v56  ;;  %v5014_v58 = vadd.f32 %v4559_v19, %v696_v26 }
 0x205   :  { %2077 = vmin.xlane.f32.xlu2 %v4960_v45  ;;  %1113 = vadd.xlane.f32.xlu1 %v3757_v16  ;;  %v4984_v16 = vpop.xlane.xlu2 %803  ;;  %v618_v40 = vpop.f32.mrf.mxu1 }
 0x206   :  { %763 = vmax.xlane.f32.xlu0 %v4969_v2  ;;  %7943 = vst [vmem:[#allocation135_spill] sm:$0xff] %v4984_v16 }
 0x207   :  { %7952 = vst [vmem:[#allocation144_spill] sm:$0xff] %v5014_v58 }
 0x20a   :  { %v5002_v24 = vpop.xlane.xlu0 %805 }
 0x20b   :  { %7949 = vst [vmem:[#allocation141_spill] sm:$0xff] %v5002_v24 }
 0x20d   :  { %1115 = vadd.xlane.f32.xlu2 %v3759_v17  ;;  %825 = vmax.xlane.f32.xlu1 %v4982_v21  ;;  %v3761_v17 = vpop.eup %3760  ;;  %v4999_v57 = vpop.xlane.xlu2 %743 }
 0x20e   :  { %2105 = vmin.xlane.f32.xlu0 %v4987_v55  ;;  %7948 = vst [vmem:[#allocation140_spill] sm:$0xff] %v4999_v57  ;;  %v3763_v11 = vpop.eup %3762  ;;  %v929_v55 = vmul.f32 1.442695, %v857_v0  ;;  %vm1886_vm12 = vcmp.eq.f32.partialorder %v4734_v44, %v4999_v57 }
 0x210   :  { %3766 = vpow2.f32 %v929_v55  ;;  %v889_v55 = vsub.f32 %v4710_v36, %v4966_v46  ;;  %v5062_v36 = vsel %vm1885_vm10, %v4778_v39, 128 }
 0x211   :  { %7964 = vst [vmem:[#allocation156_spill] sm:$0xff] %v5062_v36 }
 0x212   :  { %v5004_v54 = vpop.xlane.xlu1 %807  ;;  %v5026_v26 = vpop.xlane.xlu0 %745  ;;  %v993_v43 = vmul.f32 1.442695, %v889_v55 }
 0x213   :  { %7950 = vst [vmem:[#allocation142_spill] sm:$0xff] %v5004_v54  ;;  %v698_v55 = vpop.f32.mrf.mxu3  ;;  %vm1887_vm11 = vcmp.eq.f32.partialorder %v4748_v30, %v5026_v26 }
 0x214   :  { %7955 = vst [vmem:[#allocation147_spill] sm:$0xff] %v5026_v26 }
 0x215   :  { %827 = vmax.xlane.f32.xlu2 %v4997_v50  ;;  %1053 = vadd.xlane.f32.xlu1 %v3761_v17  ;;  %v3765_v17 = vpop.eup %3764  ;;  %v5017_v50 = vsel %vm1884_vm8, %v4778_v39, 128 }
 0x216   :  { %1117 = vadd.xlane.f32.xlu0 %v3763_v11  ;;  %7953 = vst [vmem:[#allocation145_spill] sm:$0xff] %v5017_v50  ;;  %v888_v11 = vsub.f32 %v4695_v9, %v4964_v53  ;;  %v2130_v32 = vshra.s32 %v5017_v50, 16  ;;  %v5038_v9 = vsel %vm1883_vm9, %v4778_v39, 128  ;;  %v3767_v53 = vpop.eup %3766 }
 0x217   :  { %7959 = vst [vmem:[#allocation151_spill] sm:$0xff] %v5038_v9 }
 0x218   :  { %v991_v0 = vmul.f32 1.442695, %v888_v11  ;;  %v621_v11 = vpop.f32.mrf.mxu1 }
 0x21a   :  { %v5019_v13 = vpop.xlane.xlu2 %809  ;;  %v5028_v63 = vpop.xlane.xlu1 %747  ;;  %3768 = vpow2.f32 %v991_v0 }
 0x21b   :  { %7954 = vst [vmem:[#allocation146_spill] sm:$0xff] %v5019_v13  ;;  %3770 = vpow2.f32 %v993_v43  ;;  %v5075_v43 = vadd.f32 %v4559_v19, %v698_v55  ;;  %vm1888_vm13 = vcmp.eq.f32.partialorder %v4764_v61, %v5028_v63 }
 0x21c   :  { %7956 = vst [vmem:[#allocation148_spill] sm:$0xff] %v5028_v63 }
 0x21d   :  { %1055 = vadd.xlane.f32.xlu2 %v3765_v17  ;;  %765 = vmax.xlane.f32.xlu1 %v5011_v22  ;;  %v5033_v17 = vadd.f32 %v4559_v19, %v618_v40  ;;  %v5035_v22 = vcvt.s32.f32 %v2130_v32  ;;  %v2116_v40 = vshra.s32 %v5038_v9, 16  ;;  %7967 = vst [vmem:[#allocation159_spill] sm:$0xff] %v5075_v43 }
 0x21e   :  { %829 = vmax.xlane.f32.xlu0 %v5014_v58  ;;  %v5052_v58 = vadd.f32 %v4559_v19, %v621_v11  ;;  %v890_v11 = vsub.f32 %v4725_v38, %v4984_v16  ;;  %v859_v38 = vsub.f32 %v4722_v23, %v4993_v56  ;;  %v701_v16 = vpop.f32.mrf.mxu3  ;;  %v860_v23 = vsub.f32 %v4734_v44, %v4999_v57 }
 0x21f   :  { %7957 = vst [vmem:[#allocation149_spill] sm:$0xff] %v5033_v17 }
 0x220   :  { %7958 = vst [vmem:[#allocation150_spill] sm:$0xff] %v5035_v22  ;;  %v3769_v0 = vpop.eup %3768  ;;  %v933_v55 = vmul.f32 1.442695, %v859_v38 }
 0x221   :  { %7962 = vst [vmem:[#allocation154_spill] sm:$0xff] %v5052_v58 }
 0x222   :  { %v5044_v50 = vpop.xlane.xlu2 %749  ;;  %v5047_v32 = vpop.xlane.xlu0 %811 }
 0x223   :  { %7960 = vst [vmem:[#allocation152_spill] sm:$0xff] %v5044_v50  ;;  %vm1889_vm15 = vcmp.eq.f32.partialorder %v4776_v42, %v5044_v50 }
 0x224   :  { %7961 = vst [vmem:[#allocation153_spill] sm:$0xff] %v5047_v32 }
 0x225   :  { %767 = vmax.xlane.f32.xlu2 %v5033_v17  ;;  %2133 = vmin.xlane.f32.xlu1 %v5035_v22  ;;  %v5054_v22 = vcvt.s32.f32 %v2116_v40 }
 0x226   :  { %1057 = vadd.xlane.f32.xlu0 %v3767_v53  ;;  %v858_v53 = vsub.f32 %v4707_v52, %v4991_v3  ;;  %v3771_v52 = vpop.eup %3770  ;;  %v995_v3 = vmul.f32 1.442695, %v890_v11 }
 0x227   :  { %7963 = vst [vmem:[#allocation155_spill] sm:$0xff] %v5054_v22 }
 0x228   :  { %v5049_v41 = vpop.xlane.xlu1 %2007 }
 0x229   :  { %vm2009_vm1 = vcmp.eq.f32.partialorder %v4795_v48, %v5049_v41 }
 0x22a   :  { %v5072_v9 = vpop.xlane.xlu0 %751 }
 0x22b   :  { %7966 = vst [vmem:[#allocation158_spill] sm:$0xff] %v5072_v9  ;;  %vm1890_vm14 = vcmp.eq.f32.partialorder %v4804_v47, %v5072_v9 }
 0x22d   :  { %2119 = vmin.xlane.f32.xlu2 %v5054_v22  ;;  %1119 = vadd.xlane.f32.xlu1 %v3769_v0  ;;  %v2144_v22 = vshra.s32 %v5062_v36, 16  ;;  %v931_v0 = vmul.f32 1.442695, %v858_v53 }
 0x22e   :  { %769 = vmax.xlane.f32.xlu0 %v5052_v58 }
 0x22f   :  { %v5078_v58 = vcvt.s32.f32 %v2144_v22  ;;  %3772 = vpow2.f32 %v931_v0  ;;  %v623_v0 = vpop.f32.mrf.mxu1 }
 0x230   :  { %v5067_v40 = vpop.xlane.xlu1 %813  ;;  %v5069_v46 = vpop.xlane.xlu2 %2021  ;;  %3774 = vpow2.f32 %v995_v3 }
 0x231   :  { %7965 = vst [vmem:[#allocation157_spill] sm:$0xff] %v5067_v40  ;;  %3776 = vpow2.f32 %v933_v55  ;;  %vm2023_vm5 = vcmp.eq.f32.partialorder %v4821_v28, %v5069_v46 }
 0x232   :  { %7968 = vst [vmem:[#allocation160_spill] sm:$0xff] %v5078_v58 }
 0x235   :  { %1121 = vadd.xlane.f32.xlu2 %v3771_v52  ;;  %831 = vmax.xlane.f32.xlu1 %v5075_v43  ;;  %v5090_v52 = vadd.f32 %v4559_v19, %v701_v16  ;;  %v3773_v22 = vpop.eup %3772  ;;  %v703_v19 = vpop.f32.mrf.mxu3  ;;  %v5106_v16 = vld [vmem:[%s7378_s4] ss:$0 sm:$0xff] }
 0x236   :  { %2147 = vmin.xlane.f32.xlu0 %v5078_v58  ;;  %v3775_v11 = vpop.eup %3774  ;;  %v5109_v55 = vadd.f32 %v5106_v16, %v623_v0  ;;  %v5115_v58 = vadd.f32 %v5106_v16, %v703_v19 }
 0x237   :  { %7972 = vst [vmem:[#allocation164_spill] sm:$0xff] %v5090_v52 }
 0x238   :  { %v5083_v53 = vpop.xlane.xlu1 %1041  ;;  %v5085_v36 = vpop.xlane.xlu2 %815  ;;  %7976 = vst [vmem:[#allocation168_spill] sm:$0xff] %v5109_v55 }
 0x239   :  { %7969 = vst [vmem:[#allocation161_spill] sm:$0xff] %v5083_v53  ;;  %v5087_v17 = vpop.xlane.xlu0 %1105 }
 0x23a   :  { %7970 = vst [vmem:[#allocation162_spill] sm:$0xff] %v5085_v36 }
 0x23b   :  { %7971 = vst [vmem:[#allocation163_spill] sm:$0xff] %v5087_v17  ;;  %v5112_v17 = vsel %vm1887_vm11, %v4778_v39, 128 }
 0x23c   :  { %7977 = vst [vmem:[#allocation169_spill] sm:$0xff] %v5112_v17  ;;  %v2172_v0 = vshra.s32 %v5112_v17, 16 }
 0x23d   :  { %833 = vmax.xlane.f32.xlu2 %v5090_v52  ;;  %1059 = vadd.xlane.f32.xlu1 %v3773_v22  ;;  %v3777_v22 = vpop.eup %3776  ;;  %7978 = vst [vmem:[#allocation170_spill] sm:$0xff] %v5115_v58  ;;  %v891_v52 = vsub.f32 %v4737_v60, %v5002_v24  ;;  %v5136_v24 = vsel %vm1886_vm12, %v4778_v39, 128 }
 0x23e   :  { %1123 = vadd.xlane.f32.xlu0 %v3775_v11  ;;  %v935_v11 = vmul.f32 1.442695, %v860_v23  ;;  %v5133_v60 = vcvt.s32.f32 %v2172_v0  ;;  %7982 = vst [vmem:[#allocation174_spill] sm:$0xff] %v5136_v24 }
 0x23f   :  { %v997_v19 = vmul.f32 1.442695, %v891_v52  ;;  %v2158_v52 = vshra.s32 %v5136_v24, 16 }
 0x240   :  { %v5095_v56 = vpop.xlane.xlu1 %753  ;;  %v5097_v3 = vpop.xlane.xlu2 %1043  ;;  %3778 = vpow2.f32 %v935_v11  ;;  %7981 = vst [vmem:[#allocation173_spill] sm:$0xff] %v5133_v60  ;;  %v892_v11 = vsub.f32 %v4751_v7, %v5004_v54  ;;  %v5160_v7 = vsel %vm1888_vm13, %v4778_v39, 128 }
 0x241   :  { %7973 = vst [vmem:[#allocation165_spill] sm:$0xff] %v5095_v56  ;;  %v5101_v38 = vpop.xlane.xlu0 %817  ;;  %3780 = vpow2.f32 %v997_v19  ;;  %vm1891_vm0 = vcmp.eq.f32.partialorder %v4844_v6, %v5095_v56 }
 0x242   :  { %7974 = vst [vmem:[#allocation166_spill] sm:$0xff] %v5097_v3  ;;  %v626_v3 = vpop.f32.mrf.mxu1  ;;  %v999_v0 = vmul.f32 1.442695, %v892_v11  ;;  %v861_v11 = vsub.f32 %v4748_v30, %v5026_v26 }
 0x243   :  { %7975 = vst [vmem:[#allocation167_spill] sm:$0xff] %v5101_v38 }
 0x244   :  { %3782 = vpow2.f32 %v999_v0  ;;  %7987 = vst [vmem:[#allocation179_spill] sm:$0xff] %v5160_v7 }
 0x245   :  { %1061 = vadd.xlane.f32.xlu2 %v3777_v22  ;;  %771 = vmax.xlane.f32.xlu1 %v5109_v55  ;;  %v5131_v55 = vadd.f32 %v5106_v16, %v626_v3 }
 0x246   :  { %835 = vmax.xlane.f32.xlu0 %v5115_v58  ;;  %v3779_v58 = vpop.eup %3778 }
 0x247   :  { %7980 = vst [vmem:[#allocation172_spill] sm:$0xff] %v5131_v55  ;;  %v3781_v19 = vpop.eup %3780 }
 0x248   :  { %v5122_v53 = vpop.xlane.xlu1 %2049  ;;  %v5124_v23 = vpop.xlane.xlu2 %755 }
 0x249   :  { %7979 = vst [vmem:[#allocation171_spill] sm:$0xff] %v5124_v23  ;;  %v5128_v22 = vpop.xlane.xlu0 %1045  ;;  %vm1892_vm2 = vcmp.eq.f32.partialorder %v4867_v4, %v5124_v23  ;;  %vm2051_vm6 = vcmp.eq.f32.partialorder %v4871_v12, %v5122_v53 }
 0x24a   :  { %v628_v57 = vpop.f32.mrf.mxu1  ;;  %v3783_v30 = vpop.eup %3782 }
 0x24d   :  { %773 = vmax.xlane.f32.xlu2 %v5131_v55  ;;  %2175 = vmin.xlane.f32.xlu1 %v5133_v60  ;;  %v5151_v60 = vcvt.s32.f32 %v2158_v52  ;;  %v5154_v55 = vadd.f32 %v5106_v16, %v628_v57  ;;  %v893_v52 = vsub.f32 %v4767_v10, %v5019_v13  ;;  %v862_v10 = vsub.f32 %v4764_v61, %v5028_v63 }
 0x24e   :  { %1063 = vadd.xlane.f32.xlu0 %v3779_v58  ;;  %v706_v58 = vpop.f32.mrf.mxu3 }
 0x24f   :  { %7985 = vst [vmem:[#allocation177_spill] sm:$0xff] %v5151_v60  ;;  %v5173_v0 = vadd.f32 %v5106_v16, %v706_v58  ;;  %v1001_v26 = vmul.f32 1.442695, %v893_v52  ;;  %v939_v58 = vmul.f32 1.442695, %v862_v10 }
 0x250   :  { %v5143_v44 = vpop.xlane.xlu2 %2035  ;;  %v5145_v3 = vpop.xlane.xlu1 %1107  ;;  %7986 = vst [vmem:[#allocation178_spill] sm:$0xff] %v5154_v55 }
 0x251   :  { %7983 = vst [vmem:[#allocation175_spill] sm:$0xff] %v5145_v3  ;;  %v5147_v17 = vpop.xlane.xlu0 %757  ;;  %v2186_v3 = vshra.s32 %v5160_v7, 16  ;;  %vm2037_vm3 = vcmp.eq.f32.partialorder %v4884_v14, %v5143_v44 }
 0x252   :  { %7984 = vst [vmem:[#allocation176_spill] sm:$0xff] %v5147_v17  ;;  %v631_v52 = vpop.f32.mrf.mxu1  ;;  %vm1893_vm4 = vcmp.eq.f32.partialorder %v4882_v29, %v5147_v17 }
 0x253   :  { %7991 = vst [vmem:[#allocation183_spill] sm:$0xff] %v5173_v0 }
 0x255   :  { %2161 = vmin.xlane.f32.xlu2 %v5151_v60  ;;  %1125 = vadd.xlane.f32.xlu1 %v3781_v19  ;;  %v937_v60 = vmul.f32 1.442695, %v861_v11 }
 0x256   :  { %775 = vmax.xlane.f32.xlu0 %v5154_v55  ;;  %v5176_v55 = vcvt.s32.f32 %v2186_v3  ;;  %v708_v13 = vpop.f32.mrf.mxu3 }
 0x257   :  { %3784 = vpow2.f32 %v937_v60 }
 0x258   :  { %v5165_v54 = vpop.xlane.xlu2 %1109  ;;  %v5167_v57 = vpop.xlane.xlu1 %819  ;;  %7992 = vst [vmem:[#allocation184_spill] sm:$0xff] %v5176_v55  ;;  %3786 = vpow2.f32 %v1001_v26  ;;  %v863_v26 = vsub.f32 %v4776_v42, %v5044_v50  ;;  %v895_v42 = vsub.f32 %v4817_v20, %v5067_v40 }
 0x259   :  { %7988 = vst [vmem:[#allocation180_spill] sm:$0xff] %v5165_v54  ;;  %v5170_v19 = vpop.xlane.xlu0 %2063  ;;  %3788 = vpow2.f32 %v939_v58  ;;  %v898_v28 = vsub.f32 %v4901_v18, %v5167_v57 }
 0x25a   :  { %7989 = vst [vmem:[#allocation181_spill] sm:$0xff] %v5167_v57  ;;  %vm2065_vm10 = vcmp.eq.f32.partialorder %v4906_v62, %v5170_v19  ;;  %v2087_v62 = vand.u32 65535, %v4929_v37 }
 0x25b   :  { %7990 = vst [vmem:[#allocation182_spill] sm:$0xff] %v5170_v19 }
 0x25d   :  { %1127 = vadd.xlane.f32.xlu2 %v3783_v30  ;;  %837 = vmax.xlane.f32.xlu1 %v5173_v0  ;;  %v5188_v30 = vadd.f32 %v5106_v16, %v708_v13  ;;  %v3785_v3 = vpop.eup %3784  ;;  %v633_v0 = vpop.f32.mrf.mxu1 }
 0x25e   :  { %2189 = vmin.xlane.f32.xlu0 %v5176_v55  ;;  %v3787_v60 = vpop.eup %3786  ;;  %v711_v61 = vpop.f32.mrf.mxu3  ;;  %v5208_v55 = vsel %vm1890_vm14, %v4778_v39, 128 }
 0x25f   :  { %7995 = vst [vmem:[#allocation187_spill] sm:$0xff] %v5188_v30  ;;  %v3789_v58 = vpop.eup %3788 }
 0x260   :  { %v5181_v11 = vpop.xlane.xlu2 %821  ;;  %v5183_v54 = vpop.xlane.xlu1 %1047  ;;  %8000 = vst [vmem:[#allocation192_spill] sm:$0xff] %v5208_v55 }
 0x261   :  { %7993 = vst [vmem:[#allocation185_spill] sm:$0xff] %v5181_v11  ;;  %v5185_v7 = vpop.xlane.xlu0 %1111 }
 0x262   :  { %7994 = vst [vmem:[#allocation186_spill] sm:$0xff] %v5185_v7  ;;  %v5202_v7 = vadd.f32 %v5106_v16, %v631_v52  ;;  %v2214_v52 = vshra.s32 %v5208_v55, 16 }
 0x264   :  { %7998 = vst [vmem:[#allocation190_spill] sm:$0xff] %v5202_v7 }
 0x265   :  { %839 = vmax.xlane.f32.xlu2 %v5188_v30  ;;  %1065 = vadd.xlane.f32.xlu1 %v3785_v3  ;;  %v5205_v3 = vadd.f32 %v5106_v16, %v711_v61  ;;  %v894_v30 = vsub.f32 %v4781_v31, %v5047_v32  ;;  %v5226_v31 = vcvt.s32.f32 %v2214_v52  ;;  %v5229_v32 = vsel %vm1889_vm15, %v4778_v39, 128 }
 0x266   :  { %1129 = vadd.xlane.f32.xlu0 %v3787_v60  ;;  %v941_v60 = vmul.f32 1.442695, %v863_v26  ;;  %v2200_v50 = vshra.s32 %v5229_v32, 16  ;;  %v713_v20 = vpop.f32.mrf.mxu3 }
 0x267   :  { %7999 = vst [vmem:[#allocation191_spill] sm:$0xff] %v5205_v3  ;;  %v1003_v26 = vmul.f32 1.442695, %v894_v30  ;;  %v636_v30 = vpop.f32.mrf.mxu1 }
 0x268   :  { %v5193_v63 = vpop.xlane.xlu2 %1049  ;;  %v5195_v10 = vpop.xlane.xlu1 %759  ;;  %3790 = vpow2.f32 %v941_v60  ;;  %8004 = vst [vmem:[#allocation196_spill] sm:$0xff] %v5226_v31 }
 0x269   :  { %7996 = vst [vmem:[#allocation188_spill] sm:$0xff] %v5195_v10  ;;  %v5199_v13 = vpop.xlane.xlu0 %823  ;;  %3792 = vpow2.f32 %v1003_v26  ;;  %v868_v12 = vsub.f32 %v4926_v49, %v5195_v10  ;;  %vm1894_vm7 = vcmp.eq.f32.partialorder %v4926_v49, %v5195_v10 }
 0x26a   :  { %7997 = vst [vmem:[#allocation189_spill] sm:$0xff] %v5199_v13 }
 0x26d   :  { %1067 = vadd.xlane.f32.xlu2 %v3789_v58  ;;  %777 = vmax.xlane.f32.xlu1 %v5202_v7  ;;  %v5224_v7 = vadd.f32 %v5106_v16, %v633_v0 }
 0x26e   :  { %841 = vmax.xlane.f32.xlu0 %v5205_v3  ;;  %v3791_v60 = vpop.eup %3790  ;;  %v1005_v3 = vmul.f32 1.442695, %v895_v42  ;;  %v2003_v42 = vand.u32 65535, %v4790_v51  ;;  %v865_v51 = vsub.f32 %v4844_v6, %v5095_v56  ;;  %v2031_v6 = vand.u32 65535, %v4874_v59 }
 0x26f   :  { %8003 = vst [vmem:[#allocation195_spill] sm:$0xff] %v5224_v7  ;;  %v3793_v26 = vpop.eup %3792 }
 0x270   :  { %v5215_v24 = vpop.xlane.xlu2 %761  ;;  %v5217_v61 = vpop.xlane.xlu1 %2091  ;;  %3794 = vpow2.f32 %v1005_v3 }
 0x271   :  { %8001 = vst [vmem:[#allocation193_spill] sm:$0xff] %v5215_v24  ;;  %v5221_v58 = vpop.xlane.xlu0 %1051  ;;  %vm1895_vm8 = vcmp.eq.f32.partialorder %v4944_v5, %v5215_v24 }
 0x272   :  { %8002 = vst [vmem:[#allocation194_spill] sm:$0xff] %v5217_v61 }
 0x275   :  { %779 = vmax.xlane.f32.xlu2 %v5224_v7  ;;  %2217 = vmin.xlane.f32.xlu1 %v5226_v31  ;;  %v5243_v7 = vadd.f32 %v5106_v16, %v636_v30  ;;  %v5245_v31 = vcvt.s32.f32 %v2200_v50 }
 0x276   :  { %1069 = vadd.xlane.f32.xlu0 %v3791_v60  ;;  %v864_v60 = vsub.f32 %v4804_v47, %v5072_v9  ;;  %v3795_v3 = vpop.eup %3794  ;;  %v2005_v47 = vcvt.s32.f32 %v2003_v42  ;;  %v716_v42 = vpop.f32.mrf.mxu3 }
 0x277   :  { %8008 = vst [vmem:[#allocation200_spill] sm:$0xff] %v5243_v7 }
 0x278   :  { %v5236_v0 = vpop.xlane.xlu2 %2077  ;;  %v5238_v52 = vpop.xlane.xlu1 %1113  ;;  %v943_v30 = vmul.f32 1.442695, %v864_v60  ;;  %v2010_v60 = vsel %vm2009_vm1, %v2005_v47, inf }
 0x279   :  { %8005 = vst [vmem:[#allocation197_spill] sm:$0xff] %v5236_v0  ;;  %v5240_v55 = vpop.xlane.xlu0 %763  ;;  %vm2079_vm11 = vcmp.eq.f32.partialorder %v4960_v45, %v5236_v0 }
 0x27a   :  { %8006 = vst [vmem:[#allocation198_spill] sm:$0xff] %v5238_v52  ;;  %3796 = vpow2.f32 %v943_v30  ;;  %v5279_v30 = vadd.f32 %v5106_v16, %v716_v42  ;;  %vm1896_vm9 = vcmp.eq.f32.partialorder %v4969_v2, %v5240_v55 }
 0x27b   :  { %8007 = vst [vmem:[#allocation199_spill] sm:$0xff] %v5240_v55 }
 0x27c   :  { %8016 = vst [vmem:[#allocation208_spill] sm:$0xff] %v5279_v30 }
 0x27d   :  { %2203 = vmin.xlane.f32.xlu2 %v5245_v31  ;;  %1131 = vadd.xlane.f32.xlu1 %v3793_v26  ;;  %v5261_v26 = vadd.f32 %v5106_v16, %v713_v20 }
 0x27e   :  { %781 = vmax.xlane.f32.xlu0 %v5243_v7  ;;  %v945_v7 = vmul.f32 1.442695, %v865_v51  ;;  %v896_v51 = vsub.f32 %v4834_v25, %v5085_v36  ;;  %v5302_v25 = vsel %vm1892_vm2, %v4778_v39, 128  ;;  %v2017_v36 = vand.u32 65535, %v4812_v34 }
 0x27f   :  { %8012 = vst [vmem:[#allocation204_spill] sm:$0xff] %v5261_v26 }
 0x280   :  { %v5252_v40 = vpop.xlane.xlu2 %1115  ;;  %v5254_v52 = vpop.xlane.xlu1 %825  ;;  %3798 = vpow2.f32 %v945_v7  ;;  %v1007_v59 = vmul.f32 1.442695, %v896_v51  ;;  %8021 = vst [vmem:[#allocation213_spill] sm:$0xff] %v5302_v25 }
 0x281   :  { %8009 = vst [vmem:[#allocation201_spill] sm:$0xff] %v5252_v40  ;;  %v5256_v50 = vpop.xlane.xlu0 %2105  ;;  %v5269_v40 = vsel %vm1891_vm0, %v4778_v39, 128 }
 0x282   :  { %8010 = vst [vmem:[#allocation202_spill] sm:$0xff] %v5254_v52  ;;  %v2228_v48 = vshra.s32 %v5269_v40, 16  ;;  %3800 = vpow2.f32 %v1007_v59 }
 0x283   :  { %8011 = vst [vmem:[#allocation203_spill] sm:$0xff] %v5256_v50 }
 0x284   :  { %8013 = vst [vmem:[#allocation205_spill] sm:$0xff] %v5269_v40  ;;  %v5282_v47 = vcvt.s32.f32 %v2228_v48  ;;  %v2033_v48 = vcvt.s32.f32 %v2031_v6  ;;  %v2019_v6 = vcvt.s32.f32 %v2017_v36 }
 0x285   :  { %1133 = vadd.xlane.f32.xlu2 %v3795_v3  ;;  %843 = vmax.xlane.f32.xlu1 %v5261_v26  ;;  %v3797_v26 = vpop.eup %3796 }
 0x286   :  { %2011 = vmin.xlane.f32.xlu0 %v2010_v60  ;;  %8017 = vst [vmem:[#allocation209_spill] sm:$0xff] %v5282_v47  ;;  %v638_v60 = vpop.f32.mrf.mxu1  ;;  %v3799_v7 = vpop.eup %3798  ;;  %v2024_v34 = vsel %vm2023_vm5, %v2019_v6, inf }
 0x288   :  { %v5271_v9 = vpop.xlane.xlu2 %827  ;;  %v5273_v20 = vpop.xlane.xlu1 %1053 }
 0x289   :  { %8014 = vst [vmem:[#allocation206_spill] sm:$0xff] %v5271_v9  ;;  %v5276_v3 = vpop.xlane.xlu0 %1117  ;;  %v3801_v59 = vpop.eup %3800 }
 0x28a   :  { %8015 = vst [vmem:[#allocation207_spill] sm:$0xff] %v5276_v3 }
 0x28d   :  { %845 = vmax.xlane.f32.xlu2 %v5279_v30  ;;  %1071 = vadd.xlane.f32.xlu1 %v3797_v26  ;;  %v5297_v26 = vadd.f32 %v5106_v16, %v638_v60  ;;  %v2242_v30 = vshra.s32 %v5302_v25, 16 }
 0x28e   :  { %2231 = vmin.xlane.f32.xlu0 %v5282_v47  ;;  %v2038_v47 = vsel %vm2037_vm3, %v2033_v48, inf  ;;  %v2045_v48 = vand.u32 65535, %v4852_v1 }
 0x28f   :  { %8020 = vst [vmem:[#allocation212_spill] sm:$0xff] %v5297_v26  ;;  %v5317_v51 = vcvt.s32.f32 %v2242_v30  ;;  %v866_v30 = vsub.f32 %v4867_v4, %v5124_v23  ;;  %v867_v4 = vsub.f32 %v4882_v29, %v5147_v17 }
 0x290   :  { %v5288_v40 = vpop.xlane.xlu2 %1055  ;;  %v5290_v3 = vpop.xlane.xlu1 %765 }
 0x291   :  { %8018 = vst [vmem:[#allocation210_spill] sm:$0xff] %v5290_v3  ;;  %v5294_v42 = vpop.xlane.xlu0 %829 }
 0x292   :  { %8019 = vst [vmem:[#allocation211_spill] sm:$0xff] %v5294_v42 }
 0x293   :  { %8024 = vst [vmem:[#allocation216_spill] sm:$0xff] %v5317_v51 }
 0x295   :  { %1073 = vadd.xlane.f32.xlu2 %v3799_v7  ;;  %783 = vmax.xlane.f32.xlu1 %v5297_v26  ;;  %v897_v7 = vsub.f32 %v4849_v8, %v5101_v38  ;;  %v718_v38 = vpop.f32.mrf.mxu3  ;;  %v8117_v26 = vld [vmem:[#allocation169_spill] sm:$0xff] }
 0x296   :  { %2039 = vmin.xlane.f32.xlu0 %v2038_v47  ;;  %v5320_v47 = vsel %vm1893_vm4, %v4778_v39, 128  ;;  %v5344_v23 = vadd.f32 %v5106_v16, %v718_v38 }
 0x297   :  { %8025 = vst [vmem:[#allocation217_spill] sm:$0xff] %v5320_v47  ;;  %v2256_v36 = vshra.s32 %v5320_v47, 16  ;;  %v1009_v8 = vmul.f32 1.442695, %v897_v7  ;;  %v8107_v47 = vld [vmem:[#allocation156_spill] sm:$0xff] }
 0x298   :  { %v5307_v60 = vpop.xlane.xlu2 %767  ;;  %v5309_v56 = vpop.xlane.xlu1 %2133  ;;  %8030 = vst [vmem:[#allocation222_spill] sm:$0xff] %v5344_v23  ;;  %v2143_v19 = vand.u32 65535, %v8107_v47 }
 0x299   :  { %8022 = vst [vmem:[#allocation214_spill] sm:$0xff] %v5307_v60  ;;  %v5315_v14 = vpop.xlane.xlu0 %1057  ;;  %v5339_v18 = vcvt.s32.f32 %v2256_v36  ;;  %3802 = vpow2.f32 %v1009_v8  ;;  %v949_v8 = vmul.f32 1.442695, %v867_v4  ;;  %v5359_v36 = vsel %vm1894_vm7, %v4778_v39, 128 }
 0x29a   :  { %8023 = vst [vmem:[#allocation215_spill] sm:$0xff] %v5309_v56 }
 0x29b   :  { %8029 = vst [vmem:[#allocation221_spill] sm:$0xff] %v5339_v18 }
 0x29c   :  { %8034 = vst [vmem:[#allocation226_spill] sm:$0xff] %v5359_v36 }
 0x29d   :  { %2245 = vmin.xlane.f32.xlu2 %v5317_v51  ;;  %2025 = vmin.xlane.f32.xlu1 %v2024_v34  ;;  %v1011_v34 = vmul.f32 1.442695, %v898_v28  ;;  %v2047_v51 = vcvt.s32.f32 %v2045_v48  ;;  %v951_v48 = vmul.f32 1.442695, %v868_v12 }
 0x29e   :  { %1135 = vadd.xlane.f32.xlu0 %v3801_v59  ;;  %v947_v59 = vmul.f32 1.442695, %v866_v30 }
 0x29f   :  { %v2052_v57 = vsel %vm2051_vm6, %v2047_v51, inf  ;;  %3804 = vpow2.f32 %v1011_v34  ;;  %v3803_v38 = vpop.eup %3802  ;;  %v2270_v34 = vshra.s32 %v5359_v36, 16 }
 0x2a0   :  { %v5331_v6 = vpop.xlane.xlu2 %2119  ;;  %v5333_v25 = vpop.xlane.xlu1 %1119  ;;  %3806 = vpow2.f32 %v947_v59 }
 0x2a1   :  { %8026 = vst [vmem:[#allocation218_spill] sm:$0xff] %v5331_v6  ;;  %v5337_v1 = vpop.xlane.xlu0 %769  ;;  %3808 = vpow2.f32 %v949_v8 }
 0x2a2   :  { %8027 = vst [vmem:[#allocation219_spill] sm:$0xff] %v5333_v25  ;;  %3810 = vpow2.f32 %v951_v48  ;;  %v5373_v48 = vcvt.s32.f32 %v2270_v34 }
 0x2a3   :  { %8028 = vst [vmem:[#allocation220_spill] sm:$0xff] %v5337_v1 }
 0x2a4   :  { %8038 = vst [vmem:[#allocation230_spill] sm:$0xff] %v5373_v48 }
 0x2a5   :  { %2053 = vmin.xlane.f32.xlu2 %v2052_v57  ;;  %2259 = vmin.xlane.f32.xlu1 %v5339_v18  ;;  %v3805_v16 = vpop.eup %3804  ;;  %v8105_v18 = vld [vmem:[#allocation21_spill] sm:$0xff] }
 0x2a6   :  { %847 = vmax.xlane.f32.xlu0 %v5344_v23  ;;  %v3807_v57 = vpop.eup %3806 }
 0x2a7   :  { %v3809_v12 = vpop.eup %3808 }
 0x2a8   :  { %v5350_v7 = vpop.xlane.xlu2 %1121  ;;  %v5352_v51 = vpop.xlane.xlu1 %831 }
 0x2a9   :  { %8031 = vst [vmem:[#allocation223_spill] sm:$0xff] %v5350_v7  ;;  %v5354_v28 = vpop.xlane.xlu0 %2147  ;;  %v3811_v8 = vpop.eup %3810  ;;  %v2073_v7 = vand.u32 65535, %v4951_v15 }
 0x2aa   :  { %8032 = vst [vmem:[#allocation224_spill] sm:$0xff] %v5352_v51 }
 0x2ab   :  { %8033 = vst [vmem:[#allocation225_spill] sm:$0xff] %v5354_v28 }
 0x2ad   :  { %1139 = vadd.xlane.f32.xlu2 %v3805_v16  ;;  %1137 = vadd.xlane.f32.xlu1 %v3803_v38  ;;  %v5371_v38 = vsel %vm1895_vm8, %v4778_v39, 128  ;;  %v2059_v16 = vand.u32 65535, %v4894_v35 }
 0x2ae   :  { %1075 = vadd.xlane.f32.xlu0 %v3807_v57  ;;  %8037 = vst [vmem:[#allocation229_spill] sm:$0xff] %v5371_v38  ;;  %v2284_v57 = vshra.s32 %v5371_v38, 16 }
 0x2af   :  { %v2061_v34 = vcvt.s32.f32 %v2059_v16  ;;  %v901_v16 = vsub.f32 %v4982_v21, %v5254_v52  ;;  %v2089_v21 = vcvt.s32.f32 %v2087_v62 }
 0x2b0   :  { %v5361_v30 = vpop.xlane.xlu2 %833  ;;  %v5363_v4 = vpop.xlane.xlu1 %1059 }
 0x2b1   :  { %8035 = vst [vmem:[#allocation227_spill] sm:$0xff] %v5361_v30  ;;  %v5368_v59 = vpop.xlane.xlu0 %1123  ;;  %v1017_v37 = vmul.f32 1.442695, %v901_v16 }
 0x2b2   :  { %8036 = vst [vmem:[#allocation228_spill] sm:$0xff] %v5368_v59  ;;  %v899_v59 = vsub.f32 %v4912_v27, %v5181_v11  ;;  %v2075_v27 = vcvt.s32.f32 %v2073_v7  ;;  %v5396_v11 = vsel %vm1896_vm9, %v4778_v39, 128  ;;  %v869_v7 = vsub.f32 %v4944_v5, %v5215_v24  ;;  %v8058_v24 = vld [vmem:[#allocation139_spill] sm:$0xff] }
 0x2b3   :  { %8042 = vst [vmem:[#allocation234_spill] sm:$0xff] %v5396_v11  ;;  %v2298_v45 = vshra.s32 %v5396_v11, 16  ;;  %v8066_v11 = vld [vmem:[#allocation144_spill] sm:$0xff] }
 0x2b4   :  { %v1013_v15 = vmul.f32 1.442695, %v899_v59  ;;  %v903_v23 = vsub.f32 %v8066_v11, %v5294_v42 }
 0x2b5   :  { %1079 = vadd.xlane.f32.xlu2 %v3811_v8  ;;  %1077 = vadd.xlane.f32.xlu1 %v3809_v12  ;;  %v5391_v12 = vcvt.s32.f32 %v2284_v57  ;;  %v2066_v8 = vsel %vm2065_vm10, %v2061_v34, inf  ;;  %v2080_v57 = vsel %vm2079_vm11, %v2075_v27, inf  ;;  %v5415_v27 = vcvt.s32.f32 %v2298_v45 }
 0x2b6   :  { %2273 = vmin.xlane.f32.xlu0 %v5373_v48  ;;  %v900_v48 = vsub.f32 %v4932_v33, %v5199_v13  ;;  %3812 = vpow2.f32 %v1013_v15  ;;  %v870_v15 = vsub.f32 %v4969_v2, %v5240_v55  ;;  %v8057_v55 = vld [vmem:[#allocation151_spill] sm:$0xff]  ;;  %v1021_v11 = vmul.f32 1.442695, %v903_v23 }
 0x2b7   :  { %8041 = vst [vmem:[#allocation233_spill] sm:$0xff] %v5391_v12 }
 0x2b8   :  { %v5381_v25 = vpop.xlane.xlu2 %1061  ;;  %v5383_v36 = vpop.xlane.xlu1 %771  ;;  %v1015_v33 = vmul.f32 1.442695, %v900_v48  ;;  %v8046_v48 = vld [vmem:[#allocation143_spill] sm:$0xff]  ;;  %v955_v45 = vmul.f32 1.442695, %v870_v15 }
 0x2b9   :  { %8039 = vst [vmem:[#allocation231_spill] sm:$0xff] %v5383_v36  ;;  %v5389_v35 = vpop.xlane.xlu0 %835  ;;  %vm1897_vm13 = vcmp.eq.f32.partialorder %v8046_v48, %v5290_v3 }
 0x2ba   :  { %8040 = vst [vmem:[#allocation232_spill] sm:$0xff] %v5389_v35  ;;  %3814 = vpow2.f32 %v1015_v33 }
 0x2bb   :  { %3816 = vpow2.f32 %v1017_v37 }
 0x2bc   :  { %v3813_v5 = vpop.eup %3812 }
 0x2bd   :  { %2287 = vmin.xlane.f32.xlu2 %v5391_v12  ;;  %2067 = vmin.xlane.f32.xlu1 %v2066_v8  ;;  %v8044_v8 = vld [vmem:[#allocation127_spill] sm:$0xff]  ;;  %v902_v12 = vsub.f32 %v8058_v24, %v5271_v9 }
 0x2be   :  { %2081 = vmin.xlane.f32.xlu0 %v2080_v57  ;;  %vm2093_vm12 = vcmp.eq.f32.partialorder %v8044_v8, %v5217_v61  ;;  %8045 = vst [vmem:[#allocation127_spill] sm:$0xff] %v5415_v27  ;;  %v953_v57 = vmul.f32 1.442695, %v869_v7  ;;  %v871_v8 = vsub.f32 %v8046_v48, %v5290_v3  ;;  %v2115_v3 = vand.u32 65535, %v8057_v55  ;;  %v8064_v55 = vld [vmem:[#allocation155_spill] sm:$0xff] }
 0x2bf   :  { %v2094_v52 = vsel %vm2093_vm12, %v2089_v21, inf  ;;  %vm2121_vm1 = vcmp.eq.f32.partialorder %v8064_v55, %v5331_v6  ;;  %v8106_v61 = vld [vmem:[#allocation19_spill] sm:$0xff] }
 0x2c0   :  { %v5407_v59 = vpop.xlane.xlu2 %773  ;;  %v5409_v34 = vpop.xlane.xlu1 %2175  ;;  %3818 = vpow2.f32 %v953_v57  ;;  %v957_v21 = vmul.f32 1.442695, %v871_v8  ;;  %v8052_v8 = vld [vmem:[#allocation149_spill] sm:$0xff]  ;;  %v2117_v9 = vcvt.s32.f32 %v2115_v3 }
 0x2c1   :  { %8043 = vst [vmem:[#allocation235_spill] sm:$0xff] %v5407_v59  ;;  %v5413_v13 = vpop.xlane.xlu0 %1063  ;;  %v3815_v7 = vpop.eup %3814  ;;  %3820 = vpow2.f32 %v955_v45  ;;  %vm1898_vm14 = vcmp.eq.f32.partialorder %v8052_v8, %v5307_v60  ;;  %v872_v3 = vsub.f32 %v8052_v8, %v5307_v60 }
 0x2c2   :  { %3822 = vpow2.f32 %v957_v21 }
 0x2c5   :  { %2095 = vmin.xlane.f32.xlu2 %v2094_v52  ;;  %2301 = vmin.xlane.f32.xlu1 %v5415_v27  ;;  %v3817_v52 = vpop.eup %3816 }
 0x2c6   :  { %1141 = vadd.xlane.f32.xlu0 %v3813_v5  ;;  %v3819_v37 = vpop.eup %3818  ;;  %v5431_v5 = vsel %vm1897_vm13, %v4778_v39, 128 }
 0x2c7   :  { %8049 = vst [vmem:[#allocation238_spill] sm:$0xff] %v5431_v5  ;;  %v3821_v45 = vpop.eup %3820 }
 0x2c8   :  { %v5422_v16 = vpop.xlane.xlu2 %2161  ;;  %v5424_v62 = vpop.xlane.xlu1 %1125 }
 0x2c9   :  { %8047 = vst [vmem:[#allocation236_spill] sm:$0xff] %v5424_v62  ;;  %v5426_v33 = vpop.xlane.xlu0 %775  ;;  %v2312_v62 = vshra.s32 %v5431_v5, 16 }
 0x2ca   :  { %8048 = vst [vmem:[#allocation237_spill] sm:$0xff] %v5426_v33 }
 0x2cb   :  { %v5445_v21 = vcvt.s32.f32 %v2312_v62  ;;  %v8061_v62 = vld [vmem:[#allocation136_spill] sm:$0xff] }
 0x2cc   :  { %vm2107_vm0 = vcmp.eq.f32.partialorder %v8061_v62, %v5256_v50  ;;  %v8067_v62 = vld [vmem:[#allocation145_spill] sm:$0xff]  ;;  %v8089_v50 = vmov 0.0  }
 0x2cd   :  { %1145 = vadd.xlane.f32.xlu2 %v3817_v52  ;;  %1143 = vadd.xlane.f32.xlu1 %v3815_v7  ;;  %v3823_v52 = vpop.eup %3822  ;;  %v5443_v7 = vsel %vm1898_vm14, %v4778_v39, 128  ;;  %8055 = vst [vmem:[#allocation243_spill] sm:$0xff] %v5445_v21 }
 0x2ce   :  { %1081 = vadd.xlane.f32.xlu0 %v3819_v37  ;;  %8054 = vst [vmem:[#allocation242_spill] sm:$0xff] %v5443_v7  ;;  %v8056_v37 = vld [vmem:[#allocation133_spill] sm:$0xff]  ;;  %v2326_v48 = vshra.s32 %v5443_v7, 16  ;;  %v1019_v7 = vmul.f32 1.442695, %v902_v12 }
 0x2d0   :  { %v5433_v57 = vpop.xlane.xlu2 %1127  ;;  %v5435_v15 = vpop.xlane.xlu1 %837  ;;  %3824 = vpow2.f32 %v1019_v7  ;;  %v8072_v7 = vld [vmem:[#allocation166_spill] sm:$0xff] }
 0x2d1   :  { %8050 = vst [vmem:[#allocation239_spill] sm:$0xff] %v5433_v57  ;;  %v5440_v2 = vpop.xlane.xlu0 %2189  ;;  %v2101_v57 = vand.u32 65535, %v8056_v37 }
 0x2d2   :  { %8051 = vst [vmem:[#allocation240_spill] sm:$0xff] %v5435_v15 }
 0x2d3   :  { %8053 = vst [vmem:[#allocation241_spill] sm:$0xff] %v5440_v2  ;;  %v2103_v37 = vcvt.s32.f32 %v2101_v57  ;;  %v2122_v57 = vsel %vm2121_vm1, %v2117_v9, inf  ;;  %v8070_v9 = vld [vmem:[#allocation161_spill] sm:$0xff]  ;;  %vm1693_vm1 = vcmp.eq.s32.totalorder %v4778_v39, %v8105_v18 }
 0x2d4   :  { %3826 = vlog2.f32 %v8070_v9 }
 0x2d5   :  { %1085 = vadd.xlane.f32.xlu2 %v3823_v52  ;;  %1083 = vadd.xlane.f32.xlu1 %v3821_v45  ;;  %v8060_v52 = vld [vmem:[#allocation154_spill] sm:$0xff]  ;;  %v2108_v24 = vsel %vm2107_vm0, %v2103_v37, inf  ;;  %3828 = vlog2.f32 %v8072_v7 }
 0x2d6   :  { %2315 = vmin.xlane.f32.xlu0 %v5445_v21  ;;  %vm1899_vm15 = vcmp.eq.f32.partialorder %v8060_v52, %v5337_v1  ;;  %v5463_v21 = vcvt.s32.f32 %v2326_v48  ;;  %v904_v48 = vsub.f32 %v5075_v43, %v5352_v51  ;;  %v959_v51 = vmul.f32 1.442695, %v872_v3  ;;  %v3825_v23 = vpop.eup %3824  ;;  %v8075_v3 = vld [vmem:[#allocation9_spill] sm:$0xff] }
 0x2d7   :  { %v5468_v5 = vsel %vm1899_vm15, %v4778_v39, 128  ;;  %3830 = vpow2.f32 %v1021_v11  ;;  %v873_v60 = vsub.f32 %v8060_v52, %v5337_v1  ;;  %vm1686_vm4 = vcmp.eq.s32.totalorder %v4778_v39, %v8075_v3  ;;  %v8082_v52 = vld [vmem:[#allocation12_spill] sm:$0xff] }
 0x2d8   :  { %v5453_v27 = vpop.xlane.xlu2 %839  ;;  %v5455_v38 = vpop.xlane.xlu1 %1065  ;;  %8063 = vst [vmem:[#allocation136_spill] sm:$0xff] %v5463_v21  ;;  %v2340_v12 = vshra.s32 %v5468_v5, 16  ;;  %vm1685_vm7 = vcmp.eq.s32.totalorder %v4778_v39, %v8082_v52 }
 0x2d9   :  { %8059 = vst [vmem:[#allocation133_spill] sm:$0xff] %v5453_v27  ;;  %v5461_v45 = vpop.xlane.xlu0 %1129  ;;  %v5544_v29 = vsel %vm1685_vm7, 1.0, %v8089_v50 }
 0x2da   :  { %8062 = vst [vmem:[#allocation151_spill] sm:$0xff] %v5461_v45  ;;  %v2129_v45 = vand.u32 65535, %v8067_v62  ;;  %v1023_v62 = vmul.f32 1.442695, %v904_v48  ;;  %v8073_v48 = vld [vmem:[#allocation168_spill] sm:$0xff] }
 0x2db   :  { %8065 = vst [vmem:[#allocation155_spill] sm:$0xff] %v5468_v5  ;;  %vm1900_vm6 = vcmp.eq.f32.partialorder %v8073_v48, %v5383_v36  ;;  %v8087_v5 = vld [vmem:[#allocation17_spill] sm:$0xff] }
 0x2dc   :  { %v2131_v43 = vcvt.s32.f32 %v2129_v45  ;;  %3832 = vpow2.f32 %v1023_v62  ;;  %v874_v45 = vsub.f32 %v8073_v48, %v5383_v36  ;;  %v961_v62 = vmul.f32 1.442695, %v873_v60  ;;  %v8101_v48 = vld [vmem:[#allocation20_spill] sm:$0xff] }
 0x2dd   :  { %2329 = vmin.xlane.f32.xlu2 %v5463_v21  ;;  %2109 = vmin.xlane.f32.xlu1 %v2108_v24  ;;  %v8068_v24 = vld [vmem:[#allocation150_spill] sm:$0xff]  ;;  %3834 = vlog2.f32 %v5128_v22  ;;  %vm1692_vm12 = vcmp.eq.s32.totalorder %v4778_v39, %v8087_v5  ;;  %vm1695_vm0 = vcmp.eq.s32.totalorder %v4778_v39, %v8101_v48  ;;  %v8103_v5 = vld [vmem:[#allocation103_spill] sm:$0xff] }
 0x2de   :  { %2123 = vmin.xlane.f32.xlu0 %v2122_v57  ;;  %vm2135_vm2 = vcmp.eq.f32.partialorder %v8068_v24, %v5309_v56  ;;  %v5488_v57 = vcvt.s32.f32 %v2340_v12  ;;  %v8074_v12 = vld [vmem:[#allocation8_spill] sm:$0xff]  ;;  %3836 = vpow2.f32 %v959_v51  ;;  %v3827_v24 = vpop.eup %3826  ;;  %v963_v22 = vmul.f32 1.442695, %v874_v45  ;;  %v8084_v45 = vld [vmem:[#allocation14_spill] sm:$0xff] }
 0x2df   :  { %v2136_v8 = vsel %vm2135_vm2, %v2131_v43, inf  ;;  %vm1683_vm3 = vcmp.eq.s32.totalorder %v4778_v39, %v8074_v12  ;;  %v8076_v43 = vld [vmem:[#allocation11_spill] sm:$0xff]  ;;  %v3829_v9 = vpop.eup %3828  ;;  %3838 = vlog2.f32 %v5183_v54  ;;  %v7623_v12 = vmov 0.0   ;;  %v8083_v54 = vld [vmem:[#allocation10_spill] sm:$0xff] }
 0x2e0   :  { %v5479_v37 = vpop.xlane.xlu2 %1067  ;;  %v5481_v55 = vpop.xlane.xlu1 %777  ;;  %8071 = vst [vmem:[#allocation150_spill] sm:$0xff] %v5488_v57  ;;  %vm1687_vm5 = vcmp.eq.s32.totalorder %v4778_v39, %v8076_v43  ;;  %v5511_v3 = vsel %vm1683_vm3, 1.0, %v7623_v12  ;;  %v5514_v43 = vsel %vm1686_vm4, 1.0, %v7623_v12  ;;  %vm1684_vm8 = vcmp.eq.s32.totalorder %v4778_v39, %v8083_v54  ;;  %v8108_v48 = vld [vmem:[#allocation106_spill] sm:$0xff] }
 0x2e1   :  { %v5485_v42 = vpop.xlane.xlu0 %841  ;;  %8079 = vst [vmem:[#allocation8_spill] sm:$0xff] %v5511_v3  ;;  %v5517_v51 = vsel %vm1687_vm5, 1.0, %v7623_v12  ;;  %vm1689_vm9 = vcmp.eq.s32.totalorder %v4778_v39, %v8084_v45  ;;  %3840 = vlog2.f32 %v5193_v63  ;;  %v8086_v12 = vld [vmem:[#allocation13_spill] sm:$0xff]  ;;  %v1170_v21 = vmul.f32 0.6931472, %v3827_v24 }
 0x2e2   :  { %8069 = vst [vmem:[#allocation145_spill] sm:$0xff] %v5485_v42  ;;  %vm1691_vm11 = vcmp.eq.s32.totalorder %v4778_v39, %v8086_v12  ;;  %3842 = vpow2.f32 %v961_v62  ;;  %v1172_v6 = vmul.f32 0.6931472, %v3829_v9  ;;  %v5538_v63 = vsel %vm1900_vm6, %v4778_v39, 128  ;;  %v8093_v9 = vld [vmem:[#allocation18_spill] sm:$0xff]  ;;  %v8099_v12 = vld [vmem:[#allocation172_spill] sm:$0xff] }
 0x2e3   :  { %8080 = vst [vmem:[#allocation9_spill] sm:$0xff] %v5514_v43  ;;  %3844 = vpow2.f32 %v963_v22  ;;  %v5550_v62 = vsel %vm1684_vm8, 1.0, %v8089_v50  ;;  %v5556_v24 = vsel %vm1689_vm9, 1.0, %v8089_v50  ;;  %vm1690_vm13 = vcmp.eq.s32.totalorder %v4778_v39, %v8093_v9 }
 0x2e4   :  { %8081 = vst [vmem:[#allocation11_spill] sm:$0xff] %v5517_v51  ;;  %3846 = vlog2.f32 %v5221_v58  ;;  %vm1901_vm15 = vcmp.eq.f32.partialorder %v8099_v12, %v5407_v59  ;;  %v5589_v58 = vsel %vm1690_vm13, 1.0, %v8089_v50  ;;  %v1298_v49 = vadd.f32 %v1172_v6, %v8103_v5 }
 0x2e5   :  { %2137 = vmin.xlane.f32.xlu2 %v2136_v8  ;;  %2343 = vmin.xlane.f32.xlu1 %v5488_v57  ;;  %v8085_v57 = vld [vmem:[#allocation15_spill] sm:$0xff]  ;;  %8088 = vst [vmem:[#allocation12_spill] sm:$0xff] %v5538_v63  ;;  %vm1697_vm2 = vcmp.eq.s32.totalorder %v4778_v39, %v8106_v61  ;;  %3848 = vlog2.f32 %v5273_v20  ;;  %v5608_v6 = vsel %vm1901_vm15, %v4778_v39, 128  ;;  %v5618_v20 = vsel %vm1695_vm0, 1.0, %v8089_v50 }
 0x2e6   :  { %1147 = vadd.xlane.f32.xlu0 %v3825_v23  ;;  %v3831_v23 = vpop.eup %3830  ;;  %vm1688_vm10 = vcmp.eq.s32.totalorder %v4778_v39, %v8085_v57  ;;  %8090 = vst [vmem:[#allocation10_spill] sm:$0xff] %v5544_v29  ;;  %v8098_v57 = vld [vmem:[#allocation16_spill] sm:$0xff]  ;;  %3850 = vlog2.f32 %v5288_v40  ;;  %v5627_v5 = vsel %vm1693_vm1, 1.0, %v8089_v50  ;;  %v5636_v40 = vsel %vm1697_vm2, 1.0, %v8089_v50 }
 0x2e7   :  { %v3833_v60 = vpop.eup %3832  ;;  %8091 = vst [vmem:[#allocation14_spill] sm:$0xff] %v5550_v62  ;;  %v5564_v52 = vsel %vm1688_vm10, 1.0, %v8089_v50  ;;  %vm1694_vm14 = vcmp.eq.s32.totalorder %v4778_v39, %v8098_v57  ;;  %v2368_v18 = vshra.s32 %v5608_v6, 16  ;;  %3852 = vlog2.f32 %v5315_v14  ;;  %v8129_v14 = vld [vmem:[#allocation177_spill] sm:$0xff] }
 0x2e8   :  { %v5503_v11 = vpop.xlane.xlu2 %779  ;;  %v5505_v8 = vpop.xlane.xlu1 %2217  ;;  %8092 = vst [vmem:[#allocation15_spill] sm:$0xff] %v5556_v24  ;;  %vm2163_vm5 = vcmp.eq.f32.partialorder %v8129_v14, %v5422_v16 }
 0x2e9   :  { %8077 = vst [vmem:[#allocation161_spill] sm:$0xff] %v5503_v11  ;;  %v5508_v7 = vpop.xlane.xlu0 %1069  ;;  %v3835_v1 = vpop.eup %3834  ;;  %v5658_v11 = vcvt.s32.f32 %v2368_v18 }
 0x2ea   :  { %8078 = vst [vmem:[#allocation166_spill] sm:$0xff] %v5505_v8  ;;  %v3837_v56 = vpop.eup %3836 }
 0x2eb   :  { %v3839_v22 = vpop.eup %3838  ;;  %8094 = vst [vmem:[#allocation13_spill] sm:$0xff] %v5564_v52 }
 0x2ec   :  { %v3841_v9 = vpop.eup %3840  ;;  %8100 = vst [vmem:[#allocation16_spill] sm:$0xff] %v5589_v58 }
 0x2ed   :  { %1151 = vadd.xlane.f32.xlu2 %v3833_v60  ;;  %1149 = vadd.xlane.f32.xlu1 %v3831_v23  ;;  %v5570_v23 = vsel %vm1691_vm11, 1.0, %v8089_v50  ;;  %v1174_v60 = vmul.f32 0.6931472, %v3835_v1  ;;  %v2354_v1 = vshra.s32 %v5538_v63, 16  ;;  %v3843_v10 = vpop.eup %3842  ;;  %v1176_v63 = vmul.f32 0.6931472, %v3839_v22 }
 0x2ee   :  { %1087 = vadd.xlane.f32.xlu0 %v3837_v56  ;;  %8095 = vst [vmem:[#allocation17_spill] sm:$0xff] %v5570_v23  ;;  %v5581_v56 = vsel %vm1692_vm12, 1.0, %v8089_v50  ;;  %v3845_v0 = vpop.eup %3844  ;;  %v5615_v22 = vsel %vm1694_vm14, 1.0, %v8089_v50 }
 0x2ef   :  { %8097 = vst [vmem:[#allocation244_spill] sm:$0xff] %v5581_v56  ;;  %v1299_v56 = vadd.f32 %v1174_v60, %v8108_v48  ;;  %v5621_v47 = vcvt.s32.f32 %v2354_v1  ;;  %v3847_v60 = vpop.eup %3846  ;;  %v8115_v48 = vld [vmem:[#allocation35_spill] sm:$0xff]  ;;  %v1178_v1 = vmul.f32 0.6931472, %v3841_v9  ;;  %v8125_v9 = vld [vmem:[#allocation160_spill] sm:$0xff] }
 0x2f0   :  { %v5573_v54 = vpop.xlane.xlu2 %2203  ;;  %v5575_v45 = vpop.xlane.xlu1 %1131  ;;  %8111 = vst [vmem:[#allocation103_spill] sm:$0xff] %v5615_v22  ;;  %vm2149_vm4 = vcmp.eq.f32.partialorder %v8125_v9, %v5354_v28 }
 0x2f1   :  { %8096 = vst [vmem:[#allocation18_spill] sm:$0xff] %v5575_v45  ;;  %v8102_v45 = vld [vmem:[#allocation99_spill] sm:$0xff]  ;;  %v5595_v17 = vpop.xlane.xlu0 %781  ;;  %v3849_v8 = vpop.eup %3848  ;;  %vm2205_vm9 = vcmp.eq.f32.partialorder %v5245_v31, %v5573_v54 }
 0x2f2   :  { %v1297_v36 = vadd.f32 %v1170_v21, %v8102_v45  ;;  %8104 = vst [vmem:[#allocation20_spill] sm:$0xff] %v5595_v17  ;;  %v8110_v21 = vld [vmem:[#allocation174_spill] sm:$0xff]  ;;  %v2171_v17 = vand.u32 65535, %v8117_v26 }
 0x2f3   :  { %8109 = vst [vmem:[#allocation99_spill] sm:$0xff] %v5608_v6  ;;  %v2157_v45 = vand.u32 65535, %v8110_v21  ;;  %v8116_v21 = vld [vmem:[#allocation38_spill] sm:$0xff]  ;;  %v3851_v6 = vpop.eup %3850 }
 0x2f4   :  { %8112 = vst [vmem:[#allocation21_spill] sm:$0xff] %v5618_v20  ;;  %v1361_v57 = vsub.f32 %v8115_v48, %v1297_v36  ;;  %v1362_v22 = vsub.f32 %v8116_v21, %v1298_v49  ;;  %v8120_v20 = vld [vmem:[#allocation43_spill] sm:$0xff]  ;;  %v8121_v36 = vld [vmem:[#allocation164_spill] sm:$0xff]  ;;  %v2145_v21 = vcvt.s32.f32 %v2143_v19 }
 0x2f5   :  { %1091 = vadd.xlane.f32.xlu2 %v3845_v0  ;;  %1089 = vadd.xlane.f32.xlu1 %v3843_v10  ;;  %8113 = vst [vmem:[#allocation19_spill] sm:$0xff] %v5621_v47  ;;  %v8119_v10 = vld [vmem:[#allocation108_spill] sm:$0xff]  ;;  %v905_v49 = vsub.f32 %v8121_v36, %v5361_v30  ;;  %v2159_v61 = vcvt.s32.f32 %v2157_v45  ;;  %v2173_v36 = vcvt.s32.f32 %v2171_v17  ;;  %v8126_v30 = vld [vmem:[#allocation179_spill] sm:$0xff] }
 0x2f6   :  { %8114 = vst [vmem:[#allocation156_spill] sm:$0xff] %v5627_v5  ;;  %v1300_v0 = vadd.f32 %v1176_v63, %v8119_v10  ;;  %2357 = vmin.xlane.f32.xlu0 %v5621_v47  ;;  %v1363_v5 = vsub.f32 %v8120_v20, %v1299_v56  ;;  %v8124_v63 = vld [vmem:[#allocation178_spill] sm:$0xff]  ;;  %v3155_v56 = vsub.f32 0.0, %v1361_v57  ;;  %v3156_v20 = vsub.f32 0.0, %v1362_v22  ;;  %v8127_v19 = vld [vmem:[#allocation48_spill] sm:$0xff] }
 0x2f7   :  { %8118 = vst [vmem:[#allocation106_spill] sm:$0xff] %v5636_v40  ;;  %v1180_v40 = vmul.f32 0.6931472, %v3847_v60  ;;  %vm1902_vm3 = vcmp.eq.f32.partialorder %v8124_v63, %v5426_v33  ;;  %v8128_v47 = vld [vmem:[#allocation112_spill] sm:$0xff]  ;;  %v1025_v2 = vmul.f32 1.442695, %v905_v49 }
 0x2f8   :  { %v5644_v48 = vpop.xlane.xlu2 %1133  ;;  %v5646_v26 = vpop.xlane.xlu1 %843  ;;  %v1364_v45 = vsub.f32 %v8127_v19, %v1300_v0  ;;  %v1301_v60 = vadd.f32 %v1178_v1, %v8128_v47  ;;  %v2150_v9 = vsel %vm2149_vm4, %v2145_v21, inf  ;;  %v5663_v22 = vsel %vm1902_vm3, %v4778_v39, 128  ;;  %v8130_v17 = vld [vmem:[#allocation120_spill] sm:$0xff] }
 0x2f9   :  { %8122 = vst [vmem:[#allocation174_spill] sm:$0xff] %v5644_v48  ;;  %v5653_v10 = vpop.xlane.xlu0 %2011  ;;  %v3157_v57 = vsub.f32 0.0, %v1363_v5  ;;  %v1302_v28 = vadd.f32 %v1180_v40, %v8130_v17  ;;  %v8131_v48 = vld [vmem:[#allocation170_spill] sm:$0xff]  ;;  %v2199_v47 = vand.u32 65535, %v5229_v32  ;;  %v2014_v0 = vcvt.f32.s32 %v5049_v41  ;;  %v3853_v21 = vpop.eup %3852  ;;  %v8133_v19 = vld [vmem:[#allocation52_spill] sm:$0xff] }
 0x2fa   :  { %8123 = vst [vmem:[#allocation35_spill] sm:$0xff] %v5646_v26  ;;  %v1182_v26 = vmul.f32 0.6931472, %v3849_v8  ;;  %v906_v50 = vsub.f32 %v8131_v48, %v5389_v35  ;;  %v1184_v1 = vmul.f32 0.6931472, %v3851_v6  ;;  %v8132_v8 = vld [vmem:[#allocation183_spill] sm:$0xff]  ;;  %v3219_v5 = vmul.f32 %v5511_v3, %v3155_v56 }
 0x2fb   :  { %v907_v18 = vsub.f32 %v8132_v8, %v5435_v15  ;;  %v2164_v49 = vsel %vm2163_vm5, %v2159_v61, inf  ;;  %v3220_v40 = vmul.f32 %v5550_v62, %v3156_v20  ;;  %v1365_v14 = vsub.f32 %v8133_v19, %v1301_v60  ;;  %v8134_v48 = vld [vmem:[#allocation121_spill] sm:$0xff]  ;;  %v8136_v8 = vld [vmem:[#allocation59_spill] sm:$0xff] }
 0x2fc   :  { %v2382_v17 = vshra.s32 %v5663_v22, 16  ;;  %v1303_v32 = vadd.f32 %v1182_v26, %v8134_v48  ;;  %3854 = vpow2.f32 %v1025_v2  ;;  %v875_v41 = vsub.f32 %v8099_v12, %v5407_v59  ;;  %v8137_v60 = vld [vmem:[#allocation173_spill] sm:$0xff] }
 0x2fd   :  { %2371 = vmin.xlane.f32.xlu2 %v5658_v11  ;;  %2151 = vmin.xlane.f32.xlu1 %v2150_v9  ;;  %v3158_v9 = vsub.f32 0.0, %v1364_v45  ;;  %v3221_v56 = vmul.f32 %v5544_v29, %v3157_v57  ;;  %v1366_v20 = vsub.f32 %v8136_v8, %v1302_v28  ;;  %v1027_v15 = vmul.f32 1.442695, %v906_v50  ;;  %v8139_v50 = vld [vmem:[#allocation62_spill] sm:$0xff] }
 0x2fe   :  { %2165 = vmin.xlane.f32.xlu0 %v2164_v49  ;;  %vm2177_vm6 = vcmp.eq.f32.partialorder %v8137_v60, %v5409_v34  ;;  %v8138_v49 = vld [vmem:[#allocation128_spill] sm:$0xff]  ;;  %v1186_v19 = vmul.f32 0.6931472, %v3853_v21  ;;  %3856 = vlog2.f32 %v5363_v4  ;;  %v1029_v2 = vmul.f32 1.442695, %v907_v18  ;;  %v8140_v21 = vld [vmem:[#allocation66_spill] sm:$0xff] }
 0x2ff   :  { %v1304_v45 = vadd.f32 %v1184_v1, %v8138_v49  ;;  %v3283_v26 = vadd.f32 %v3220_v40, %v3219_v5  ;;  %v3159_v35 = vsub.f32 0.0, %v1365_v14  ;;  %3858 = vlog2.f32 %v5381_v25  ;;  %v8141_v5 = vld [vmem:[#allocation129_spill] sm:$0xff]  ;;  %v8142_v14 = vld [vmem:[#allocation190_spill] sm:$0xff] }
 0x300   :  { %v5680_v6 = vpop.xlane.xlu2 %845  ;;  %v5682_v61 = vpop.xlane.xlu1 %1071  ;;  %v5693_v12 = vcvt.s32.f32 %v2382_v17  ;;  %v3222_v28 = vmul.f32 %v5514_v43, %v3158_v9  ;;  %v1367_v57 = vsub.f32 %v8139_v50, %v1303_v32  ;;  %v965_v8 = vmul.f32 1.442695, %v875_v41  ;;  %v8144_v50 = vld [vmem:[#allocation71_spill] sm:$0xff] }
 0x301   :  { %8135 = vst [vmem:[#allocation38_spill] sm:$0xff] %v5680_v6  ;;  %v5690_v48 = vpop.xlane.xlu0 %2231  ;;  %v2178_v60 = vsel %vm2177_vm6, %v2173_v36, inf  ;;  %v3284_v59 = vadd.f32 %v3283_v26, %v3221_v56  ;;  %v3160_v1 = vsub.f32 0.0, %v1366_v20  ;;  %3860 = vpow2.f32 %v1027_v15 }
 0x302   :  { %v876_v4 = vsub.f32 %v8124_v63, %v5426_v33  ;;  %v3855_v18 = vpop.eup %3854  ;;  %v1368_v25 = vsub.f32 %v8140_v21, %v1304_v45  ;;  %v1305_v40 = vadd.f32 %v1186_v19, %v8141_v5  ;;  %3862 = vpow2.f32 %v1029_v2  ;;  %v8145_v21 = vld [vmem:[#allocation192_spill] sm:$0xff] }
 0x303   :  { %v877_v17 = vsub.f32 %v8142_v14, %v5481_v55  ;;  %v3223_v36 = vmul.f32 %v5517_v51, %v3159_v35  ;;  %3864 = vlog2.f32 %v5413_v13  ;;  %v5706_v15 = vcvt.s32.f32 %v2199_v47 }
 0x304   :  { %v8143_v9 = vand.u32 65535, %v8126_v30  ;;  %v3857_v41 = vpop.eup %3856  ;;  %v2042_v56 = vcvt.f32.s32 %v5143_v44  ;;  %v3285_v20 = vadd.f32 %v3284_v59, %v3222_v28  ;;  %v3161_v49 = vsub.f32 0.0, %v1367_v57 }
 0x305   :  { %2179 = vmin.xlane.f32.xlu2 %v2178_v60  ;;  %2385 = vmin.xlane.f32.xlu1 %v5693_v12  ;;  %3866 = vpow2.f32 %v965_v8  ;;  %v3859_v35 = vpop.eup %3858  ;;  %v3224_v13 = vmul.f32 %v5564_v52, %v3160_v1  ;;  %v967_v2 = vmul.f32 1.442695, %v876_v4  ;;  %v2013_v30 = vcvt.f32.s32 %v5653_v10 }
 0x306   :  { %1153 = vadd.xlane.f32.xlu0 %v3855_v18  ;;  %v5710_v32 = vcvt.s32.f32 %v8143_v9  ;;  %3868 = vlog2.f32 %v5455_v38  ;;  %v2015_v47 = vshll.u32 %v2014_v0, 16  ;;  %v3162_v26 = vsub.f32 0.0, %v1368_v25 }
 0x307   :  { %v1369_v60 = vsub.f32 %v8144_v50, %v1305_v40  ;;  %v969_v44 = vmul.f32 1.442695, %v877_v17  ;;  %v3861_v28 = vpop.eup %3860  ;;  %v2028_v57 = vcvt.f32.s32 %v5069_v46  ;;  %v3286_v8 = vadd.f32 %v3285_v20, %v3223_v36  ;;  %v8146_v20 = vld [vmem:[#allocation187_spill] sm:$0xff] }
 0x308   :  { %v5713_v45 = vpop.xlane.xlu2 %1073  ;;  %v5715_v19 = vpop.xlane.xlu1 %783  ;;  %v2213_v5 = vand.u32 65535, %v8145_v21  ;;  %v2056_v1 = vcvt.f32.s32 %v5122_v53  ;;  %v3225_v38 = vmul.f32 %v5556_v24, %v3161_v49  ;;  %v1188_v4 = vmul.f32 0.6931472, %v3857_v41 }
 0x309   :  { %v2040_v59 = vpop.xlane.xlu0 %2039  ;;  %v3863_v9 = vpop.eup %3862  ;;  %v1190_v10 = vmul.f32 0.6931472, %v3859_v35  ;;  %v2043_v25 = vshll.u32 %v2042_v56, 16  ;;  %v3287_v63 = vadd.f32 %v3286_v8, %v3224_v13  ;;  %3870 = vpow2.f32 %v967_v2  ;;  %v8147_v35 = vld [vmem:[#allocation137_spill] sm:$0xff]  ;;  %v8148_v2 = vld [vmem:[#allocation138_spill] sm:$0xff] }
 0x30a   :  { %v2041_v18 = vcvt.f32.s32 %v2040_v59  ;;  %v3865_v0 = vpop.eup %3864  ;;  %v2016_v40 = vadd.s32 %v2015_v47, %v2013_v30  ;;  %v3226_v46 = vmul.f32 %v5589_v58, %v3162_v26  ;;  %v3163_v36 = vsub.f32 0.0, %v1369_v60 }
 0x30b   :  { %v3867_v17 = vpop.eup %3866  ;;  %v908_v50 = vsub.f32 %v8146_v20, %v5453_v27  ;;  %3872 = vpow2.f32 %v969_v44  ;;  %v2029_v59 = vshll.u32 %v2028_v57, 16  ;;  %v5729_v56 = vcvt.s32.f32 %v2213_v5  ;;  %v8167_v20 = vld [vmem:[#allocation88_spill] sm:$0xff] }
 0x30c   :  { %v3869_v53 = vpop.eup %3868  ;;  %3874 = vlog2.f32 %v5479_v37  ;;  %v2044_v41 = vadd.s32 %v2043_v25, %v2041_v18  ;;  %v3288_v49 = vadd.f32 %v3287_v63, %v3225_v38  ;;  %v1306_v13 = vadd.f32 %v1188_v4, %v8147_v35  ;;  %v8152_v4 = vld [vmem:[#allocation80_spill] sm:$0xff]  ;;  %v8158_v35 = vld [vmem:[#allocation35_spill] sm:$0xff] }
 0x30d   :  { %1157 = vadd.xlane.f32.xlu2 %v3863_v9  ;;  %1155 = vadd.xlane.f32.xlu1 %v3861_v28  ;;  %v1307_v30 = vadd.f32 %v1190_v10, %v8148_v2  ;;  %3876 = vlog2.f32 %v5508_v7  ;;  %v2057_v60 = vshll.u32 %v2056_v1, 16  ;;  %v1192_v44 = vmul.f32 0.6931472, %v3865_v0  ;;  %v8150_v9 = vld [vmem:[#allocation23_spill] sm:$0xff] }
 0x30e   :  { %1093 = vadd.xlane.f32.xlu0 %v3867_v17  ;;  %vm2899_vm7 = vcmp.eq.s32.totalorder %v4778_v39, %v2016_v40  ;;  %v5737_v37 = vadd.f32 %v3288_v49, %v3226_v46  ;;  %v5740_v57 = vmul.f32 %v5570_v23, %v3163_v36  ;;  %v1031_v63 = vmul.f32 1.442695, %v908_v50  ;;  %v8151_v1 = vld [vmem:[#allocation75_spill] sm:$0xff]  ;;  %v8155_v36 = vld [vmem:[#allocation140_spill] sm:$0xff] }
 0x30f   :  { %v1194_v8 = vmul.f32 0.6931472, %v3869_v53  ;;  %v3871_v21 = vpop.eup %3870  ;;  %3878 = vlog2.f32 %v5682_v61  ;;  %vm2901_vm8 = vcmp.eq.s32.totalorder %v4778_v39, %v2044_v41  ;;  %vm1698_vm10 = vcmp.eq.s32.totalorder %v4778_v39, %v8150_v9  ;;  %v8153_v0 = vld [vmem:[#allocation191_spill] sm:$0xff]  ;;  %v8156_v53 = vld [vmem:[#allocation241_spill] sm:$0xff]  ;;  %v8179_v9 = vld [vmem:[#allocation156_spill] sm:$0xff] }
 0x310   :  { %v5734_v47 = vpop.xlane.xlu2 %2245  ;;  %v2026_v26 = vpop.xlane.xlu1 %2025  ;;  %v1370_v38 = vsub.f32 %v8151_v1, %v1306_v13  ;;  %v1371_v10 = vsub.f32 %v8152_v4, %v1307_v30  ;;  %v909_v25 = vsub.f32 %v8153_v0, %v5485_v42  ;;  %v8154_v17 = vmov 0.0   ;;  %v8159_v13 = vld [vmem:[#allocation204_spill] sm:$0xff]  ;;  %v8161_v1 = vld [vmem:[#allocation161_spill] sm:$0xff]  ;;  %v8162_v41 = vld [vmem:[#allocation195_spill] sm:$0xff] }
 0x311   :  { %v2027_v28 = vcvt.f32.s32 %v2026_v26  ;;  %v5742_v18 = vpop.xlane.xlu0 %1135  ;;  %v3873_v5 = vpop.eup %3872  ;;  %v3629_v61 = vsel %vm2899_vm7, 1.0, %v8154_v17  ;;  %v1308_v50 = vadd.f32 %v1192_v44, %v8155_v36  ;;  %3880 = vlog2.f32 %v5713_v45  ;;  %v8160_v26 = vld [vmem:[#allocation147_spill] sm:$0xff]  ;;  %v8163_v0 = vld [vmem:[#allocation166_spill] sm:$0xff] }
 0x312   :  { %8149 = vst [vmem:[#allocation169_spill] sm:$0xff] %v5742_v18  ;;  %v3875_v46 = vpop.eup %3874  ;;  %v910_v2 = vsub.f32 %v8159_v13, %v8158_v35  ;;  %v3631_v40 = vsel %vm2901_vm8, 1.0, %v8154_v17  ;;  %v2206_v45 = vsel %vm2205_vm9, %v5706_v15, inf  ;;  %3882 = vpow2.f32 %v1031_v63  ;;  %v8164_v35 = vld [vmem:[#allocation196_spill] sm:$0xff] }
 0x313   :  { %v2030_v7 = vadd.s32 %v2029_v59, %v2027_v28  ;;  %v8157_v59 = vld [vmem:[#allocation184_spill] sm:$0xff]  ;;  %v3877_v49 = vpop.eup %3876  ;;  %v1309_v44 = vadd.f32 %v1194_v8, %v8160_v26  ;;  %v3091_v28 = vmul.f32 %v3629_v61, %v5511_v3  ;;  %v878_v4 = vsub.f32 %v8162_v41, %v8161_v1 }
 0x314   :  { %vm2191_vm12 = vcmp.eq.f32.partialorder %v8157_v59, %v8156_v53  ;;  %vm2219_vm13 = vcmp.eq.f32.partialorder %v8164_v35, %v8163_v0  ;;  %v1198_v15 = vmul.f32 0.6931472, %v3877_v49  ;;  %v3093_v63 = vmul.f32 %v3631_v40, %v5544_v29  ;;  %v8168_v40 = vld [vmem:[#allocation148_spill] sm:$0xff]  ;;  %v8205_v53 = vld [vmem:[#allocation113_spill] sm:$0xff] }
 0x315   :  { %vm2900_vm11 = vcmp.eq.s32.totalorder %v4778_v39, %v2030_v7  ;;  %1097 = vadd.xlane.f32.xlu2 %v3873_v5  ;;  %1095 = vadd.xlane.f32.xlu1 %v3871_v21  ;;  %v1196_v7 = vmul.f32 0.6931472, %v3875_v46  ;;  %v1033_v5 = vmul.f32 1.442695, %v909_v25  ;;  %v3879_v31 = vpop.eup %3878  ;;  %v3164_v26 = vsub.f32 0.0, %v1370_v38  ;;  %v8172_v59 = vld [vmem:[#allocation212_spill] sm:$0xff] }
 0x316   :  { %v3630_v30 = vsel %vm2900_vm11, 1.0, %v8154_v17  ;;  %2207 = vmin.xlane.f32.xlu0 %v2206_v45  ;;  %v8165_v45 = vld [vmem:[#allocation84_spill] sm:$0xff]  ;;  %v1035_v25 = vmul.f32 1.442695, %v910_v2  ;;  %v1373_v42 = vsub.f32 %v8167_v20, %v1309_v44  ;;  %v2192_v49 = vsel %vm2191_vm12, %v5710_v32, inf }
 0x317   :  { %v3092_v21 = vmul.f32 %v3630_v30, %v5550_v62  ;;  %v3165_v30 = vsub.f32 0.0, %v1371_v10  ;;  %v1372_v46 = vsub.f32 %v8165_v45, %v1308_v50  ;;  %v3881_v3 = vpop.eup %3880  ;;  %v1200_v38 = vmul.f32 0.6931472, %v3879_v31  ;;  %v8169_v2 = vld [vmem:[#allocation152_spill] sm:$0xff] }
 0x318   :  { %v2054_v36 = vpop.xlane.xlu2 %2053  ;;  %v5777_v13 = vpop.xlane.xlu1 %2259  ;;  %v2220_v10 = vsel %vm2219_vm13, %v5729_v56, inf  ;;  %3884 = vpow2.f32 %v1033_v5  ;;  %v1311_v20 = vadd.f32 %v1198_v15, %v8169_v2  ;;  %v8171_v44 = vld [vmem:[#allocation200_spill] sm:$0xff]  ;;  %v1202_v32 = vmul.f32 0.6931472, %v3881_v3  ;;  %v8175_v15 = vld [vmem:[#allocation93_spill] sm:$0xff] }
 0x319   :  { %v3352_v8 = vadd.f32 %v3092_v21, %v3091_v28  ;;  %v2055_v61 = vcvt.f32.s32 %v2054_v36  ;;  %v5783_v62 = vpop.xlane.xlu0 %847  ;;  %v1310_v28 = vadd.f32 %v1196_v7, %v8168_v40  ;;  %v971_v21 = vmul.f32 1.442695, %v878_v4  ;;  %v3883_v50 = vpop.eup %3882  ;;  %v8174_v35 = vld [vmem:[#allocation244_spill] sm:$0xff] }
 0x31a   :  { %8166 = vst [vmem:[#allocation108_spill] sm:$0xff] %v5783_v62  ;;  %3886 = vpow2.f32 %v1035_v25  ;;  %v880_v7 = vsub.f32 %v8172_v59, %v5715_v19  ;;  %v5806_v56 = vsel %vm1698_vm10, 1.0, %v8154_v17  ;;  %v3228_v5 = vmul.f32 %v8174_v35, %v3164_v26 }
 0x31b   :  { %v2058_v27 = vadd.s32 %v2057_v60, %v2055_v61  ;;  %v3353_v18 = vadd.f32 %v3352_v8, %v3093_v63  ;;  %v8170_v60 = vld [vmem:[#allocation20_spill] sm:$0xff]  ;;  %8173 = vst [vmem:[#allocation43_spill] sm:$0xff] %v5806_v56  ;;  %v3166_v31 = vsub.f32 0.0, %v1372_v46  ;;  %v3290_v3 = vadd.f32 %v5737_v37, %v5740_v57  ;;  %v8176_v8 = vld [vmem:[#allocation158_spill] sm:$0xff]  ;;  %v8182_v57 = vld [vmem:[#allocation165_spill] sm:$0xff] }
 0x31c   :  { %v879_v36 = vsub.f32 %v8171_v44, %v8170_v60  ;;  %v1374_v63 = vsub.f32 %v8175_v15, %v1310_v28  ;;  %3888 = vpow2.f32 %v971_v21  ;;  %v1312_v61 = vadd.f32 %v1200_v38, %v8176_v8  ;;  %v8184_v8 = vld [vmem:[#allocation103_spill] sm:$0xff] }
 0x31d   :  { %vm2902_vm14 = vcmp.eq.s32.totalorder %v4778_v39, %v2058_v27  ;;  %2221 = vmin.xlane.f32.xlu2 %v2220_v10  ;;  %2193 = vmin.xlane.f32.xlu1 %v2192_v49  ;;  %v3229_v49 = vmul.f32 %v8179_v9, %v3165_v30  ;;  %v3167_v40 = vsub.f32 0.0, %v1373_v42  ;;  %v8180_v10 = vld [vmem:[#allocation24_spill] sm:$0xff]  ;;  %v1313_v28 = vadd.f32 %v1202_v32, %v8182_v57 }
 0x31e   :  { %v3632_v4 = vsel %vm2902_vm14, 1.0, %v8154_v17  ;;  %1159 = vadd.xlane.f32.xlu0 %v3883_v50  ;;  %v973_v26 = vmul.f32 1.442695, %v879_v36  ;;  %vm1696_vm15 = vcmp.eq.s32.totalorder %v4778_v39, %v8180_v10  ;;  %v8181_v50 = vld [vmem:[#allocation97_spill] sm:$0xff]  ;;  %v975_v21 = vmul.f32 1.442695, %v880_v7  ;;  %v3885_v38 = vpop.eup %3884 }
 0x31f   :  { %v3094_v27 = vmul.f32 %v3632_v4, %v5514_v43  ;;  %v1375_v37 = vsub.f32 %v8181_v50, %v1311_v20  ;;  %v8183_v4 = vld [vmem:[#allocation22_spill] sm:$0xff]  ;;  %v3291_v15 = vadd.f32 %v3290_v3, %v3228_v5  ;;  %v3230_v30 = vmul.f32 %v8184_v8, %v3166_v31  ;;  %v8186_v36 = vld [vmem:[#allocation27_spill] sm:$0xff]  ;;  %v8189_v50 = vld [vmem:[#allocation21_spill] sm:$0xff] }
 0x320   :  { %v5814_v45 = vpop.xlane.xlu2 %1139  ;;  %v5816_v25 = vpop.xlane.xlu1 %1137  ;;  %vm1700_vm0 = vcmp.eq.s32.totalorder %v4778_v39, %v8183_v4  ;;  %vm1699_vm2 = vcmp.eq.s32.totalorder %v4778_v39, %v8186_v36  ;;  %v3168_v20 = vsub.f32 0.0, %v1374_v63  ;;  %v5834_v7 = vsel %vm1696_vm15, 1.0, %v8154_v17  ;;  %v8191_v63 = vld [vmem:[#allocation109_spill] sm:$0xff]  ;;  %v8195_v4 = vld [vmem:[#allocation208_spill] sm:$0xff] }
 0x321   :  { %8177 = vst [vmem:[#allocation160_spill] sm:$0xff] %v5814_v45  ;;  %v5819_v46 = vadd.f32 %v3353_v18, %v3094_v27  ;;  %v1076_v2 = vpop.xlane.xlu0 %1075  ;;  %v3887_v42 = vpop.eup %3886  ;;  %v8185_v18 = vld [vmem:[#allocation26_spill] sm:$0xff]  ;;  %v3292_v10 = vadd.f32 %v3291_v15, %v3229_v49  ;;  %v3231_v57 = vmul.f32 %v8189_v50, %v3167_v40  ;;  %v5841_v31 = vsel %vm1700_vm0, 1.0, %v8154_v17  ;;  %v8198_v45 = vld [vmem:[#allocation217_spill] sm:$0xff] }
 0x322   :  { %8178 = vst [vmem:[#allocation179_spill] sm:$0xff] %v5816_v25  ;;  %3890 = vlog2.f32 %v1076_v2  ;;  %vm1701_vm1 = vcmp.eq.s32.totalorder %v4778_v39, %v8185_v18  ;;  %v8187_v27 = vld [vmem:[#allocation102_spill] sm:$0xff]  ;;  %v3889_v5 = vpop.eup %3888  ;;  %v3169_v3 = vsub.f32 0.0, %v1375_v37  ;;  %v1377_v2 = vsub.f32 %v8191_v63, %v1313_v28  ;;  %v8196_v28 = vld [vmem:[#allocation205_spill] sm:$0xff] }
 0x323   :  { %v1376_v32 = vsub.f32 %v8187_v27, %v1312_v61  ;;  %8188 = vst [vmem:[#allocation48_spill] sm:$0xff] %v5834_v7  ;;  %3892 = vpow2.f32 %v973_v26  ;;  %v5845_v61 = vsel %vm1701_vm1, 1.0, %v8154_v17  ;;  %v5848_v49 = vsel %vm1699_vm2, 1.0, %v8154_v17  ;;  %v8194_v26 = vld [vmem:[#allocation213_spill] sm:$0xff]  ;;  %v8197_v63 = vld [vmem:[#allocation182_spill] sm:$0xff] }
 0x324   :  { %8190 = vst [vmem:[#allocation112_spill] sm:$0xff] %v5841_v31  ;;  %3894 = vpow2.f32 %v975_v21  ;;  %v3293_v40 = vadd.f32 %v3292_v10, %v3230_v30  ;;  %v3232_v15 = vmul.f32 %v5834_v7, %v3168_v20  ;;  %v2227_v21 = vand.u32 65535, %v8196_v28  ;;  %v8199_v10 = vld [vmem:[#allocation106_spill] sm:$0xff]  ;;  %v8203_v7 = vld [vmem:[#allocation216_spill] sm:$0xff] }
 0x325   :  { %1163 = vadd.xlane.f32.xlu2 %v3887_v42  ;;  %1161 = vadd.xlane.f32.xlu1 %v3885_v38  ;;  %8192 = vst [vmem:[#allocation177_spill] sm:$0xff] %v5845_v61  ;;  %v2241_v38 = vand.u32 65535, %v8194_v26  ;;  %v911_v42 = vsub.f32 %v8195_v4, %v5680_v6  ;;  %v3170_v18 = vsub.f32 0.0, %v1376_v32  ;;  %v2070_v43 = vcvt.f32.s32 %v8197_v63  ;;  %v8201_v32 = vld [vmem:[#allocation30_spill] sm:$0xff]  ;;  %v8202_v6 = vld [vmem:[#allocation197_spill] sm:$0xff] }
 0x326   :  { %8193 = vst [vmem:[#allocation120_spill] sm:$0xff] %v5848_v49  ;;  %1099 = vadd.xlane.f32.xlu0 %v3889_v5  ;;  %v3294_v29 = vadd.f32 %v3293_v40, %v3231_v57  ;;  %v2255_v30 = vand.u32 65535, %v8198_v45  ;;  %v3233_v5 = vmul.f32 %v8199_v10, %v3169_v3  ;;  %v3171_v26 = vsub.f32 0.0, %v1377_v2  ;;  %v8204_v2 = vld [vmem:[#allocation171_spill] sm:$0xff] }
 0x327   :  { %vm1702_vm3 = vcmp.eq.s32.totalorder %v4778_v39, %v8201_v32  ;;  %v2084_v28 = vcvt.f32.s32 %v8202_v6  ;;  %vm2247_vm4 = vcmp.eq.f32.partialorder %v8203_v7, %v5734_v47  ;;  %v2243_v57 = vcvt.s32.f32 %v2241_v38 }
 0x328   :  { %v1080_v37 = vpop.xlane.xlu2 %1079  ;;  %v1078_v36 = vpop.xlane.xlu1 %1077  ;;  %v1037_v45 = vmul.f32 1.442695, %v911_v42  ;;  %v3234_v3 = vmul.f32 %v5806_v56, %v3170_v18  ;;  %vm1904_vm5 = vcmp.eq.f32.partialorder %v8162_v41, %v8161_v1  ;;  %v2257_v63 = vcvt.s32.f32 %v2255_v30  ;;  %v8206_v42 = vld [vmem:[#allocation194_spill] sm:$0xff] }
 0x329   :  { %v3891_v27 = vpop.eup %3890  ;;  %3896 = vlog2.f32 %v1080_v37  ;;  %v5858_v20 = vpop.xlane.xlu0 %2273  ;;  %v3295_v37 = vadd.f32 %v3294_v29, %v3232_v15  ;;  %v2229_v10 = vcvt.s32.f32 %v2227_v21  ;;  %v3235_v33 = vmul.f32 %v5848_v49, %v3171_v26  ;;  %v8209_v26 = vld [vmem:[#allocation221_spill] sm:$0xff]  ;;  %v8255_v49 = vld [vmem:[#allocation199_spill] sm:$0xff] }
 0x32a   :  { %v1204_v25 = vmul.f32 0.6931472, %v3891_v27  ;;  %3898 = vlog2.f32 %v1078_v36  ;;  %8200 = vst [vmem:[#allocation52_spill] sm:$0xff] %v5858_v20  ;;  %v3893_v4 = vpop.eup %3892  ;;  %v2071_v36 = vshll.u32 %v2070_v43, 16  ;;  %v2248_v29 = vsel %vm2247_vm4, %v2243_v57, inf }
 0x32b   :  { %v3895_v40 = vpop.eup %3894  ;;  %v3296_v6 = vadd.f32 %v3295_v37, %v3233_v5  ;;  %v2085_v43 = vshll.u32 %v2084_v28, 16  ;;  %vm1905_vm6 = vcmp.eq.f32.partialorder %v8171_v44, %v8170_v60  ;;  %3900 = vpow2.f32 %v1037_v45  ;;  %v8210_v45 = vld [vmem:[#allocation188_spill] sm:$0xff] }
 0x32c   :  { %v1314_v27 = vadd.f32 %v1204_v25, %v8204_v2  ;;  %v2098_v25 = vcvt.f32.s32 %v8206_v42  ;;  %vm1903_vm8 = vcmp.eq.f32.partialorder %v8142_v14, %v5481_v55  ;;  %vm2261_vm9 = vcmp.eq.f32.partialorder %v8209_v26, %v5777_v13  ;;  %v8215_v26 = vld [vmem:[#allocation115_spill] sm:$0xff] }
 0x32d   :  { %1103 = vadd.xlane.f32.xlu2 %v3895_v40  ;;  %1101 = vadd.xlane.f32.xlu1 %v3893_v4  ;;  %v8207_v4 = vld [vmem:[#allocation209_spill] sm:$0xff]  ;;  %v3297_v21 = vadd.f32 %v3296_v6, %v3234_v3  ;;  %v5889_v57 = vsel %vm1904_vm5, %v4778_v39, 128  ;;  %v8211_v6 = vld [vmem:[#allocation176_spill] sm:$0xff]  ;;  %v5901_v42 = vsel %vm1905_vm6, %v4778_v39, 128  ;;  %vm1906_vm13 = vcmp.eq.f32.partialorder %v8172_v59, %v5715_v19 }
 0x32e   :  { %v1378_v38 = vsub.f32 %v8205_v53, %v1314_v27  ;;  %vm2233_vm7 = vcmp.eq.f32.partialorder %v8207_v4, %v5690_v48  ;;  %2249 = vmin.xlane.f32.xlu0 %v2248_v29  ;;  %8212 = vst [vmem:[#allocation59_spill] sm:$0xff] %v5901_v42  ;;  %v2410_v32 = vshra.s32 %v5889_v57, 16 }
 0x32f   :  { %v3897_v15 = vpop.eup %3896  ;;  %v3298_v40 = vadd.f32 %v3297_v21, %v3235_v33 }
 0x330   :  { %v3899_v18 = vpop.eup %3898  ;;  %v3172_v30 = vsub.f32 0.0, %v1378_v38  ;;  %v1208_v53 = vmul.f32 0.6931472, %v3897_v15  ;;  %v5879_v5 = vpop.xlane.xlu2 %2287  ;;  %v2234_v15 = vsel %vm2233_vm7, %v2229_v10, inf }
 0x331   :  { %8208 = vst [vmem:[#allocation121_spill] sm:$0xff] %v5879_v5  ;;  %v2068_v7 = vpop.xlane.xlu1 %2067  ;;  %v1206_v28 = vmul.f32 0.6931472, %v3899_v18  ;;  %v2082_v27 = vpop.xlane.xlu0 %2081  ;;  %v8213_v18 = vld [vmem:[#allocation123_spill] sm:$0xff] }
 0x332   :  { %v3236_v37 = vmul.f32 %v5841_v31, %v3172_v30  ;;  %v1316_v3 = vadd.f32 %v1208_v53, %v8210_v45  ;;  %v2069_v2 = vcvt.f32.s32 %v2068_v7  ;;  %v2083_v29 = vcvt.f32.s32 %v2082_v27  ;;  %v8218_v27 = vld [vmem:[#allocation41_spill] sm:$0xff] }
 0x333   :  { %v1315_v38 = vadd.f32 %v1206_v28, %v8211_v6  ;;  %v2262_v53 = vsel %vm2261_vm9, %v2257_v63, inf  ;;  %v5908_v7 = vsel %vm1702_vm3, 1.0, %v8154_v17  ;;  %v5915_v28 = vsel %vm1903_vm8, %v4778_v39, 128 }
 0x334   :  { %v3299_v33 = vadd.f32 %v3298_v40, %v3236_v37  ;;  %v1380_v21 = vsub.f32 %v8213_v18, %v1316_v3  ;;  %v2072_v30 = vadd.s32 %v2071_v36, %v2069_v2  ;;  %8214 = vst [vmem:[#allocation173_spill] sm:$0xff] %v5908_v7  ;;  %v2086_v10 = vadd.s32 %v2085_v43, %v2083_v29  ;;  %v3901_v40 = vpop.eup %3900  ;;  %v8216_v36 = vld [vmem:[#allocation222_spill] sm:$0xff]  ;;  %v8217_v2 = vld [vmem:[#allocation105_spill] sm:$0xff] }
 0x335   :  { %v1379_v4 = vsub.f32 %v8215_v26, %v1315_v38  ;;  %2263 = vmin.xlane.f32.xlu2 %v2262_v53  ;;  %2235 = vmin.xlane.f32.xlu1 %v2234_v15  ;;  %v912_v63 = vsub.f32 %v8216_v36, %v5783_v62  ;;  %v2424_v37 = vshra.s32 %v5901_v42, 16  ;;  %vm1907_vm12 = vcmp.eq.f32.partialorder %v8218_v27, %v8217_v2  ;;  %v8235_v62 = vld [vmem:[#allocation25_spill] sm:$0xff]  ;;  %v8256_v42 = vld [vmem:[#allocation143_spill] sm:$0xff] }
 0x336   :  { %vm2903_vm10 = vcmp.eq.s32.totalorder %v4778_v39, %v2072_v30  ;;  %v3174_v45 = vsub.f32 0.0, %v1380_v21  ;;  %vm2904_vm11 = vcmp.eq.s32.totalorder %v4778_v39, %v2086_v10  ;;  %1165 = vadd.xlane.f32.xlu0 %v3901_v40  ;;  %v2099_v6 = vshll.u32 %v2098_v25, 16 }
 0x337   :  { %v3173_v43 = vsub.f32 0.0, %v1379_v4  ;;  %v3633_v3 = vsel %vm2903_vm10, 1.0, %v8154_v17  ;;  %v3634_v29 = vsel %vm2904_vm11, 1.0, %v8154_v17  ;;  %v2396_v26 = vshra.s32 %v5915_v28, 16 }
 0x338   :  { %v3095_v38 = vmul.f32 %v3633_v3, %v5517_v51  ;;  %v2096_v15 = vpop.xlane.xlu2 %2095  ;;  %v3096_v21 = vmul.f32 %v3634_v29, %v5564_v52  ;;  %v1039_v4 = vmul.f32 1.442695, %v912_v63  ;;  %v5936_v25 = vcvt.s32.f32 %v2410_v32 }
 0x339   :  { %v5928_v18 = vpop.xlane.xlu1 %2301  ;;  %v3237_v30 = vmul.f32 %v5845_v61, %v3173_v43  ;;  %v2097_v53 = vcvt.f32.s32 %v2096_v15  ;;  %v5934_v40 = vpop.xlane.xlu0 %1141  ;;  %v5938_v3 = vcvt.s32.f32 %v2424_v37  ;;  %v3238_v51 = vmul.f32 %v5908_v7, %v3174_v45 }
 0x33a   :  { %8219 = vst [vmem:[#allocation128_spill] sm:$0xff] %v5928_v18  ;;  %v3355_v10 = vadd.f32 %v5819_v46, %v3095_v38  ;;  %v5947_v63 = vsel %vm1907_vm12, %v4778_v39, 128  ;;  %v5952_v46 = vcvt.s32.f32 %v2396_v26  ;;  %3902 = vpow2.f32 %v1039_v4  ;;  %v8228_v26 = vld [vmem:[#allocation110_spill] sm:$0xff]  ;;  %v8229_v4 = vld [vmem:[#allocation45_spill] sm:$0xff] }
 0x33b   :  { %8220 = vst [vmem:[#allocation62_spill] sm:$0xff] %v5934_v40  ;;  %v3300_v43 = vadd.f32 %v3299_v33, %v3237_v30  ;;  %v2100_v36 = vadd.s32 %v2099_v6, %v2097_v53  ;;  %v5957_v33 = vsel %vm1906_vm13, %v4778_v39, 128  ;;  %vm1908_vm15 = vcmp.eq.f32.partialorder %v8229_v4, %v8228_v26 }
 0x33c   :  { %8221 = vst [vmem:[#allocation66_spill] sm:$0xff] %v5936_v25  ;;  %v3356_v29 = vadd.f32 %v3355_v10, %v3096_v21  ;;  %vm1703_vm0 = vcmp.eq.s32.totalorder %v4778_v39, %v8235_v62 }
 0x33d   :  { %8222 = vst [vmem:[#allocation129_spill] sm:$0xff] %v5938_v3  ;;  %vm2905_vm14 = vcmp.eq.s32.totalorder %v4778_v39, %v2100_v36  ;;  %2413 = vmin.xlane.f32.xlu2 %v5936_v25  ;;  %2427 = vmin.xlane.f32.xlu1 %v5938_v3  ;;  %v5954_v32 = vadd.f32 %v3300_v43, %v3238_v51  ;;  %v2452_v36 = vshra.s32 %v5947_v63, 16  ;;  %v2438_v51 = vshra.s32 %v5957_v33, 16  ;;  %v8231_v43 = vld [vmem:[#allocation226_spill] sm:$0xff] }
 0x33e   :  { %8223 = vst [vmem:[#allocation190_spill] sm:$0xff] %v5952_v46  ;;  %v3635_v37 = vsel %vm2905_vm14, 1.0, %v8154_v17  ;;  %2399 = vmin.xlane.f32.xlu0 %v5952_v46  ;;  %v8241_v46 = vld [vmem:[#allocation242_spill] sm:$0xff] }
 0x33f   :  { %8224 = vst [vmem:[#allocation71_spill] sm:$0xff] %v5957_v33  ;;  %v3097_v45 = vmul.f32 %v3635_v37, %v5556_v24  ;;  %v5970_v21 = vcvt.s32.f32 %v2452_v36  ;;  %v5975_v10 = vcvt.s32.f32 %v2438_v51  ;;  %v2269_v37 = vand.u32 65535, %v8231_v43  ;;  %v8232_v24 = vld [vmem:[#allocation234_spill] sm:$0xff]  ;;  %v8240_v33 = vld [vmem:[#allocation243_spill] sm:$0xff] }
 0x340   :  { %v5963_v6 = vpop.xlane.xlu2 %1145  ;;  %v3903_v53 = vpop.eup %3902 }
 0x341   :  { %8225 = vst [vmem:[#allocation192_spill] sm:$0xff] %v5963_v6  ;;  %v5965_v38 = vpop.xlane.xlu1 %1143  ;;  %v5967_v15 = vadd.f32 %v3356_v29, %v3097_v45  ;;  %v1082_v30 = vpop.xlane.xlu0 %1081  ;;  %v2297_v29 = vand.u32 65535, %v8232_v24  ;;  %v8233_v45 = vld [vmem:[#allocation238_spill] sm:$0xff]  ;;  %v8237_v24 = vld [vmem:[#allocation127_spill] sm:$0xff]  ;;  %v2271_v43 = vcvt.s32.f32 %v2269_v37 }
 0x342   :  { %8226 = vst [vmem:[#allocation137_spill] sm:$0xff] %v5965_v38  ;;  %3904 = vlog2.f32 %v1082_v30  ;;  %v2311_v52 = vand.u32 65535, %v8233_v45  ;;  %v8234_v30 = vld [vmem:[#allocation229_spill] sm:$0xff]  ;;  %v5985_v38 = vsel %vm1908_vm15, %v4778_v39, 128  ;;  %vm2303_vm2 = vcmp.eq.f32.partialorder %v8237_v24, %v5928_v18 }
 0x343   :  { %8227 = vst [vmem:[#allocation138_spill] sm:$0xff] %v5970_v21  ;;  %v2283_v36 = vand.u32 65535, %v8234_v30  ;;  %v2299_v40 = vcvt.s32.f32 %v2297_v29  ;;  %v8245_v29 = vld [vmem:[#allocation126_spill] sm:$0xff] }
 0x344   :  { %8230 = vst [vmem:[#allocation23_spill] sm:$0xff] %v5975_v10 }
 0x345   :  { %2455 = vmin.xlane.f32.xlu2 %v5970_v21  ;;  %1167 = vadd.xlane.f32.xlu1 %v3903_v53  ;;  %v8236_v53 = vld [vmem:[#allocation230_spill] sm:$0xff]  ;;  %v8239_v21 = vld [vmem:[#allocation233_spill] sm:$0xff]  ;;  %v2285_v61 = vcvt.s32.f32 %v2283_v36  ;;  %v2304_v24 = vsel %vm2303_vm2, %v2299_v40, inf }
 0x346   :  { %2441 = vmin.xlane.f32.xlu0 %v5975_v10  ;;  %vm2275_vm1 = vcmp.eq.f32.partialorder %v8236_v53, %v5858_v20  ;;  %v2313_v10 = vcvt.s32.f32 %v2311_v52  ;;  %vm2289_vm3 = vcmp.eq.f32.partialorder %v8239_v21, %v5879_v5  ;;  %v2325_v53 = vand.u32 65535, %v8241_v46  ;;  %v8242_v20 = vld [vmem:[#allocation193_spill] sm:$0xff] }
 0x347   :  { %v2466_v52 = vshra.s32 %v5985_v38, 16  ;;  %v2290_v5 = vsel %vm2289_vm3, %v2285_v61, inf  ;;  %v6008_v46 = vsel %vm1703_vm0, 1.0, %v8154_v17 }
 0x348   :  { %v1086_v7 = vpop.xlane.xlu2 %1085  ;;  %v3905_v51 = vpop.eup %3904  ;;  %8246 = vst [vmem:[#allocation140_spill] sm:$0xff] %v6008_v46  ;;  %v2327_v61 = vcvt.s32.f32 %v2325_v53 }
 0x349   :  { %v1084_v6 = vpop.xlane.xlu1 %1083  ;;  %3906 = vlog2.f32 %v1086_v7  ;;  %v1210_v45 = vmul.f32 0.6931472, %v3905_v51  ;;  %v5991_v30 = vpop.xlane.xlu0 %2315  ;;  %v2276_v7 = vsel %vm2275_vm1, %v2271_v43, inf  ;;  %v6017_v62 = vcvt.s32.f32 %v2466_v52 }
 0x34a   :  { %3908 = vlog2.f32 %v1084_v6  ;;  %8238 = vst [vmem:[#allocation75_spill] sm:$0xff] %v5991_v30  ;;  %vm2317_vm4 = vcmp.eq.f32.partialorder %v8240_v33, %v5991_v30  ;;  %v8244_v6 = vld [vmem:[#allocation203_spill] sm:$0xff] }
 0x34b   :  { %v1317_v31 = vadd.f32 %v1210_v45, %v8242_v20  ;;  %v5999_v37 = vsel %vm2317_vm4, %v2313_v10, inf  ;;  %v2112_v51 = vcvt.f32.s32 %v8244_v6  ;;  %v8247_v20 = vld [vmem:[#allocation218_spill] sm:$0xff]  ;;  %v8248_v10 = vld [vmem:[#allocation29_spill] sm:$0xff]  ;;  %v8250_v6 = vld [vmem:[#allocation136_spill] sm:$0xff]  ;;  %8251 = vst [vmem:[#allocation147_spill] sm:$0xff] %v6017_v62 }
 0x34c   :  { %8243 = vst [vmem:[#allocation80_spill] sm:$0xff] %v5999_v37  ;;  %v2126_v40 = vcvt.f32.s32 %v8247_v20  ;;  %vm1704_vm5 = vcmp.eq.s32.totalorder %v4778_v39, %v8248_v10 }
 0x34d   :  { %2305 = vmin.xlane.f32.xlu2 %v2304_v24  ;;  %2277 = vmin.xlane.f32.xlu1 %v2276_v7  ;;  %v1381_v21 = vsub.f32 %v8245_v29, %v1317_v31  ;;  %v2113_v24 = vshll.u32 %v2112_v51, 16 }
 0x34e   :  { %2291 = vmin.xlane.f32.xlu0 %v2290_v5  ;;  %v8252_v5 = vld [vmem:[#allocation210_spill] sm:$0xff]  ;;  %v2127_v25 = vshll.u32 %v2126_v40, 16  ;;  %v6034_v40 = vsel %vm1704_vm5, 1.0, %v8154_v17 }
 0x34f   :  { %v3907_v18 = vpop.eup %3906  ;;  %v3175_v36 = vsub.f32 0.0, %v1381_v21  ;;  %8259 = vst [vmem:[#allocation195_spill] sm:$0xff] %v6034_v40 }
 0x350   :  { %v3909_v33 = vpop.eup %3908  ;;  %v1214_v43 = vmul.f32 0.6931472, %v3907_v18  ;;  %v6013_v45 = vpop.xlane.xlu2 %2329  ;;  %v8254_v18 = vld [vmem:[#allocation215_spill] sm:$0xff] }
 0x351   :  { %8249 = vst [vmem:[#allocation184_spill] sm:$0xff] %v6013_v45  ;;  %v2110_v31 = vpop.xlane.xlu1 %2109  ;;  %v1212_v7 = vmul.f32 0.6931472, %v3909_v33  ;;  %vm2331_vm6 = vcmp.eq.f32.partialorder %v8250_v6, %v6013_v45  ;;  %v3239_v29 = vmul.f32 %v6008_v46, %v3175_v36  ;;  %v2124_v37 = vpop.xlane.xlu0 %2123  ;;  %v2140_v21 = vcvt.f32.s32 %v8254_v18  ;;  %v8257_v45 = vld [vmem:[#allocation155_spill] sm:$0xff]  ;;  %v8258_v36 = vld [vmem:[#allocation132_spill] sm:$0xff] }
 0x352   :  { %v1319_v20 = vadd.f32 %v1214_v43, %v8252_v5  ;;  %v2111_v30 = vcvt.f32.s32 %v2110_v31  ;;  %v6021_v3 = vsel %vm2331_vm6, %v2327_v61, inf  ;;  %v2125_v51 = vcvt.f32.s32 %v2124_v37 }
 0x353   :  { %8253 = vst [vmem:[#allocation161_spill] sm:$0xff] %v6021_v3  ;;  %v1318_v53 = vadd.f32 %v1212_v7, %v8255_v49  ;;  %v3302_v33 = vadd.f32 %v5954_v32, %v3239_v29  ;;  %v2339_v44 = vand.u32 65535, %v8257_v45  ;;  %v8260_v49 = vld [vmem:[#allocation33_spill] sm:$0xff] }
 0x354   :  { %v1383_v6 = vsub.f32 %v8256_v42, %v1319_v20  ;;  %v2114_v52 = vadd.s32 %v2113_v24, %v2111_v30  ;;  %v2128_v43 = vadd.s32 %v2127_v25, %v2125_v51  ;;  %vm1705_vm7 = vcmp.eq.s32.totalorder %v4778_v39, %v8260_v49 }
 0x355   :  { %v1382_v46 = vsub.f32 %v8258_v36, %v1318_v53  ;;  %2469 = vmin.xlane.f32.xlu1 %v6017_v62  ;;  %v2141_v25 = vshll.u32 %v2140_v21, 16  ;;  %v2341_v61 = vcvt.s32.f32 %v2339_v44  ;;  %v6053_v5 = vsel %vm1705_vm7, 1.0, %v8154_v17 }
 0x356   :  { %vm2906_vm8 = vcmp.eq.s32.totalorder %v4778_v39, %v2114_v52  ;;  %v3177_v42 = vsub.f32 0.0, %v1383_v6  ;;  %vm2907_vm9 = vcmp.eq.s32.totalorder %v4778_v39, %v2128_v43  ;;  %8263 = vst [vmem:[#allocation196_spill] sm:$0xff] %v6053_v5 }
 0x357   :  { %v3176_v32 = vsub.f32 0.0, %v1382_v46  ;;  %v3636_v30 = vsel %vm2906_vm8, 1.0, %v8154_v17  ;;  %v3637_v45 = vsel %vm2907_vm9, 1.0, %v8154_v17  ;;  %v8262_v46 = vld [vmem:[#allocation150_spill] sm:$0xff] }
 0x358   :  { %v3098_v37 = vmul.f32 %v3636_v30, %v5589_v58  ;;  %v2138_v31 = vpop.xlane.xlu2 %2137  ;;  %v3099_v7 = vmul.f32 %v3637_v45, %v5570_v23  ;;  %v3241_v44 = vmul.f32 %v6053_v5, %v3177_v42 }
 0x359   :  { %v6043_v10 = vpop.xlane.xlu1 %2343  ;;  %v3240_v24 = vmul.f32 %v6034_v40, %v3176_v32  ;;  %v2139_v29 = vcvt.f32.s32 %v2138_v31  ;;  %v6056_v18 = vpop.xlane.xlu0 %1147 }
 0x35a   :  { %8261 = vst [vmem:[#allocation166_spill] sm:$0xff] %v6043_v10  ;;  %vm2345_vm10 = vcmp.eq.f32.partialorder %v8262_v46, %v6043_v10  ;;  %v3358_v20 = vadd.f32 %v5967_v15, %v3098_v37  ;;  %v8268_v37 = vld [vmem:[#allocation12_spill] sm:$0xff] }
 0x35b   :  { %8264 = vst [vmem:[#allocation84_spill] sm:$0xff] %v6056_v18  ;;  %v6058_v21 = vsel %vm2345_vm10, %v2341_v61, inf  ;;  %v3303_v53 = vadd.f32 %v3302_v33, %v3240_v24  ;;  %v2142_v51 = vadd.s32 %v2141_v25, %v2139_v29  ;;  %v2353_v42 = vand.u32 65535, %v8268_v37  ;;  %v8271_v29 = vld [vmem:[#allocation214_spill] sm:$0xff] }
 0x35c   :  { %8265 = vst [vmem:[#allocation88_spill] sm:$0xff] %v6058_v21  ;;  %v3359_v6 = vadd.f32 %v3358_v20, %v3099_v7  ;;  %v8270_v7 = vld [vmem:[#allocation19_spill] sm:$0xff] }
 0x35d   :  { %vm2908_vm11 = vcmp.eq.s32.totalorder %v4778_v39, %v2142_v51  ;;  %v3304_v52 = vadd.f32 %v3303_v53, %v3241_v44  ;;  %v2355_v24 = vcvt.s32.f32 %v2353_v42  ;;  %v8272_v20 = vld [vmem:[#allocation99_spill] sm:$0xff]  ;;  %v8274_v51 = vld [vmem:[#allocation28_spill] sm:$0xff] }
 0x35e   :  { %v3638_v36 = vsel %vm2908_vm11, 1.0, %v8154_v17  ;;  %v2367_v44 = vand.u32 65535, %v8272_v20  ;;  %vm1706_vm13 = vcmp.eq.s32.totalorder %v4778_v39, %v8274_v51  ;;  %v8279_v20 = vld [vmem:[#allocation32_spill] sm:$0xff] }
 0x35f   :  { %v3100_v43 = vmul.f32 %v3638_v36, %v8174_v35  ;;  %vm1707_vm14 = vcmp.eq.s32.totalorder %v4778_v39, %v8279_v20 }
 0x360   :  { %v6064_v49 = vpop.xlane.xlu2 %1151 }
 0x361   :  { %8266 = vst [vmem:[#allocation148_spill] sm:$0xff] %v6064_v49  ;;  %v6066_v32 = vpop.xlane.xlu1 %1149  ;;  %v6068_v15 = vadd.f32 %v3359_v6, %v3100_v43  ;;  %v1088_v30 = vpop.xlane.xlu0 %1087  ;;  %v8275_v6 = vld [vmem:[#allocation225_spill] sm:$0xff] }
 0x362   :  { %8267 = vst [vmem:[#allocation152_spill] sm:$0xff] %v6066_v32  ;;  %3910 = vlog2.f32 %v1088_v30  ;;  %v2154_v36 = vcvt.f32.s32 %v8275_v6  ;;  %v8276_v43 = vld [vmem:[#allocation149_spill] sm:$0xff]  ;;  %v2451_v32 = vand.u32 65535, %v5947_v63 }
 0x364   :  { %v2155_v51 = vshll.u32 %v2154_v36, 16  ;;  %v8283_v36 = vld [vmem:[#allocation168_spill] sm:$0xff] }
 0x368   :  { %v1092_v33 = vpop.xlane.xlu2 %1091  ;;  %v3911_v45 = vpop.eup %3910 }
 0x369   :  { %v1090_v25 = vpop.xlane.xlu1 %1089  ;;  %3912 = vlog2.f32 %v1092_v33  ;;  %v1216_v31 = vmul.f32 0.6931472, %v3911_v45  ;;  %v6071_v61 = vpop.xlane.xlu0 %2357  ;;  %v2168_v33 = vcvt.f32.s32 %v5422_v16 }
 0x36a   :  { %3914 = vlog2.f32 %v1090_v25  ;;  %8269 = vst [vmem:[#allocation20_spill] sm:$0xff] %v6071_v61  ;;  %vm2359_vm12 = vcmp.eq.f32.partialorder %v8270_v7, %v6071_v61  ;;  %v6085_v25 = vsel %vm1706_vm13, 1.0, %v8154_v17 }
 0x36b   :  { %v1320_v46 = vadd.f32 %v1216_v31, %v8271_v29  ;;  %v6077_v53 = vsel %vm2359_vm12, %v2355_v24, inf  ;;  %8277 = vst [vmem:[#allocation93_spill] sm:$0xff] %v6085_v25  ;;  %v2369_v29 = vcvt.s32.f32 %v2367_v44  ;;  %v2169_v58 = vshll.u32 %v2168_v33, 16  ;;  %v8282_v44 = vld [vmem:[#allocation220_spill] sm:$0xff] }
 0x36c   :  { %8273 = vst [vmem:[#allocation212_spill] sm:$0xff] %v6077_v53 }
 0x36d   :  { %v1384_v30 = vsub.f32 %v8276_v43, %v1320_v46  ;;  %v8280_v46 = vld [vmem:[#allocation231_spill] sm:$0xff] }
 0x36f   :  { %v3913_v37 = vpop.eup %3912  ;;  %v3178_v45 = vsub.f32 0.0, %v1384_v30 }
 0x370   :  { %v3915_v42 = vpop.eup %3914  ;;  %v1220_v31 = vmul.f32 0.6931472, %v3913_v37  ;;  %v6087_v7 = vpop.xlane.xlu2 %2371  ;;  %v2182_v37 = vcvt.f32.s32 %v5409_v34  ;;  %v8286_v34 = vld [vmem:[#allocation37_spill] sm:$0xff] }
 0x371   :  { %8278 = vst [vmem:[#allocation158_spill] sm:$0xff] %v6087_v7  ;;  %v2152_v24 = vpop.xlane.xlu1 %2151  ;;  %v1218_v6 = vmul.f32 0.6931472, %v3915_v42  ;;  %vm2373_vm15 = vcmp.eq.f32.partialorder %v5658_v11, %v6087_v7  ;;  %v3242_v16 = vmul.f32 %v6085_v25, %v3178_v45  ;;  %v2166_v23 = vpop.xlane.xlu0 %2165  ;;  %v2381_v11 = vand.u32 65535, %v5663_v22  ;;  %v8284_v7 = vld [vmem:[#allocation154_spill] sm:$0xff] }
 0x372   :  { %v1322_v43 = vadd.f32 %v1220_v31, %v8280_v46  ;;  %v2153_v35 = vcvt.f32.s32 %v2152_v24  ;;  %v6095_v30 = vsel %vm2373_vm15, %v2369_v29, inf  ;;  %v2167_v53 = vcvt.f32.s32 %v2166_v23 }
 0x373   :  { %8281 = vst [vmem:[#allocation24_spill] sm:$0xff] %v6095_v30  ;;  %v1321_v61 = vadd.f32 %v1218_v6, %v8282_v44  ;;  %v3305_v5 = vadd.f32 %v3304_v52, %v3242_v16  ;;  %v6106_v31 = vsel %vm1707_vm14, 1.0, %v8154_v17  ;;  %vm1708_vm0 = vcmp.eq.s32.totalorder %v4778_v39, %v8286_v34  ;;  %v8292_v44 = vld [vmem:[#allocation36_spill] sm:$0xff] }
 0x374   :  { %v1386_v42 = vsub.f32 %v8283_v36, %v1322_v43  ;;  %v2156_v10 = vadd.s32 %v2155_v51, %v2153_v35  ;;  %v2170_v25 = vadd.s32 %v2169_v58, %v2167_v53  ;;  %8285 = vst [vmem:[#allocation97_spill] sm:$0xff] %v6106_v31  ;;  %v2183_v22 = vshll.u32 %v2182_v37, 16  ;;  %v8291_v37 = vld [vmem:[#allocation31_spill] sm:$0xff]  ;;  %v8293_v36 = vld [vmem:[#allocation34_spill] sm:$0xff] }
 0x375   :  { %v1385_v45 = vsub.f32 %v8284_v7, %v1321_v61  ;;  %v2383_v7 = vcvt.s32.f32 %v2381_v11  ;;  %vm1709_vm4 = vcmp.eq.s32.totalorder %v4778_v39, %v8291_v37  ;;  %vm1710_vm5 = vcmp.eq.s32.totalorder %v4778_v39, %v8292_v44  ;;  %v8295_v11 = vld [vmem:[#allocation42_spill] sm:$0xff]  ;;  %v8310_v37 = vld [vmem:[#allocation49_spill] sm:$0xff] }
 0x376   :  { %vm2909_vm1 = vcmp.eq.s32.totalorder %v4778_v39, %v2156_v10  ;;  %v3180_v23 = vsub.f32 0.0, %v1386_v42  ;;  %vm2910_vm2 = vcmp.eq.s32.totalorder %v4778_v39, %v2170_v25  ;;  %v6125_v25 = vsel %vm1708_vm0, 1.0, %v8154_v17  ;;  %v8294_v42 = vld [vmem:[#allocation40_spill] sm:$0xff] }
 0x377   :  { %v3179_v52 = vsub.f32 0.0, %v1385_v45  ;;  %v3639_v35 = vsel %vm2909_vm1, 1.0, %v8154_v17  ;;  %v3640_v61 = vsel %vm2910_vm2, 1.0, %v8154_v17  ;;  %8288 = vst [vmem:[#allocation22_spill] sm:$0xff] %v6125_v25  ;;  %vm1712_vm6 = vcmp.eq.s32.totalorder %v4778_v39, %v8293_v36  ;;  %v8313_v36 = vld [vmem:[#allocation57_spill] sm:$0xff] }
 0x378   :  { %v3101_v58 = vmul.f32 %v3639_v35, %v8179_v9  ;;  %v2180_v53 = vpop.xlane.xlu2 %2179  ;;  %v3102_v29 = vmul.f32 %v3640_v61, %v8184_v8  ;;  %v3244_v16 = vmul.f32 %v6125_v25, %v3180_v23  ;;  %vm1713_vm8 = vcmp.eq.s32.totalorder %v4778_v39, %v8294_v42  ;;  %v8299_v35 = vld [vmem:[#allocation39_spill] sm:$0xff]  ;;  %v8314_v42 = vld [vmem:[#allocation54_spill] sm:$0xff] }
 0x379   :  { %v6115_v33 = vpop.xlane.xlu1 %2385  ;;  %v3243_v24 = vmul.f32 %v6106_v31, %v3179_v52  ;;  %v2181_v10 = vcvt.f32.s32 %v2180_v53  ;;  %v6128_v51 = vpop.xlane.xlu0 %1153  ;;  %vm1711_vm9 = vcmp.eq.s32.totalorder %v4778_v39, %v8295_v11  ;;  %v6149_v34 = vsel %vm1709_vm4, 1.0, %v8154_v17  ;;  %v8315_v11 = vld [vmem:[#allocation61_spill] sm:$0xff] }
 0x37a   :  { %8287 = vst [vmem:[#allocation165_spill] sm:$0xff] %v6115_v33  ;;  %vm2387_vm3 = vcmp.eq.f32.partialorder %v5693_v12, %v6115_v33  ;;  %v3361_v20 = vadd.f32 %v6068_v15, %v3101_v58  ;;  %v6152_v23 = vsel %vm1710_vm5, 1.0, %v8154_v17  ;;  %v6155_v52 = vsel %vm1712_vm6, 1.0, %v8154_v17  ;;  %v8333_v33 = vld [vmem:[#allocation65_spill] sm:$0xff] }
 0x37b   :  { %8289 = vst [vmem:[#allocation26_spill] sm:$0xff] %v6128_v51  ;;  %v6130_v6 = vsel %vm2387_vm3, %v2383_v7, inf  ;;  %v3306_v46 = vadd.f32 %v3305_v5, %v3243_v24  ;;  %v2184_v43 = vadd.s32 %v2183_v22, %v2181_v10  ;;  %vm1715_vm10 = vcmp.eq.s32.totalorder %v4778_v39, %v8299_v35  ;;  %v8304_v7 = vld [vmem:[#allocation46_spill] sm:$0xff]  ;;  %v8306_v10 = vld [vmem:[#allocation44_spill] sm:$0xff] }
 0x37c   :  { %8290 = vst [vmem:[#allocation27_spill] sm:$0xff] %v6130_v6  ;;  %v3362_v12 = vadd.f32 %v3361_v20, %v3102_v29  ;;  %v6164_v61 = vsel %vm1713_vm8, 1.0, %v8154_v17  ;;  %v6167_v53 = vsel %vm1711_vm9, 1.0, %v8154_v17  ;;  %vm1716_vm11 = vcmp.eq.s32.totalorder %v4778_v39, %v8304_v7  ;;  %v8305_v29 = vld [vmem:[#allocation47_spill] sm:$0xff]  ;;  %v8307_v20 = vld [vmem:[#allocation50_spill] sm:$0xff]  ;;  %v8349_v51 = vld [vmem:[#allocation172_spill] sm:$0xff] }
 0x37d   :  { %vm2911_vm7 = vcmp.eq.s32.totalorder %v4778_v39, %v2184_v43  ;;  %v6140_v15 = vadd.f32 %v3306_v46, %v3244_v16  ;;  %8296 = vst [vmem:[#allocation102_spill] sm:$0xff] %v6149_v34  ;;  %vm1714_vm12 = vcmp.eq.s32.totalorder %v4778_v39, %v8305_v29  ;;  %vm1718_vm13 = vcmp.eq.s32.totalorder %v4778_v39, %v8306_v10  ;;  %v8308_v16 = vld [vmem:[#allocation53_spill] sm:$0xff]  ;;  %v8335_v6 = vld [vmem:[#allocation74_spill] sm:$0xff] }
 0x37e   :  { %v3641_v5 = vsel %vm2911_vm7, 1.0, %v8154_v17  ;;  %8297 = vst [vmem:[#allocation109_spill] sm:$0xff] %v6152_v23  ;;  %vm1719_vm14 = vcmp.eq.s32.totalorder %v4778_v39, %v8307_v20  ;;  %vm1717_vm15 = vcmp.eq.s32.totalorder %v4778_v39, %v8308_v16  ;;  %v6182_v43 = vsel %vm1715_vm10, 1.0, %v8154_v17  ;;  %v8322_v20 = vld [vmem:[#allocation64_spill] sm:$0xff]  ;;  %v8323_v16 = vld [vmem:[#allocation163_spill] sm:$0xff] }
 0x37f   :  { %v3103_v45 = vmul.f32 %v3641_v5, %v8189_v50  ;;  %8298 = vst [vmem:[#allocation213_spill] sm:$0xff] %v6155_v52  ;;  %vm1721_vm0 = vcmp.eq.s32.totalorder %v4778_v39, %v8310_v37  ;;  %v6189_v44 = vsel %vm1716_vm11, 1.0, %v8154_v17  ;;  %vm1720_vm2 = vcmp.eq.s32.totalorder %v4778_v39, %v8313_v36  ;;  %v8327_v36 = vld [vmem:[#allocation175_spill] sm:$0xff] }
 0x380   :  { %v6159_v22 = vpop.xlane.xlu2 %1157  ;;  %8302 = vst [vmem:[#allocation217_spill] sm:$0xff] %v6164_v61  ;;  %vm1724_vm3 = vcmp.eq.s32.totalorder %v4778_v39, %v8314_v42  ;;  %vm1725_vm4 = vcmp.eq.s32.totalorder %v4778_v39, %v8315_v11  ;;  %v6198_v5 = vsel %vm1714_vm12, 1.0, %v8154_v17  ;;  %v6204_v35 = vsel %vm1719_vm14, 1.0, %v8154_v17  ;;  %v8328_v42 = vld [vmem:[#allocation60_spill] sm:$0xff] }
 0x381   :  { %8300 = vst [vmem:[#allocation205_spill] sm:$0xff] %v6159_v22  ;;  %v6161_v58 = vpop.xlane.xlu1 %1155  ;;  %v6171_v24 = vadd.f32 %v3362_v12, %v3103_v45  ;;  %v1094_v46 = vpop.xlane.xlu0 %1093  ;;  %v8311_v12 = vld [vmem:[#allocation56_spill] sm:$0xff]  ;;  %v6201_v45 = vsel %vm1718_vm13, 1.0, %v8154_v17  ;;  %v6207_v7 = vsel %vm1717_vm15, 1.0, %v8154_v17  ;;  %v6210_v29 = vsel %vm1721_vm0, 1.0, %v8154_v17 }
 0x382   :  { %8301 = vst [vmem:[#allocation182_spill] sm:$0xff] %v6161_v58  ;;  %vm1722_vm1 = vcmp.eq.s32.totalorder %v4778_v39, %v8311_v12  ;;  %3916 = vlog2.f32 %v1094_v46  ;;  %vm1723_vm5 = vcmp.eq.s32.totalorder %v4778_v39, %v8322_v20  ;;  %v6219_v46 = vsel %vm1720_vm2, 1.0, %v8154_v17  ;;  %v8329_v11 = vld [vmem:[#allocation68_spill] sm:$0xff]  ;;  %v8330_v20 = vld [vmem:[#allocation69_spill] sm:$0xff]  ;;  %v8342_v58 = vld [vmem:[#allocation186_spill] sm:$0xff] }
 0x383   :  { %8303 = vst [vmem:[#allocation30_spill] sm:$0xff] %v6167_v53  ;;  %v6213_v10 = vsel %vm1722_vm1, 1.0, %v8154_v17  ;;  %3918 = vlog2.f32 %v8323_v16  ;;  %v6222_v37 = vsel %vm1724_vm3, 1.0, %v8154_v17  ;;  %v6225_v12 = vsel %vm1725_vm4, 1.0, %v8154_v17  ;;  %v8331_v16 = vld [vmem:[#allocation180_spill] sm:$0xff] }
 0x384   :  { %8309 = vst [vmem:[#allocation197_spill] sm:$0xff] %v6182_v43  ;;  %3920 = vlog2.f32 %v8327_v36  ;;  %vm1727_vm6 = vcmp.eq.s32.totalorder %v4778_v39, %v8328_v42  ;;  %vm1728_vm7 = vcmp.eq.s32.totalorder %v4778_v39, %v8329_v11  ;;  %vm1726_vm8 = vcmp.eq.s32.totalorder %v4778_v39, %v8330_v20  ;;  %v8334_v36 = vld [vmem:[#allocation73_spill] sm:$0xff]  ;;  %v8341_v42 = vld [vmem:[#allocation51_spill] sm:$0xff] }
 0x385   :  { %8312 = vst [vmem:[#allocation216_spill] sm:$0xff] %v6189_v44  ;;  %3922 = vlog2.f32 %v8331_v16  ;;  %v6236_v25 = vsel %vm1723_vm5, 1.0, %v8154_v17  ;;  %vm1730_vm9 = vcmp.eq.s32.totalorder %v4778_v39, %v8333_v33  ;;  %vm1731_vm10 = vcmp.eq.s32.totalorder %v4778_v39, %v8334_v36  ;;  %v8348_v33 = vld [vmem:[#allocation241_spill] sm:$0xff] }
 0x386   :  { %8316 = vst [vmem:[#allocation171_spill] sm:$0xff] %v6198_v5  ;;  %vm1729_vm11 = vcmp.eq.s32.totalorder %v4778_v39, %v8335_v6  ;;  %v2210_v31 = vcvt.f32.s32 %v5573_v54  ;;  %v6249_v21 = vsel %vm1727_vm6, 1.0, %v8154_v17  ;;  %v6255_v22 = vsel %vm1728_vm7, 1.0, %v8154_v17 }
 0x387   :  { %8317 = vst [vmem:[#allocation113_spill] sm:$0xff] %v6201_v45  ;;  %v6261_v54 = vsel %vm1726_vm8, 1.0, %v8154_v17  ;;  %v6273_v20 = vsel %vm1730_vm9, 1.0, %v8154_v17 }
 0x388   :  { %8318 = vst [vmem:[#allocation194_spill] sm:$0xff] %v6204_v35  ;;  %v1098_v50 = vpop.xlane.xlu2 %1097  ;;  %v3917_v9 = vpop.eup %3916 }
 0x389   :  { %8319 = vst [vmem:[#allocation209_spill] sm:$0xff] %v6207_v7  ;;  %v1096_v8 = vpop.xlane.xlu1 %1095  ;;  %3924 = vlog2.f32 %v1098_v50  ;;  %v1222_v30 = vmul.f32 0.6931472, %v3917_v9  ;;  %v2208_v16 = vpop.xlane.xlu0 %2207  ;;  %v8339_v9 = vld [vmem:[#allocation70_spill] sm:$0xff] }
 0x38a   :  { %8320 = vst [vmem:[#allocation221_spill] sm:$0xff] %v6210_v29  ;;  %3926 = vlog2.f32 %v1096_v8  ;;  %vm1733_vm12 = vcmp.eq.s32.totalorder %v4778_v39, %v8339_v9  ;;  %v3919_v8 = vpop.eup %3918  ;;  %v8340_v50 = vld [vmem:[#allocation114_spill] sm:$0xff]  ;;  %v2209_v11 = vcvt.f32.s32 %v2208_v16  ;;  %v6279_v9 = vsel %vm1731_vm10, 1.0, %v8154_v17 }
 0x38b   :  { %8321 = vst [vmem:[#allocation188_spill] sm:$0xff] %v6213_v10  ;;  %vm1909_vm13 = vcmp.eq.f32.partialorder %v8341_v42, %v8340_v50  ;;  %3928 = vlog2.f32 %v8342_v58  ;;  %v3921_v40 = vpop.eup %3920  ;;  %v6285_v58 = vsel %vm1729_vm11, 1.0, %v8154_v17  ;;  %v6289_v16 = vsel %vm1733_vm12, 1.0, %v8154_v17 }
 0x38c   :  { %8324 = vst [vmem:[#allocation176_spill] sm:$0xff] %v6219_v46  ;;  %v1234_v49 = vmul.f32 0.6931472, %v3919_v8 }
 0x38d   :  { %8325 = vst [vmem:[#allocation123_spill] sm:$0xff] %v6222_v37 }
 0x38e   :  { %8326 = vst [vmem:[#allocation115_spill] sm:$0xff] %v6225_v12 }
 0x38f   :  { %8332 = vst [vmem:[#allocation105_spill] sm:$0xff] %v6236_v25 }
 0x390   :  { %8336 = vst [vmem:[#allocation41_spill] sm:$0xff] %v6249_v21  ;;  %v8343_v21 = vld [vmem:[#allocation235_spill] sm:$0xff]  ;;  %v2222_v18 = vpop.xlane.xlu2 %2221 }
 0x391   :  { %8337 = vst [vmem:[#allocation110_spill] sm:$0xff] %v6255_v22  ;;  %v1323_v3 = vadd.f32 %v1222_v30, %v8343_v21  ;;  %v2224_v21 = vcvt.f32.s32 %v8163_v0  ;;  %v3923_v30 = vpop.eup %3922  ;;  %v2211_v22 = vshll.u32 %v2210_v31, 16  ;;  %v6299_v0 = vsel %vm1909_vm13, %v4778_v39, 128  ;;  %v6305_v29 = vpop.xlane.xlu0 %1159 }
 0x392   :  { %8338 = vst [vmem:[#allocation45_spill] sm:$0xff] %v6261_v54  ;;  %v3925_v36 = vpop.eup %3924  ;;  %v2223_v54 = vcvt.f32.s32 %v2222_v18 }
 0x393   :  { %8344 = vst [vmem:[#allocation226_spill] sm:$0xff] %v6273_v20  ;;  %v2196_v20 = vcvt.f32.s32 %v8348_v33  ;;  %v1387_v62 = vsub.f32 %v8349_v51, %v1323_v3  ;;  %v3927_v6 = vpop.eup %3926  ;;  %v1226_v33 = vmul.f32 0.6931472, %v3925_v36  ;;  %v2212_v31 = vadd.s32 %v2211_v22, %v2209_v11  ;;  %v2194_v3 = vpop.xlane.xlu1 %2193  ;;  %v8352_v51 = vld [vmem:[#allocation207_spill] sm:$0xff]  ;;  %v8353_v36 = vld [vmem:[#allocation237_spill] sm:$0xff] }
 0x394   :  { %8345 = vst [vmem:[#allocation234_spill] sm:$0xff] %v6279_v9  ;;  %v8350_v9 = vld [vmem:[#allocation198_spill] sm:$0xff]  ;;  %v2225_v8 = vshll.u32 %v2224_v21, 16  ;;  %v3929_v63 = vpop.eup %3928  ;;  %v2195_v10 = vcvt.f32.s32 %v2194_v3 }
 0x395   :  { %8346 = vst [vmem:[#allocation238_spill] sm:$0xff] %v6285_v58  ;;  %3930 = vlog2.f32 %v8350_v9  ;;  %v8351_v58 = vld [vmem:[#allocation201_spill] sm:$0xff]  ;;  %v1224_v9 = vmul.f32 0.6931472, %v3927_v6  ;;  %v2197_v12 = vshll.u32 %v2196_v20, 16  ;;  %v1325_v25 = vadd.f32 %v1226_v33, %v5481_v55 }
 0x396   :  { %8347 = vst [vmem:[#allocation229_spill] sm:$0xff] %v6289_v16  ;;  %3932 = vlog2.f32 %v8351_v58  ;;  %v3181_v16 = vsub.f32 0.0, %v1387_v62  ;;  %v1236_v58 = vmul.f32 0.6931472, %v3921_v40  ;;  %v1238_v62 = vmul.f32 0.6931472, %v3923_v30 }
 0x397   :  { %3934 = vlog2.f32 %v8352_v51  ;;  %v1324_v22 = vadd.f32 %v1224_v9, %v8353_v36  ;;  %v2226_v11 = vadd.s32 %v2225_v8, %v2223_v54  ;;  %v1389_v21 = vsub.f32 %v8142_v14, %v1325_v25  ;;  %v8355_v30 = vld [vmem:[#allocation219_spill] sm:$0xff] }
 0x398   :  { %v3245_v37 = vmul.f32 %v6149_v34, %v3181_v16  ;;  %vm2913_vm14 = vcmp.eq.s32.totalorder %v4778_v39, %v2212_v31  ;;  %v2198_v18 = vadd.s32 %v2197_v12, %v2195_v10  ;;  %v1240_v6 = vmul.f32 0.6931472, %v3929_v63  ;;  %v8354_v16 = vld [vmem:[#allocation178_spill] sm:$0xff]  ;;  %v8356_v31 = vld [vmem:[#allocation48_spill] sm:$0xff]  ;;  %v6325_v8 = vpop.xlane.xlu2 %1163 }
 0x399   :  { %v1388_v51 = vsub.f32 %v8354_v16, %v1324_v22  ;;  %v6312_v55 = vcvt.s32.f32 %v2451_v32  ;;  %v2465_v33 = vand.u32 65535, %v5985_v38  ;;  %3936 = vlog2.f32 %v8355_v30  ;;  %v8357_v63 = vld [vmem:[#allocation116_spill] sm:$0xff] }
 0x39a   :  { %v3308_v46 = vadd.f32 %v6140_v15, %v3245_v37  ;;  %vm2914_vm15 = vcmp.eq.s32.totalorder %v4778_v39, %v2226_v11  ;;  %vm2912_vm0 = vcmp.eq.s32.totalorder %v4778_v39, %v2198_v18  ;;  %v2480_v14 = vshra.s32 %v6299_v0, 16 }
 0x39b   :  { %v3931_v20 = vpop.eup %3930  ;;  %v3183_v15 = vsub.f32 0.0, %v1389_v21  ;;  %v3182_v10 = vsub.f32 0.0, %v1388_v51  ;;  %v3643_v37 = vsel %vm2913_vm14, 1.0, %v8154_v17  ;;  %v3642_v12 = vsel %vm2912_vm0, 1.0, %v8154_v17  ;;  %v6327_v9 = vpop.xlane.xlu1 %1161 }
 0x39c   :  { %v3933_v40 = vpop.eup %3932  ;;  %v1329_v32 = vadd.f32 %v1234_v49, %v8217_v2  ;;  %v1330_v38 = vadd.f32 %v1236_v58, %v8228_v26  ;;  %v1331_v54 = vadd.f32 %v1238_v62, %v8340_v50  ;;  %v3104_v3 = vmul.f32 %v3642_v12, %v8356_v31  ;;  %v8358_v49 = vld [vmem:[#allocation223_spill] sm:$0xff]  ;;  %v8359_v26 = vld [vmem:[#allocation106_spill] sm:$0xff]  ;;  %v1100_v62 = vpop.xlane.xlu0 %1099 }
 0x39d   :  { %v3935_v25 = vpop.eup %3934  ;;  %v1332_v36 = vadd.f32 %v1240_v6, %v8357_v63  ;;  %v1242_v22 = vmul.f32 0.6931472, %v3931_v20  ;;  %v3246_v21 = vmul.f32 %v6152_v23, %v3182_v10  ;;  %v3644_v18 = vsel %vm2914_vm15, 1.0, %v8154_v17  ;;  %v8360_v6 = vld [vmem:[#allocation55_spill] sm:$0xff] }
 0x39e   :  { %v1244_v2 = vmul.f32 0.6931472, %v3933_v40  ;;  %3938 = vlog2.f32 %v8358_v49  ;;  %v3105_v50 = vmul.f32 %v3643_v37, %v8359_v26  ;;  %v3364_v58 = vadd.f32 %v6171_v24, %v3104_v3  ;;  %v8362_v3 = vld [vmem:[#allocation122_spill] sm:$0xff] }
 0x39f   :  { %v1246_v16 = vmul.f32 0.6931472, %v3935_v25  ;;  %v3247_v51 = vmul.f32 %v6167_v53, %v3183_v15  ;;  %v3309_v30 = vadd.f32 %v3308_v46, %v3246_v21  ;;  %3940 = vlog2.f32 %v1100_v62  ;;  %v3937_v20 = vpop.eup %3936  ;;  %v8361_v15 = vld [vmem:[#allocation118_spill] sm:$0xff] }
 0x3a0   :  { %vm1910_vm1 = vcmp.eq.f32.partialorder %v8360_v6, %v8357_v63  ;;  %v1393_v11 = vsub.f32 %v8218_v27, %v1329_v32  ;;  %v3106_v40 = vmul.f32 %v3644_v18, %v5806_v56  ;;  %v3365_v10 = vadd.f32 %v3364_v58, %v3105_v50  ;;  %v8363_v27 = vld [vmem:[#allocation125_spill] sm:$0xff]  ;;  %v8364_v50 = vld [vmem:[#allocation228_spill] sm:$0xff]  ;;  %v8369_v56 = vld [vmem:[#allocation130_spill] sm:$0xff] }
 0x3a1   :  { %v1394_v12 = vsub.f32 %v8229_v4, %v1330_v38  ;;  %v1395_v37 = vsub.f32 %v8341_v42, %v1331_v54  ;;  %v1396_v24 = vsub.f32 %v8360_v6, %v1332_v36  ;;  %v6345_v25 = vadd.f32 %v3309_v30, %v3247_v51  ;;  %v8365_v54 = vld [vmem:[#allocation236_spill] sm:$0xff]  ;;  %v1104_v36 = vpop.xlane.xlu2 %1103 }
 0x3a2   :  { %v1333_v46 = vadd.f32 %v1242_v22, %v8361_v15  ;;  %v1334_v21 = vadd.f32 %v1244_v2, %v8362_v3  ;;  %v6349_v49 = vadd.f32 %v3365_v10, %v3106_v40  ;;  %v6351_v62 = vcvt.s32.f32 %v2465_v33 }
 0x3a3   :  { %v1335_v32 = vadd.f32 %v1246_v16, %v8363_v27  ;;  %v1248_v18 = vmul.f32 0.6931472, %v3937_v20  ;;  %3942 = vlog2.f32 %v8364_v50  ;;  %v2252_v4 = vcvt.f32.s32 %v5734_v47  ;;  %v1102_v58 = vpop.xlane.xlu1 %1101  ;;  %v8366_v47 = vld [vmem:[#allocation58_spill] sm:$0xff] }
 0x3a4   :  { %v3939_v42 = vpop.eup %3938  ;;  %v3187_v38 = vsub.f32 0.0, %v1393_v11  ;;  %3944 = vlog2.f32 %v8365_v54  ;;  %v6357_v22 = vcvt.s32.f32 %v2480_v14  ;;  %v6363_v33 = vsel %vm1910_vm1, %v4778_v39, 128  ;;  %v8367_v11 = vld [vmem:[#allocation63_spill] sm:$0xff]  ;;  %v2250_v50 = vpop.xlane.xlu0 %2249 }
 0x3a5   :  { %v3941_v2 = vpop.eup %3940  ;;  %v3188_v16 = vsub.f32 0.0, %v1394_v12  ;;  %v3189_v51 = vsub.f32 0.0, %v1395_v37  ;;  %v3190_v30 = vsub.f32 0.0, %v1396_v24  ;;  %3946 = vlog2.f32 %v1104_v36  ;;  %v8368_v14 = vld [vmem:[#allocation67_spill] sm:$0xff] }
 0x3a6   :  { %v1397_v20 = vsub.f32 %v8366_v47, %v1333_v46  ;;  %v1398_v40 = vsub.f32 %v8367_v11, %v1334_v21  ;;  %v1228_v10 = vmul.f32 0.6931472, %v3941_v2  ;;  %3948 = vlog2.f32 %v1102_v58 }
 0x3a7   :  { %v1399_v54 = vsub.f32 %v8368_v14, %v1335_v32  ;;  %v6369_v26 = vadd.f32 %v1248_v18, %v8369_v56  ;;  %v2253_v63 = vshll.u32 %v2252_v4, 16  ;;  %v2251_v6 = vcvt.f32.s32 %v2250_v50 }
 0x3a8   :  { %v6372_v31 = vmul.f32 %v6182_v43, %v3187_v38  ;;  %v1250_v12 = vmul.f32 0.6931472, %v3939_v42  ;;  %v1326_v37 = vadd.f32 %v1228_v10, %v8161_v1  ;;  %v6377_v21 = vmul.f32 %v6189_v44, %v3188_v16 }
 0x3a9   :  { %v3943_v46 = vpop.eup %3942  ;;  %v6380_v36 = vmul.f32 %v6207_v7, %v3189_v51  ;;  %v2266_v32 = vcvt.f32.s32 %v5777_v13  ;;  %v2254_v18 = vadd.s32 %v2253_v63, %v2251_v6  ;;  %v6384_v58 = vmul.f32 %v6201_v45, %v3190_v30  ;;  %v8370_v51 = vld [vmem:[#allocation72_spill] sm:$0xff]  ;;  %v8371_v13 = vld [vmem:[#allocation239_spill] sm:$0xff] }
 0x3aa   :  { %v3945_v4 = vpop.eup %3944  ;;  %v6386_v38 = vsub.f32 0.0, %v1397_v20  ;;  %v2238_v1 = vcvt.f32.s32 %v5690_v48  ;;  %v1390_v42 = vsub.f32 %v8162_v41, %v1326_v37  ;;  %v6390_v10 = vsub.f32 0.0, %v1398_v40  ;;  %v8372_v6 = vld [vmem:[#allocation131_spill] sm:$0xff]  ;;  %v2264_v48 = vpop.xlane.xlu2 %2263 }
 0x3ab   :  { %v3947_v2 = vpop.eup %3946  ;;  %v6392_v16 = vsub.f32 0.0, %v1399_v54  ;;  %3950 = vlog2.f32 %v8371_v13  ;;  %v6398_v30 = vadd.f32 %v1250_v12, %v8372_v6  ;;  %v1252_v20 = vmul.f32 0.6931472, %v3943_v46  ;;  %v2236_v7 = vpop.xlane.xlu1 %2235 }
 0x3ac   :  { %v3949_v63 = vpop.eup %3948  ;;  %v3184_v24 = vsub.f32 0.0, %v1390_v42  ;;  %v1232_v45 = vmul.f32 0.6931472, %v3947_v2  ;;  %v1254_v41 = vmul.f32 0.6931472, %v3945_v4  ;;  %v2267_v37 = vshll.u32 %v2266_v32, 16  ;;  %v6402_v13 = vpop.xlane.xlu0 %1165 }
 0x3ad   :  { %v1230_v40 = vmul.f32 0.6931472, %v3949_v63  ;;  %v2265_v44 = vcvt.f32.s32 %v2264_v48  ;;  %v2239_v54 = vshll.u32 %v2238_v1, 16  ;;  %v2237_v53 = vcvt.f32.s32 %v2236_v7  ;;  %v8373_v2 = vld [vmem:[#allocation135_spill] sm:$0xff] }
 0x3ae   :  { %v3248_v43 = vmul.f32 %v6155_v52, %v3184_v24  ;;  %v1328_v50 = vadd.f32 %v1232_v45, %v5715_v19  ;;  %v2409_v46 = vand.u32 65535, %v5889_v57  ;;  %v2395_v42 = vand.u32 65535, %v5915_v28  ;;  %v8374_v45 = vld [vmem:[#allocation141_spill] sm:$0xff]  ;;  %v8375_v63 = vld [vmem:[#allocation151_spill] sm:$0xff]  ;;  %v8377_v57 = vld [vmem:[#allocation18_spill] sm:$0xff] }
 0x3af   :  { %v1327_v12 = vadd.f32 %v1230_v40, %v8170_v60  ;;  %v2268_v23 = vadd.s32 %v2267_v37, %v2265_v44  ;;  %vm2916_vm2 = vcmp.eq.s32.totalorder %v4778_v39, %v2254_v18  ;;  %v2240_v1 = vadd.s32 %v2239_v54, %v2237_v53  ;;  %v8376_v60 = vld [vmem:[#allocation200_spill] sm:$0xff] }
 0x3b0   :  { %v3311_v4 = vadd.f32 %v6345_v25, %v3248_v43  ;;  %v1392_v32 = vsub.f32 %v8172_v59, %v1328_v50  ;;  %v1338_v19 = vadd.f32 %v1252_v20, %v8373_v2  ;;  %v6412_v7 = vadd.f32 %v1254_v41, %v8374_v45  ;;  %v8378_v59 = vld [vmem:[#allocation59_spill] sm:$0xff]  ;;  %v8379_v20 = vld [vmem:[#allocation120_spill] sm:$0xff] }
 0x3b1   :  { %v3951_v24 = vpop.eup %3950  ;;  %3952 = vlog2.f32 %v8375_v63  ;;  %v1391_v44 = vsub.f32 %v8376_v60, %v1327_v12  ;;  %vm2917_vm3 = vcmp.eq.s32.totalorder %v4778_v39, %v2268_v23  ;;  %vm2915_vm4 = vcmp.eq.s32.totalorder %v4778_v39, %v2240_v1  ;;  %v8383_v1 = vld [vmem:[#allocation129_spill] sm:$0xff]  ;;  %v8384_v63 = vld [vmem:[#allocation112_spill] sm:$0xff] }
 0x3b2   :  { %3954 = vlog2.f32 %v8377_v57  ;;  %v2423_v28 = vand.u32 65535, %v8378_v59  ;;  %v3186_v43 = vsub.f32 0.0, %v1392_v32  ;;  %v3646_v25 = vsel %vm2916_vm2, 1.0, %v8154_v17  ;;  %v6423_v41 = vpop.xlane.xlu2 %2413  ;;  %v8382_v32 = vld [vmem:[#allocation66_spill] sm:$0xff] }
 0x3b3   :  { %v3185_v53 = vsub.f32 0.0, %v1391_v44  ;;  %v3645_v18 = vsel %vm2915_vm4, 1.0, %v8154_v17  ;;  %v1256_v50 = vmul.f32 0.6931472, %v3951_v24  ;;  %8380 = vst [vmem:[#allocation25_spill] sm:$0xff] %v6423_v41  ;;  %v6425_v37 = vpop.xlane.xlu1 %2427  ;;  %v2411_v40 = vcvt.s32.f32 %v2409_v46  ;;  %v8386_v59 = vld [vmem:[#allocation174_spill] sm:$0xff] }
 0x3b4   :  { %v3107_v48 = vmul.f32 %v3645_v18, %v8379_v20  ;;  %8381 = vst [vmem:[#allocation230_spill] sm:$0xff] %v6425_v37  ;;  %v2397_v54 = vcvt.s32.f32 %v2395_v42  ;;  %v3647_v12 = vsel %vm2917_vm3, 1.0, %v8154_v17  ;;  %vm2415_vm5 = vcmp.eq.f32.partialorder %v8382_v32, %v6423_v41  ;;  %v6435_v44 = vpop.xlane.xlu0 %2399  ;;  %v8387_v32 = vld [vmem:[#allocation190_spill] sm:$0xff]  ;;  %v8412_v41 = vld [vmem:[#allocation160_spill] sm:$0xff] }
 0x3b5   :  { %v3249_v23 = vmul.f32 %v6164_v61, %v3185_v53  ;;  %vm2429_vm6 = vcmp.eq.f32.partialorder %v8383_v1, %v6425_v37  ;;  %v3108_v24 = vmul.f32 %v3646_v25, %v8384_v63  ;;  %8385 = vst [vmem:[#allocation127_spill] sm:$0xff] %v6435_v44  ;;  %v6437_v57 = vsel %vm2415_vm5, %v2411_v40, inf  ;;  %v8388_v1 = vld [vmem:[#allocation76_spill] sm:$0xff]  ;;  %v8389_v63 = vld [vmem:[#allocation177_spill] sm:$0xff] }
 0x3b6   :  { %v3367_v60 = vadd.f32 %v6349_v49, %v3107_v48  ;;  %v2425_v46 = vcvt.s32.f32 %v2423_v28  ;;  %3956 = vlog2.f32 %v8386_v59  ;;  %v3250_v53 = vmul.f32 %v6198_v5, %v3186_v43  ;;  %v8391_v40 = vld [vmem:[#allocation81_spill] sm:$0xff] }
 0x3b7   :  { %v3953_v42 = vpop.eup %3952  ;;  %v3312_v18 = vadd.f32 %v3311_v4, %v3249_v23  ;;  %vm2401_vm7 = vcmp.eq.f32.partialorder %v8387_v32, %v6435_v44  ;;  %v1401_v25 = vsub.f32 %v8388_v1, %v6398_v30  ;;  %v3109_v49 = vmul.f32 %v3647_v12, %v8389_v63  ;;  %v8393_v4 = vld [vmem:[#allocation142_spill] sm:$0xff]  ;;  %v8394_v44 = vld [vmem:[#allocation71_spill] sm:$0xff]  ;;  %v8395_v12 = vld [vmem:[#allocation85_spill] sm:$0xff] }
 0x3b8   :  { %v3955_v20 = vpop.eup %3954  ;;  %v3368_v48 = vadd.f32 %v3367_v60, %v3108_v24  ;;  %v6446_v61 = vsel %vm2429_vm6, %v2425_v46, inf  ;;  %v3255_v28 = vmul.f32 %v6204_v35, %v6386_v38  ;;  %v1402_v59 = vsub.f32 %v8391_v40, %v1338_v19  ;;  %v8396_v46 = vld [vmem:[#allocation169_spill] sm:$0xff]  ;;  %v8397_v19 = vld [vmem:[#allocation176_spill] sm:$0xff] }
 0x3b9   :  { %8390 = vst [vmem:[#allocation233_spill] sm:$0xff] %v6446_v61  ;;  %v3313_v52 = vadd.f32 %v3312_v18, %v3250_v53  ;;  %v6451_v43 = vsel %vm2401_vm7, %v2397_v54, inf  ;;  %v1340_v23 = vadd.f32 %v1256_v50, %v8393_v4  ;;  %v1258_v32 = vmul.f32 0.6931472, %v3953_v42  ;;  %v8398_v54 = vld [vmem:[#allocation221_spill] sm:$0xff]  ;;  %v8410_v61 = vld [vmem:[#allocation188_spill] sm:$0xff] }
 0x3ba   :  { %8392 = vst [vmem:[#allocation243_spill] sm:$0xff] %v6451_v43  ;;  %v6454_v5 = vadd.f32 %v3368_v48, %v3109_v49  ;;  %v2437_v30 = vand.u32 65535, %v8394_v44  ;;  %v1403_v24 = vsub.f32 %v8395_v12, %v6412_v7  ;;  %v1260_v60 = vmul.f32 0.6931472, %v3955_v20  ;;  %v6468_v44 = vpop.xlane.xlu2 %2455  ;;  %v8405_v35 = vld [vmem:[#allocation153_spill] sm:$0xff]  ;;  %v8418_v4 = vld [vmem:[#allocation62_spill] sm:$0xff] }
 0x3bb   :  { %3958 = vlog2.f32 %v8396_v46  ;;  %v3314_v38 = vadd.f32 %v3313_v52, %v6372_v31  ;;  %v3256_v53 = vmul.f32 %v8397_v19, %v6390_v10  ;;  %v3257_v18 = vmul.f32 %v8398_v54, %v6392_v16  ;;  %v6470_v48 = vpop.xlane.xlu1 %1167  ;;  %v8400_v46 = vld [vmem:[#allocation179_spill] sm:$0xff]  ;;  %v8401_v31 = vld [vmem:[#allocation138_spill] sm:$0xff]  ;;  %v8402_v10 = vld [vmem:[#allocation89_spill] sm:$0xff] }
 0x3bc   :  { %v8399_v50 = vsub.f32 %v8370_v51, %v6369_v26  ;;  %v3195_v49 = vsub.f32 0.0, %v1401_v25  ;;  %v3957_v7 = vpop.eup %3956  ;;  %v3196_v20 = vsub.f32 0.0, %v1402_v59  ;;  %3960 = vlog2.f32 %v8400_v46  ;;  %v8403_v54 = vld [vmem:[#allocation146_spill] sm:$0xff]  ;;  %v6478_v26 = vpop.xlane.xlu0 %2441  ;;  %v8406_v46 = vld [vmem:[#allocation23_spill] sm:$0xff] }
 0x3bd   :  { %v3315_v52 = vadd.f32 %v3314_v38, %v6377_v21  ;;  %vm2457_vm8 = vcmp.eq.f32.partialorder %v8401_v31, %v6468_v44  ;;  %v1404_v16 = vsub.f32 %v8402_v10, %v1340_v23  ;;  %v1341_v63 = vadd.f32 %v1258_v32, %v8403_v54  ;;  %8404 = vst [vmem:[#allocation242_spill] sm:$0xff] %v6478_v26  ;;  %v8407_v38 = vld [vmem:[#allocation52_spill] sm:$0xff] }
 0x3be   :  { %v3194_v42 = vsub.f32 0.0, %v8399_v50  ;;  %v2458_v25 = vsel %vm2457_vm8, %v6312_v55, inf  ;;  %v2439_v50 = vcvt.s32.f32 %v2437_v30  ;;  %v3197_v19 = vsub.f32 0.0, %v1403_v24  ;;  %v8408_v23 = vld [vmem:[#allocation128_spill] sm:$0xff]  ;;  %v8411_v30 = vld [vmem:[#allocation105_spill] sm:$0xff] }
 0x3bf   :  { %v1342_v37 = vadd.f32 %v1260_v60, %v8405_v35  ;;  %v3316_v59 = vadd.f32 %v3315_v52, %v6380_v36  ;;  %vm2443_vm9 = vcmp.eq.f32.partialorder %v8406_v46, %v6478_v26  ;;  %2459 = vmin.xlane.f32.xlu0 %v2458_v25  ;;  %v1262_v21 = vmul.f32 0.6931472, %v3957_v7  ;;  %v8413_v60 = vld [vmem:[#allocation123_spill] sm:$0xff]  ;;  %v8414_v25 = vld [vmem:[#allocation94_spill] sm:$0xff]  ;;  %v8415_v26 = vld [vmem:[#allocation121_spill] sm:$0xff] }
 0x3c0   :  { %v2280_v31 = vcvt.f32.s32 %v8407_v38  ;;  %v2308_v34 = vcvt.f32.s32 %v8408_v23  ;;  %v6487_v32 = vsel %vm2443_vm9, %v2439_v50, inf  ;;  %v3258_v55 = vmul.f32 %v8410_v61, %v3194_v42  ;;  %v8416_v23 = vld [vmem:[#allocation115_spill] sm:$0xff] }
 0x3c1   :  { %8409 = vst [vmem:[#allocation193_spill] sm:$0xff] %v6487_v32  ;;  %v3959_v43 = vpop.eup %3958  ;;  %v3259_v24 = vmul.f32 %v8411_v30, %v3195_v49  ;;  %3962 = vlog2.f32 %v8412_v41  ;;  %v3317_v36 = vadd.f32 %v3316_v59, %v6384_v58  ;;  %v3260_v52 = vmul.f32 %v8413_v60, %v3196_v20  ;;  %v8417_v32 = vld [vmem:[#allocation98_spill] sm:$0xff]  ;;  %v8419_v49 = vld [vmem:[#allocation157_spill] sm:$0xff] }
 0x3c2   :  { %v3198_v46 = vsub.f32 0.0, %v1404_v16  ;;  %v1405_v7 = vsub.f32 %v8414_v25, %v1341_v63  ;;  %v2294_v38 = vcvt.f32.s32 %v8415_v26  ;;  %v3961_v54 = vpop.eup %3960  ;;  %v3261_v50 = vmul.f32 %v8416_v23, %v3197_v19  ;;  %v2306_v59 = vpop.xlane.xlu2 %2305  ;;  %v8420_v16 = vld [vmem:[#allocation137_spill] sm:$0xff] }
 0x3c3   :  { %v1406_v10 = vsub.f32 %v8417_v32, %v1342_v37  ;;  %3964 = vlog2.f32 %v8418_v4  ;;  %v3318_v42 = vadd.f32 %v3317_v36, %v3255_v28  ;;  %v1343_v30 = vadd.f32 %v1262_v21, %v8419_v49  ;;  %v2278_v20 = vpop.xlane.xlu1 %2277  ;;  %v8421_v25 = vld [vmem:[#allocation45_spill] sm:$0xff]  ;;  %v8422_v28 = vld [vmem:[#allocation78_spill] sm:$0xff] }
 0x3c4   :  { %v1264_v41 = vmul.f32 0.6931472, %v3959_v43  ;;  %v2281_v61 = vshll.u32 %v2280_v31, 16  ;;  %v2309_v58 = vshll.u32 %v2308_v34, 16  ;;  %3966 = vlog2.f32 %v8420_v16  ;;  %v2292_v2 = vpop.xlane.xlu0 %2291  ;;  %v8429_v16 = vld [vmem:[#allocation173_spill] sm:$0xff] }
 0x3c5   :  { %v3319_v63 = vadd.f32 %v3318_v42, %v3256_v53  ;;  %v2307_v60 = vcvt.f32.s32 %v2306_v59  ;;  %v2279_v26 = vcvt.f32.s32 %v2278_v20  ;;  %v3262_v40 = vmul.f32 %v8421_v25, %v3198_v46  ;;  %v8423_v53 = vld [vmem:[#allocation104_spill] sm:$0xff]  ;;  %v8424_v59 = vld [vmem:[#allocation162_spill] sm:$0xff] }
 0x3c6   :  { %v3199_v19 = vsub.f32 0.0, %v1405_v7  ;;  %v1266_v23 = vmul.f32 0.6931472, %v3961_v54  ;;  %v2295_v37 = vshll.u32 %v2294_v38, 16  ;;  %vm1734_vm10 = vcmp.eq.s32.totalorder %v4778_v39, %v8422_v28  ;;  %v8425_v46 = vld [vmem:[#allocation192_spill] sm:$0xff] }
 0x3c7   :  { %v3963_v4 = vpop.eup %3962  ;;  %v3320_v43 = vadd.f32 %v3319_v63, %v3257_v18  ;;  %v2310_v21 = vadd.s32 %v2309_v58, %v2307_v60  ;;  %v2282_v34 = vadd.s32 %v2281_v61, %v2279_v26  ;;  %v2293_v31 = vcvt.f32.s32 %v2292_v2  ;;  %2483 = vmin.xlane.f32.xlu0 %v6357_v22  ;;  %v8426_v60 = vld [vmem:[#allocation167_spill] sm:$0xff]  ;;  %v8427_v2 = vld [vmem:[#allocation84_spill] sm:$0xff] }
 0x3c8   :  { %v3200_v36 = vsub.f32 0.0, %v1406_v10  ;;  %v1407_v42 = vsub.f32 %v8423_v53, %v1343_v30  ;;  %v1344_v20 = vadd.f32 %v1264_v41, %v8424_v59  ;;  %3968 = vlog2.f32 %v8425_v46  ;;  %v8428_v30 = vld [vmem:[#allocation152_spill] sm:$0xff]  ;;  %v8451_v59 = vld [vmem:[#allocation119_spill] sm:$0xff] }
 0x3c9   :  { %v3965_v54 = vpop.eup %3964  ;;  %v3321_v7 = vadd.f32 %v3320_v43, %v3258_v55  ;;  %vm2920_vm11 = vcmp.eq.s32.totalorder %v4778_v39, %v2310_v21  ;;  %vm2918_vm12 = vcmp.eq.s32.totalorder %v4778_v39, %v2282_v34  ;;  %v2296_v38 = vadd.s32 %v2295_v37, %v2293_v31  ;;  %v8430_v26 = vld [vmem:[#allocation148_spill] sm:$0xff] }
 0x3ca   :  { %v1268_v18 = vmul.f32 0.6931472, %v3963_v4  ;;  %v1345_v61 = vadd.f32 %v1266_v23, %v8426_v60  ;;  %3970 = vlog2.f32 %v8427_v2  ;;  %v3648_v10 = vsel %vm2918_vm12, 1.0, %v8154_v17  ;;  %v3967_v58 = vpop.eup %3966  ;;  %v8432_v34 = vld [vmem:[#allocation140_spill] sm:$0xff] }
 0x3cb   :  { %3972 = vlog2.f32 %v8428_v30  ;;  %v3322_v41 = vadd.f32 %v3321_v7, %v3259_v24  ;;  %v3110_v63 = vmul.f32 %v3648_v10, %v8429_v16  ;;  %vm2919_vm13 = vcmp.eq.s32.totalorder %v4778_v39, %v2296_v38  ;;  %v6519_v23 = vpop.xlane.xlu1 %2469  ;;  %v8433_v24 = vld [vmem:[#allocation147_spill] sm:$0xff] }
 0x3cc   :  { %v1270_v55 = vmul.f32 0.6931472, %v3965_v54  ;;  %3974 = vlog2.f32 %v8430_v26  ;;  %v3650_v37 = vsel %vm2920_vm11, 1.0, %v8154_v17  ;;  %v3649_v4 = vsel %vm2919_vm13, 1.0, %v8154_v17  ;;  %8431 = vst [vmem:[#allocation203_spill] sm:$0xff] %v6519_v23  ;;  %v8434_v7 = vld [vmem:[#allocation107_spill] sm:$0xff] }
 0x3cd   :  { %v3323_v43 = vadd.f32 %v3322_v41, %v3260_v52  ;;  %v3370_v21 = vadd.f32 %v6454_v5, %v3110_v63  ;;  %v3111_v31 = vmul.f32 %v3649_v4, %v8432_v34  ;;  %vm2471_vm14 = vcmp.eq.f32.partialorder %v8433_v24, %v6519_v23  ;;  %v8435_v54 = vld [vmem:[#allocation181_spill] sm:$0xff]  ;;  %v8436_v26 = vld [vmem:[#allocation26_spill] sm:$0xff]  ;;  %v8437_v16 = vld [vmem:[#allocation195_spill] sm:$0xff] }
 0x3ce   :  { %v3969_v46 = vpop.eup %3968  ;;  %v1408_v38 = vsub.f32 %v8434_v7, %v1344_v20  ;;  %v1346_v2 = vadd.f32 %v1268_v18, %v8435_v54  ;;  %v1272_v10 = vmul.f32 0.6931472, %v3967_v58  ;;  %v2472_v30 = vsel %vm2471_vm14, %v6351_v62, inf  ;;  %v8438_v5 = vld [vmem:[#allocation161_spill] sm:$0xff]  ;;  %v8440_v23 = vld [vmem:[#allocation111_spill] sm:$0xff]  ;;  %v8442_v62 = vld [vmem:[#allocation182_spill] sm:$0xff] }
 0x3cf   :  { %3976 = vlog2.f32 %v8436_v26  ;;  %v3324_v25 = vadd.f32 %v3323_v43, %v3261_v50  ;;  %v3112_v52 = vmul.f32 %v3650_v37, %v8437_v16  ;;  %v3371_v41 = vadd.f32 %v3370_v21, %v3111_v31  ;;  %2333 = vmin.xlane.f32.xlu0 %v8438_v5  ;;  %2473 = vmin.xlane.f32.xlu2 %v2472_v30  ;;  %v8439_v4 = vld [vmem:[#allocation41_spill] sm:$0xff] }
 0x3d0   :  { %v3971_v63 = vpop.eup %3970  ;;  %v3263_v24 = vmul.f32 %v8439_v4, %v3199_v19  ;;  %v3201_v34 = vsub.f32 0.0, %v1407_v42  ;;  %v1409_v20 = vsub.f32 %v8440_v23, %v1345_v61  ;;  %v8441_v7 = vld [vmem:[#allocation185_spill] sm:$0xff]  ;;  %v1274_v54 = vmul.f32 0.6931472, %v3969_v46  ;;  %v8444_v19 = vld [vmem:[#allocation79_spill] sm:$0xff]  ;;  %v8445_v42 = vld [vmem:[#allocation110_spill] sm:$0xff] }
 0x3d1   :  { %v1347_v18 = vadd.f32 %v1270_v55, %v8441_v7  ;;  %v3973_v58 = vpop.eup %3972  ;;  %3978 = vlog2.f32 %v8442_v62  ;;  %v3325_v26 = vadd.f32 %v3324_v25, %v3262_v40  ;;  %v6535_v50 = vadd.f32 %v3371_v41, %v3112_v52  ;;  %v8446_v21 = vld [vmem:[#allocation117_spill] sm:$0xff]  ;;  %v8448_v52 = vld [vmem:[#allocation238_spill] sm:$0xff] }
 0x3d2   :  { %v3975_v37 = vpop.eup %3974  ;;  %v6541_v43 = vsel %vm1734_vm10, 1.0, %v8154_v17  ;;  %vm1732_vm15 = vcmp.eq.s32.totalorder %v4778_v39, %v8444_v19  ;;  %v3264_v61 = vmul.f32 %v8445_v42, %v3200_v36  ;;  %v3202_v55 = vsub.f32 0.0, %v1408_v38  ;;  %v8447_v46 = vld [vmem:[#allocation189_spill] sm:$0xff]  ;;  %v8452_v38 = vld [vmem:[#allocation202_spill] sm:$0xff]  ;;  %v8462_v19 = vld [vmem:[#allocation224_spill] sm:$0xff] }
 0x3d3   :  { %8443 = vst [vmem:[#allocation126_spill] sm:$0xff] %v6541_v43  ;;  %v1410_v31 = vsub.f32 %v8446_v21, %v1346_v2  ;;  %v1348_v30 = vadd.f32 %v1272_v10, %v8447_v46  ;;  %v1276_v40 = vmul.f32 0.6931472, %v3971_v63  ;;  %v3326_v25 = vadd.f32 %v3325_v26, %v3263_v24  ;;  %v8449_v62 = vld [vmem:[#allocation205_spill] sm:$0xff]  ;;  %v8454_v10 = vld [vmem:[#allocation226_spill] sm:$0xff]  ;;  %v8455_v26 = vld [vmem:[#allocation124_spill] sm:$0xff] }
 0x3d4   :  { %v3265_v41 = vmul.f32 %v8448_v52, %v3201_v34  ;;  %v1278_v5 = vmul.f32 0.6931472, %v3973_v58  ;;  %3980 = vlog2.f32 %v8449_v62  ;;  %v8450_v28 = vshra.s32 %v6363_v33, 16  ;;  %v8453_v21 = vld [vmem:[#allocation77_spill] sm:$0xff] }
 0x3d5   :  { %v3977_v16 = vpop.eup %3976  ;;  %v3203_v7 = vsub.f32 0.0, %v1409_v20  ;;  %v1411_v36 = vsub.f32 %v8451_v59, %v1347_v18  ;;  %v1349_v42 = vadd.f32 %v1274_v54, %v8452_v38  ;;  %v3327_v2 = vadd.f32 %v3326_v25, %v3264_v61  ;;  %v8458_v18 = vld [vmem:[#allocation211_spill] sm:$0xff] }
 0x3d6   :  { %v6552_v4 = vcvt.s32.f32 %v8450_v28  ;;  %vm1736_vm0 = vcmp.eq.s32.totalorder %v4778_v39, %v8453_v21  ;;  %v3266_v63 = vmul.f32 %v8454_v10, %v3202_v55  ;;  %v1280_v34 = vmul.f32 0.6931472, %v3975_v37  ;;  %v8456_v28 = vld [vmem:[#allocation206_spill] sm:$0xff]  ;;  %v8466_v21 = vld [vmem:[#allocation227_spill] sm:$0xff] }
 0x3d7   :  { %3982 = vlog2.f32 %v6305_v29  ;;  %v3979_v24 = vpop.eup %3978  ;;  %v3204_v58 = vsub.f32 0.0, %v1410_v31  ;;  %v1412_v62 = vsub.f32 %v8455_v26, %v1348_v30  ;;  %v1350_v52 = vadd.f32 %v1276_v40, %v8456_v28  ;;  %v8459_v29 = vld [vmem:[#allocation234_spill] sm:$0xff] }
 0x3d8   :  { %v3328_v20 = vadd.f32 %v3327_v2, %v3265_v41  ;;  %2497 = vmin.xlane.f32.xlu2 %v6552_v4  ;;  %v6567_v54 = vsel %vm1732_vm15, 1.0, %v8154_v17  ;;  %v1351_v61 = vadd.f32 %v1278_v5, %v8458_v18  ;;  %v1282_v37 = vmul.f32 0.6931472, %v3977_v16  ;;  %v8460_v30 = vld [vmem:[#allocation134_spill] sm:$0xff] }
 0x3d9   :  { %8457 = vst [vmem:[#allocation218_spill] sm:$0xff] %v6567_v54  ;;  %3984 = vlog2.f32 %v6327_v9  ;;  %v3267_v55 = vmul.f32 %v8459_v29, %v3203_v7  ;;  %v3205_v31 = vsub.f32 0.0, %v1411_v36  ;;  %v1413_v25 = vsub.f32 %v8460_v30, %v1349_v42  ;;  %v8463_v7 = vld [vmem:[#allocation139_spill] sm:$0xff] }
 0x3da   :  { %v3329_v40 = vadd.f32 %v3328_v20, %v3266_v63  ;;  %v3981_v41 = vpop.eup %3980  ;;  %v6577_v2 = vsel %vm1736_vm0, 1.0, %v8154_v17  ;;  %v1352_v10 = vadd.f32 %v1280_v34, %v8462_v19  ;;  %v1284_v38 = vmul.f32 0.6931472, %v3979_v24  ;;  %v8464_v63 = vld [vmem:[#allocation86_spill] sm:$0xff]  ;;  %v8465_v20 = vld [vmem:[#allocation144_spill] sm:$0xff]  ;;  %v8467_v34 = vld [vmem:[#allocation229_spill] sm:$0xff] }
 0x3db   :  { %8461 = vst [vmem:[#allocation29_spill] sm:$0xff] %v6577_v2  ;;  %3986 = vlog2.f32 %v6325_v8  ;;  %v3268_v9 = vmul.f32 %v6567_v54, %v3204_v58  ;;  %v3206_v16 = vsub.f32 0.0, %v1412_v62  ;;  %v1414_v5 = vsub.f32 %v8463_v7, %v1350_v52  ;;  %v8468_v62 = vld [vmem:[#allocation83_spill] sm:$0xff]  ;;  %v8471_v7 = vld [vmem:[#allocation88_spill] sm:$0xff] }
 0x3dc   :  { %v3330_v36 = vadd.f32 %v3329_v40, %v3267_v55  ;;  %vm1735_vm1 = vcmp.eq.s32.totalorder %v4778_v39, %v8464_v63  ;;  %v1415_v29 = vsub.f32 %v8465_v20, %v1351_v61  ;;  %v1353_v30 = vadd.f32 %v1282_v37, %v8466_v21  ;;  %v8469_v52 = vld [vmem:[#allocation159_spill] sm:$0xff]  ;;  %v8470_v40 = vld [vmem:[#allocation232_spill] sm:$0xff]  ;;  %v8477_v63 = vld [vmem:[#allocation82_spill] sm:$0xff] }
 0x3dd   :  { %v3983_v42 = vpop.eup %3982  ;;  %3988 = vlog2.f32 %v6402_v13  ;;  %v3269_v24 = vmul.f32 %v8467_v34, %v3205_v31  ;;  %v3207_v19 = vsub.f32 0.0, %v1413_v25  ;;  %v1286_v8 = vmul.f32 0.6931472, %v3981_v41  ;;  %v8473_v41 = vld [vmem:[#allocation91_spill] sm:$0xff] }
 0x3de   :  { %v3331_v28 = vadd.f32 %v3330_v36, %v3268_v9  ;;  %vm1737_vm2 = vcmp.eq.s32.totalorder %v4778_v39, %v8468_v62  ;;  %v1416_v55 = vsub.f32 %v8469_v52, %v1352_v10  ;;  %v1354_v54 = vadd.f32 %v1284_v38, %v8470_v40  ;;  %v8474_v10 = vld [vmem:[#allocation164_spill] sm:$0xff] }
 0x3df   :  { %v3985_v58 = vpop.eup %3984  ;;  %3990 = vlog2.f32 %v6470_v48  ;;  %v3270_v61 = vmul.f32 %v6541_v43, %v3206_v16  ;;  %v3208_v37 = vsub.f32 0.0, %v1414_v5  ;;  %v1288_v21 = vmul.f32 0.6931472, %v3983_v42  ;;  %v8475_v16 = vld [vmem:[#allocation240_spill] sm:$0xff] }
 0x3e0   :  { %v3332_v13 = vadd.f32 %v3331_v28, %v3269_v24  ;;  %2347 = vmin.xlane.f32.xlu2 %v8471_v7  ;;  %v6600_v25 = vsel %vm1735_vm1, 1.0, %v8154_v17  ;;  %vm1738_vm3 = vcmp.eq.s32.totalorder %v4778_v39, %v8473_v41  ;;  %v3209_v38 = vsub.f32 0.0, %v1415_v29  ;;  %v8478_v29 = vld [vmem:[#allocation170_spill] sm:$0xff] }
 0x3e1   :  { %v3987_v31 = vpop.eup %3986  ;;  %8472 = vst [vmem:[#allocation136_spill] sm:$0xff] %v6600_v25  ;;  %v1417_v48 = vsub.f32 %v8474_v10, %v1353_v30  ;;  %v3271_v9 = vmul.f32 %v6600_v25, %v3207_v19  ;;  %v1355_v5 = vadd.f32 %v1286_v8, %v8475_v16  ;;  %v1290_v28 = vmul.f32 0.6931472, %v3985_v58  ;;  %v8479_v19 = vld [vmem:[#allocation133_spill] sm:$0xff]  ;;  %v8486_v10 = vld [vmem:[#allocation35_spill] sm:$0xff] }
 0x3e2   :  { %v3333_v36 = vadd.f32 %v3332_v13, %v3270_v61  ;;  %v6611_v42 = vsel %vm1737_vm2, 1.0, %v8154_v17  ;;  %vm1739_vm4 = vcmp.eq.s32.totalorder %v4778_v39, %v8477_v63  ;;  %v3210_v24 = vsub.f32 0.0, %v1416_v55  ;;  %v8480_v13 = vld [vmem:[#allocation90_spill] sm:$0xff] }
 0x3e3   :  { %v3989_v7 = vpop.eup %3988  ;;  %8476 = vst [vmem:[#allocation210_spill] sm:$0xff] %v6611_v42  ;;  %v1418_v43 = vsub.f32 %v8478_v29, %v1354_v54  ;;  %v3272_v30 = vmul.f32 %v6577_v2, %v3208_v37  ;;  %v1356_v25 = vadd.f32 %v1288_v21, %v8479_v19  ;;  %v1292_v8 = vmul.f32 0.6931472, %v3987_v31  ;;  %v8482_v54 = vld [vmem:[#allocation183_spill] sm:$0xff]  ;;  %v8483_v37 = vld [vmem:[#allocation145_spill] sm:$0xff] }
 0x3e4   :  { %v3334_v58 = vadd.f32 %v3333_v36, %v3271_v9  ;;  %vm1740_vm5 = vcmp.eq.s32.totalorder %v4778_v39, %v8480_v13  ;;  %v6624_v62 = vsel %vm1738_vm3, 1.0, %v8154_v17  ;;  %v3273_v55 = vmul.f32 %v6611_v42, %v3209_v38  ;;  %v8485_v13 = vld [vmem:[#allocation187_spill] sm:$0xff] }
 0x3e5   :  { %v3991_v61 = vpop.eup %3990  ;;  %8481 = vst [vmem:[#allocation215_spill] sm:$0xff] %v6624_v62  ;;  %v3211_v34 = vsub.f32 0.0, %v1417_v48  ;;  %v1419_v16 = vsub.f32 %v8482_v54, %v1355_v5  ;;  %v1357_v2 = vadd.f32 %v1290_v28, %v8483_v37  ;;  %v1294_v31 = vmul.f32 0.6931472, %v3989_v7  ;;  %v8488_v28 = vld [vmem:[#allocation96_spill] sm:$0xff] }
 0x3e6   :  { %v3335_v21 = vadd.f32 %v3334_v58, %v3272_v30  ;;  %v6633_v9 = vsel %vm1739_vm4, 1.0, %v8154_v17  ;;  %v3274_v36 = vmul.f32 %v6624_v62, %v3210_v24  ;;  %v3212_v41 = vsub.f32 0.0, %v1418_v43  ;;  %v8489_v30 = vld [vmem:[#allocation191_spill] sm:$0xff]  ;;  %v8490_v24 = vld [vmem:[#allocation38_spill] sm:$0xff] }
 0x3e7   :  { %8484 = vst [vmem:[#allocation199_spill] sm:$0xff] %v6633_v9  ;;  %v1420_v52 = vsub.f32 %v8485_v13, %v1356_v25  ;;  %v1358_v38 = vadd.f32 %v1292_v8, %v8486_v10  ;;  %v1296_v42 = vmul.f32 0.6931472, %v3991_v61  ;;  %v6639_v5 = vsel %vm1740_vm5, 1.0, %v8154_v17  ;;  %v8491_v62 = vld [vmem:[#allocation87_spill] sm:$0xff]  ;;  %v8492_v61 = vld [vmem:[#allocation204_spill] sm:$0xff] }
 0x3e8   :  { %v3336_v48 = vadd.f32 %v3335_v21, %v3273_v55  ;;  %8487 = vst [vmem:[#allocation143_spill] sm:$0xff] %v6639_v5  ;;  %vm1741_vm6 = vcmp.eq.s32.totalorder %v4778_v39, %v8488_v28  ;;  %v3275_v7 = vmul.f32 %v6633_v9, %v3211_v34  ;;  %v3213_v63 = vsub.f32 0.0, %v1419_v16  ;;  %v8493_v10 = vld [vmem:[#allocation108_spill] sm:$0xff]  ;;  %v8494_v28 = vld [vmem:[#allocation95_spill] sm:$0xff]  ;;  %v8541_v9 = vld [vmem:[#allocation134_spill] sm:$0xff] }
 0x3e9   :  { %v1421_v58 = vsub.f32 %v8489_v30, %v1357_v2  ;;  %v1359_v43 = vadd.f32 %v1294_v31, %v8490_v24  ;;  %vm1742_vm7 = vcmp.eq.s32.totalorder %v4778_v39, %v8491_v62  ;;  %v3276_v25 = vmul.f32 %v6639_v5, %v3212_v41  ;;  %v8540_v5 = vld [vmem:[#allocation202_spill] sm:$0xff] }
 0x3ea   :  { %v3337_v37 = vadd.f32 %v3336_v48, %v3274_v36  ;;  %v3214_v8 = vsub.f32 0.0, %v1420_v52  ;;  %v1422_v55 = vsub.f32 %v8492_v61, %v1358_v38  ;;  %v1360_v54 = vadd.f32 %v1296_v42, %v8493_v10  ;;  %v8496_v36 = vld [vmem:[#allocation208_spill] sm:$0xff]  ;;  %v8498_v52 = vld [vmem:[#allocation101_spill] sm:$0xff]  ;;  %v8499_v48 = vld [vmem:[#allocation222_spill] sm:$0xff] }
 0x3eb   :  { %vm1743_vm8 = vcmp.eq.s32.totalorder %v4778_v39, %v8494_v28  ;;  %v6654_v34 = vsel %vm1741_vm6, 1.0, %v8154_v17  ;;  %v3215_v16 = vsub.f32 0.0, %v1421_v58  ;;  %v1423_v62 = vsub.f32 %v8496_v36, %v1359_v43 }
 0x3ec   :  { %v3338_v21 = vadd.f32 %v3337_v37, %v3275_v7  ;;  %8495 = vst [vmem:[#allocation155_spill] sm:$0xff] %v6654_v34  ;;  %v3277_v2 = vmul.f32 %v6654_v34, %v3213_v63  ;;  %v6659_v41 = vsel %vm1742_vm7, 1.0, %v8154_v17  ;;  %vm1744_vm9 = vcmp.eq.s32.totalorder %v4778_v39, %v8498_v52  ;;  %v8501_v63 = vld [vmem:[#allocation92_spill] sm:$0xff] }
 0x3ed   :  { %8497 = vst [vmem:[#allocation132_spill] sm:$0xff] %v6659_v41  ;;  %v3278_v42 = vmul.f32 %v6659_v41, %v3214_v8  ;;  %v3216_v37 = vsub.f32 0.0, %v1422_v55  ;;  %v1424_v7 = vsub.f32 %v8499_v48, %v1360_v54  ;;  %v6666_v28 = vsel %vm1743_vm8, 1.0, %v8154_v17  ;;  %v8503_v52 = vld [vmem:[#allocation100_spill] sm:$0xff] }
 0x3ee   :  { %v3339_v31 = vadd.f32 %v3338_v21, %v3276_v25  ;;  %8500 = vst [vmem:[#allocation33_spill] sm:$0xff] %v6666_v28  ;;  %vm1745_vm10 = vcmp.eq.s32.totalorder %v4778_v39, %v8501_v63  ;;  %v3279_v58 = vmul.f32 %v6666_v28, %v3215_v16  ;;  %v3217_v25 = vsub.f32 0.0, %v1423_v62 }
 0x3ef   :  { %v6672_v21 = vsel %vm1744_vm9, 1.0, %v8154_v17  ;;  %vm1746_vm11 = vcmp.eq.s32.totalorder %v4778_v39, %v8503_v52  ;;  %v3218_v54 = vsub.f32 0.0, %v1424_v7  ;;  %v2462_v52 = vcvt.f32.s32 %v6468_v44 }
 0x3f0   :  { %v3340_v38 = vadd.f32 %v3339_v31, %v3277_v2  ;;  %8502 = vst [vmem:[#allocation150_spill] sm:$0xff] %v6672_v21  ;;  %v3280_v8 = vmul.f32 %v6672_v21, %v3216_v37  ;;  %v6678_v2 = vsel %vm1745_vm10, 1.0, %v8154_v17  ;;  %v6682_v16 = vsel %vm1746_vm11, 1.0, %v8154_v17 }
 0x3f1   :  { %8504 = vst [vmem:[#allocation12_spill] sm:$0xff] %v6678_v2  ;;  %v3281_v63 = vmul.f32 %v6678_v2, %v3217_v25  ;;  %v2463_v37 = vshll.u32 %v2462_v52, 16  ;;  %vm1911_vm13 = vcmp.eq.f32.partialorder %v8366_v47, %v8361_v15  ;;  %vm1912_vm14 = vcmp.eq.f32.partialorder %v8367_v11, %v8362_v3  ;;  %v8508_v11 = vld [vmem:[#allocation24_spill] sm:$0xff] }
 0x3f2   :  { %v3341_v43 = vadd.f32 %v3340_v38, %v3278_v42  ;;  %8505 = vst [vmem:[#allocation19_spill] sm:$0xff] %v6682_v16  ;;  %v3282_v42 = vmul.f32 %v6682_v16, %v3218_v54  ;;  %v6700_v44 = vsel %vm1911_vm13, %v4778_v39, 128  ;;  %vm1914_vm0 = vcmp.eq.f32.partialorder %v8370_v51, %v8369_v56 }
 0x3f3   :  { %v6724_v3 = vsel %vm1914_vm0, %v4778_v39, 128  ;;  %vm1917_vm1 = vcmp.eq.f32.partialorder %v8395_v12, %v8374_v45  ;;  %vm1920_vm2 = vcmp.eq.f32.partialorder %v8417_v32, %v8405_v35  ;;  %vm1923_vm3 = vcmp.eq.f32.partialorder %v8440_v23, %v8426_v60 }
 0x3f4   :  { %v3342_v55 = vadd.f32 %v3341_v43, %v3279_v58  ;;  %v2479_v43 = vand.u32 65535, %v6299_v0  ;;  %v2493_v0 = vand.u32 65535, %v6363_v33  ;;  %v6743_v51 = vsel %vm1920_vm2, %v4778_v39, 128 }
 0x3f5   :  { %v2634_v45 = vshra.s32 %v6743_v51, 16  ;;  %vm1926_vm4 = vcmp.eq.f32.partialorder %v8455_v26, %v8447_v46  ;;  %vm1929_vm5 = vcmp.eq.f32.partialorder %v8465_v20, %v8458_v18  ;;  %vm1932_vm6 = vcmp.eq.f32.partialorder %v8478_v29, %v8470_v40 }
 0x3f6   :  { %v3343_v31 = vadd.f32 %v3342_v55, %v3280_v8  ;;  %v2481_v25 = vcvt.s32.f32 %v2479_v43  ;;  %v6752_v43 = vsel %vm1923_vm3, %v4778_v39, 128  ;;  %v6770_v23 = vsel %vm1929_vm5, %v4778_v39, 128 }
 0x3f7   :  { %v6749_v12 = vcvt.s32.f32 %v2634_v45  ;;  %v2760_v46 = vshra.s32 %v6770_v23, 16  ;;  %vm1934_vm7 = vcmp.eq.f32.partialorder %v8485_v13, %v8479_v19  ;;  %vm1913_vm11 = vcmp.eq.f32.partialorder %v8368_v14, %v8363_v27  ;;  %v8517_v14 = vld [vmem:[#allocation97_spill] sm:$0xff] }
 0x3f8   :  { %v3344_v62 = vadd.f32 %v3343_v31, %v3281_v63  ;;  %v2508_v31 = vshra.s32 %v6700_v44, 16  ;;  %v2495_v63 = vcvt.s32.f32 %v2493_v0  ;;  %v6819_v27 = vsel %vm1913_vm11, %v4778_v39, 128 }
 0x3f9   :  { %v6776_v26 = vcvt.s32.f32 %v2760_v46  ;;  %v8514_v46 = vld [vmem:[#allocation75_spill] sm:$0xff]  ;;  %vm1921_vm2 = vcmp.eq.f32.partialorder %v8423_v53, %v8419_v49 }
 0x3fa   :  { %v6685_v38 = vadd.f32 %v3344_v62, %v3282_v42  ;;  %v6711_v15 = vcvt.s32.f32 %v2508_v31  ;;  %v6714_v62 = vsel %vm1912_vm14, %v4778_v39, 128  ;;  %vm1915_vm14 = vcmp.eq.f32.partialorder %v8388_v1, %v8372_v6 }
 0x3fb   :  { %v2522_v33 = vshra.s32 %v6714_v62, 16 }
 0x3fc   :  { %8506 = vst [vmem:[#allocation214_spill] sm:$0xff] %v6685_v38 }
 0x3fd   :  { %v6718_v42 = vcvt.s32.f32 %v2522_v33 }
 0x432   :  { %v2460_v28 = vpop.xlane.xlu0 %2459 }
 0x433   :  { %v2461_v58 = vcvt.f32.s32 %v2460_v28  ;;  %v8507_v28 = vld [vmem:[#allocation80_spill] sm:$0xff] }
 0x435   :  { %v6688_v7 = vadd.s32 %v2463_v37, %v2461_v58  ;;  %v6733_v37 = vsel %vm1917_vm1, %v4778_v39, 128 }
 0x436   :  { %v2592_v58 = vshra.s32 %v6733_v37, 16 }
 0x438   :  { %v6737_v56 = vcvt.s32.f32 %v2592_v58  ;;  %v8513_v58 = vld [vmem:[#allocation166_spill] sm:$0xff] }
 0x439   :  { %v2350_v45 = vcvt.f32.s32 %v8513_v58 }
 0x43a   :  { %v6691_v8 = vpop.xlane.xlu0 %2483 }
 0x43b   :  { %vm2485_vm12 = vcmp.eq.f32.partialorder %v6357_v22, %v6691_v8  ;;  %v2490_v0 = vcvt.f32.s32 %v6691_v8  ;;  %v2351_v16 = vshll.u32 %v2350_v45, 16 }
 0x43c   :  { %v2486_v55 = vsel %vm2485_vm12, %v2481_v25, inf  ;;  %v2676_v25 = vshra.s32 %v6752_v43, 16 }
 0x43d   :  { %2487 = vmin.xlane.f32.xlu1 %v2486_v55  ;;  %v6779_v55 = vsel %vm1932_vm6, %v4778_v39, 128  ;;  %v2491_v19 = vshll.u32 %v2490_v0, 16 }
 0x43e   :  { %v6758_v35 = vcvt.s32.f32 %v2676_v25  ;;  %v2802_v18 = vshra.s32 %v6779_v55, 16 }
 0x440   :  { %v6785_v20 = vcvt.s32.f32 %v2802_v18  ;;  %v2322_v18 = vcvt.f32.s32 %v8514_v46 }
 0x442   :  { %v6697_v54 = vpop.xlane.xlu2 %2473  ;;  %8509 = vst [vmem:[#allocation99_spill] sm:$0xff] %v6785_v20  ;;  %v2334_v31 = vpop.xlane.xlu0 %2333  ;;  %v2323_v8 = vshll.u32 %v2322_v18, 16  ;;  %v2521_v18 = vand.u32 65535, %v6714_v62  ;;  %v8520_v62 = vld [vmem:[#allocation135_spill] sm:$0xff] }
 0x445   :  { %2319 = vmin.xlane.f32.xlu1 %v8507_v28  ;;  %v6788_v28 = vsel %vm1934_vm7, %v4778_v39, 128  ;;  %vm1927_vm7 = vcmp.eq.f32.partialorder %v8541_v9, %v8540_v5  ;;  %v8545_v9 = vld [vmem:[#allocation224_spill] sm:$0xff]  ;;  %v8546_v5 = vld [vmem:[#allocation159_spill] sm:$0xff] }
 0x446   :  { %8510 = vst [vmem:[#allocation28_spill] sm:$0xff] %v6788_v28  ;;  %v2830_v40 = vshra.s32 %v6788_v28, 16  ;;  %v8548_v28 = vld [vmem:[#allocation240_spill] sm:$0xff] }
 0x448   :  { %v6792_v29 = vcvt.s32.f32 %v2830_v40 }
 0x44a   :  { %8511 = vst [vmem:[#allocation225_spill] sm:$0xff] %v6792_v29 }
 0x44b   :  { %v6707_v22 = vpop.xlane.xlu2 %2497 }
 0x44c   :  { %vm2499_vm15 = vcmp.eq.f32.partialorder %v6552_v4, %v6707_v22  ;;  %v2550_v4 = vshra.s32 %v6724_v3, 16 }
 0x44d   :  { %v2500_v47 = vsel %vm2499_vm15, %v2495_v63, inf  ;;  %2511 = vmin.xlane.f32.xlu1 %v6711_v15  ;;  %v8512_v63 = vld [vmem:[#allocation184_spill] sm:$0xff] }
 0x44e   :  { %2501 = vmin.xlane.f32.xlu0 %v2500_v47  ;;  %v6730_v52 = vcvt.s32.f32 %v2550_v4  ;;  %v2336_v47 = vcvt.f32.s32 %v8512_v63 }
 0x453   :  { %v2348_v4 = vpop.xlane.xlu2 %2347 }
 0x454   :  { %v2349_v40 = vcvt.f32.s32 %v2348_v4 }
 0x456   :  { %2525 = vmin.xlane.f32.xlu0 %v6718_v42  ;;  %v2352_v21 = vadd.s32 %v2351_v16, %v2349_v40  ;;  %v8515_v16 = vld [vmem:[#allocation196_spill] sm:$0xff]  ;;  %v2536_v40 = vshra.s32 %v6819_v27, 16 }
 0x458   :  { %vm2923_vm9 = vcmp.eq.s32.totalorder %v4778_v39, %v2352_v21 }
 0x45e   :  { %2375 = vmin.xlane.f32.xlu0 %v8508_v11  ;;  %v2335_v11 = vcvt.f32.s32 %v2334_v31  ;;  %v2507_v31 = vand.u32 65535, %v6700_v44 }
 0x466   :  { %2553 = vmin.xlane.f32.xlu0 %v6730_v52 }
 0x46e   :  { %2595 = vmin.xlane.f32.xlu0 %v6737_v56 }
 0x476   :  { %2417 = vmin.xlane.f32.xlu0 %v6437_v57  ;;  %v6761_v57 = vsel %vm1926_vm4, %v4778_v39, 128 }
 0x477   :  { %v2718_v32 = vshra.s32 %v6761_v57, 16 }
 0x479   :  { %v6767_v60 = vcvt.s32.f32 %v2718_v32  ;;  %v2337_v32 = vshll.u32 %v2336_v47, 16 }
 0x47b   :  { %v2338_v38 = vadd.s32 %v2337_v32, %v2335_v11  ;;  %v2509_v11 = vcvt.s32.f32 %v2507_v31 }
 0x47d   :  { %vm2922_vm8 = vcmp.eq.s32.totalorder %v4778_v39, %v2338_v38 }
 0x47e   :  { %2637 = vmin.xlane.f32.xlu0 %v6749_v12  ;;  %v3652_v63 = vsel %vm2922_vm8, 1.0, %v8154_v17 }
 0x486   :  { %2679 = vmin.xlane.f32.xlu0 %v6758_v35 }
 0x48e   :  { %2721 = vmin.xlane.f32.xlu0 %v6767_v60 }
 0x496   :  { %2763 = vmin.xlane.f32.xlu0 %v6776_v26 }
 0x49e   :  { %2805 = vmin.xlane.f32.xlu0 %v6785_v20 }
 0x4a6   :  { %2833 = vmin.xlane.f32.xlu0 %v6792_v29 }
 0x4b0   :  { %v2488_v33 = vpop.xlane.xlu1 %2487 }
 0x4b1   :  { %v2489_v13 = vcvt.f32.s32 %v2488_v33  ;;  %v2504_v33 = vcvt.f32.s32 %v6707_v22 }
 0x4b3   :  { %v6798_v25 = vadd.s32 %v2491_v19, %v2489_v13  ;;  %v8516_v19 = vld [vmem:[#allocation93_spill] sm:$0xff]  ;;  %v2505_v22 = vshll.u32 %v2504_v33, 16 }
 0x4b4   :  { %v3114_v38 = vmul.f32 %v3652_v63, %v8516_v19  ;;  %v8519_v63 = vld [vmem:[#allocation158_spill] sm:$0xff]  ;;  %v8543_v19 = vld [vmem:[#allocation164_spill] sm:$0xff] }
 0x4b5   :  { %v2378_v33 = vcvt.f32.s32 %v8519_v63 }
 0x4b8   :  { %v2320_v2 = vpop.xlane.xlu1 %2319 }
 0x4b9   :  { %v2321_v41 = vcvt.f32.s32 %v2320_v2 }
 0x4bb   :  { %v2324_v0 = vadd.s32 %v2323_v8, %v2321_v41  ;;  %v3653_v41 = vsel %vm2923_vm9, 1.0, %v8154_v17  ;;  %vm1930_vm9 = vcmp.eq.f32.partialorder %v8546_v5, %v8545_v9  ;;  %v2549_v5 = vand.u32 65535, %v6724_v3 }
 0x4bc   :  { %v3115_v45 = vmul.f32 %v3653_v41, %v8517_v14  ;;  %v8542_v14 = vld [vmem:[#allocation227_spill] sm:$0xff]  ;;  %v2591_v3 = vand.u32 65535, %v6733_v37 }
 0x4bd   :  { %vm2921_vm10 = vcmp.eq.s32.totalorder %v4778_v39, %v2324_v0  ;;  %v6832_v0 = vcvt.s32.f32 %v2536_v40  ;;  %vm1931_vm8 = vcmp.eq.f32.partialorder %v8543_v19, %v8542_v14 }
 0x4be   :  { %v3651_v47 = vsel %vm2921_vm10, 1.0, %v8154_v17 }
 0x4bf   :  { %v3113_v2 = vmul.f32 %v3651_v47, %v8515_v16  ;;  %v8521_v47 = vld [vmem:[#allocation81_spill] sm:$0xff] }
 0x4c0   :  { %v6813_v44 = vpop.xlane.xlu1 %2511  ;;  %vm1916_vm15 = vcmp.eq.f32.partialorder %v8521_v47, %v8520_v62 }
 0x4c1   :  { %v2502_v13 = vpop.xlane.xlu0 %2501  ;;  %v3373_v21 = vadd.f32 %v6535_v50, %v3113_v2  ;;  %vm2513_vm12 = vcmp.eq.f32.partialorder %v6711_v15, %v6813_v44  ;;  %v2523_v15 = vcvt.s32.f32 %v2521_v18 }
 0x4c2   :  { %v2503_v4 = vcvt.f32.s32 %v2502_v13  ;;  %v2514_v58 = vsel %vm2513_vm12, %v2509_v11, inf  ;;  %v6841_v13 = vsel %vm1916_vm15, %v4778_v39, 128 }
 0x4c3   :  { %v3374_v32 = vadd.f32 %v3373_v21, %v3114_v38  ;;  %2515 = vmin.xlane.f32.xlu2 %v2514_v58  ;;  %v2379_v38 = vshll.u32 %v2378_v33, 16  ;;  %v8523_v21 = vld [vmem:[#allocation212_spill] sm:$0xff]  ;;  %v2578_v6 = vshra.s32 %v6841_v13, 16  ;;  %v8525_v58 = vld [vmem:[#allocation89_spill] sm:$0xff] }
 0x4c4   :  { %v6822_v46 = vadd.s32 %v2505_v22, %v2503_v4  ;;  %v8522_v22 = vld [vmem:[#allocation27_spill] sm:$0xff]  ;;  %v8524_v4 = vld [vmem:[#allocation142_spill] sm:$0xff] }
 0x4c5   :  { %v6826_v8 = vadd.f32 %v3374_v32, %v3115_v45  ;;  %vm1918_vm0 = vcmp.eq.f32.partialorder %v8525_v58, %v8524_v4  ;;  %v8526_v45 = vld [vmem:[#allocation146_spill] sm:$0xff]  ;;  %v6858_v40 = vcvt.s32.f32 %v2578_v6  ;;  %v8532_v6 = vld [vmem:[#allocation107_spill] sm:$0xff] }
 0x4c6   :  { %8518 = vst [vmem:[#allocation149_spill] sm:$0xff] %v6822_v46  ;;  %v8527_v32 = vld [vmem:[#allocation94_spill] sm:$0xff]  ;;  %v6866_v63 = vsel %vm1918_vm0, %v4778_v39, 128  ;;  %v8549_v46 = vld [vmem:[#allocation183_spill] sm:$0xff] }
 0x4c7   :  { %vm1919_vm1 = vcmp.eq.f32.partialorder %v8527_v32, %v8526_v45  ;;  %v2606_v62 = vshra.s32 %v6866_v63, 16  ;;  %v6889_v32 = vsel %vm1921_vm2, %v4778_v39, 128  ;;  %vm1933_vm10 = vcmp.eq.f32.partialorder %v8549_v46, %v8548_v28 }
 0x4c8   :  { %v2648_v53 = vshra.s32 %v6889_v32, 16  ;;  %v6960_v9 = vsel %vm1933_vm10, %v4778_v39, 128  ;;  %v2551_v28 = vcvt.s32.f32 %v2549_v5  ;;  %v2535_v5 = vand.u32 65535, %v6819_v27 }
 0x4c9   :  { %v6828_v50 = vpop.xlane.xlu0 %2525  ;;  %8550 = vst [vmem:[#allocation168_spill] sm:$0xff] %v6960_v9 }
 0x4ca   :  { %vm2527_vm13 = vcmp.eq.f32.partialorder %v6718_v42, %v6828_v50  ;;  %v6844_v42 = vsel %vm1915_vm14, %v4778_v39, 128  ;;  %v6903_v34 = vcvt.s32.f32 %v2648_v53 }
 0x4cb   :  { %v2528_v31 = vsel %vm2527_vm13, %v2523_v15, inf  ;;  %2539 = vmin.xlane.f32.xlu2 %v6832_v0  ;;  %v2564_v1 = vshra.s32 %v6844_v42, 16 }
 0x4cc   :  { %2529 = vmin.xlane.f32.xlu1 %v2528_v31  ;;  %v6863_v31 = vsel %vm1919_vm1, %v4778_v39, 128 }
 0x4cd   :  { %v6860_v15 = vcvt.s32.f32 %v2564_v1  ;;  %v2620_v33 = vshra.s32 %v6863_v31, 16 }
 0x4d1   :  { %v2376_v2 = vpop.xlane.xlu0 %2375 }
 0x4d2   :  { %v2377_v41 = vcvt.f32.s32 %v2376_v2  ;;  %v6874_v2 = vcvt.s32.f32 %v2620_v33 }
 0x4d3   :  { %2389 = vmin.xlane.f32.xlu2 %v8522_v22 }
 0x4d4   :  { %v6846_v11 = vadd.s32 %v2379_v38, %v2377_v41  ;;  %2361 = vmin.xlane.f32.xlu1 %v8523_v21  ;;  %v6876_v38 = vcvt.s32.f32 %v2606_v62  ;;  %v8530_v41 = vld [vmem:[#allocation25_spill] sm:$0xff]  ;;  %v8531_v21 = vld [vmem:[#allocation162_spill] sm:$0xff] }
 0x4d5   :  { %v2420_v22 = vcvt.f32.s32 %v8530_v41  ;;  %vm1922_vm3 = vcmp.eq.f32.partialorder %v8532_v6, %v8531_v21  ;;  %v8533_v62 = vld [vmem:[#allocation233_spill] sm:$0xff]  ;;  %v8534_v41 = vld [vmem:[#allocation243_spill] sm:$0xff] }
 0x4d6   :  { %v6886_v45 = vsel %vm1922_vm3, %v4778_v39, 128  ;;  %v8535_v21 = vld [vmem:[#allocation181_spill] sm:$0xff]  ;;  %vm2925_vm0 = vcmp.eq.s32.totalorder %v4778_v39, %v6846_v11  ;;  %vm1937_vm3 = vcmp.eq.f32.partialorder %v8496_v36, %v8490_v24  ;;  %v8559_v11 = vld [vmem:[#allocation22_spill] sm:$0xff] }
 0x4d7   :  { %v2421_v4 = vshll.u32 %v2420_v22, 16  ;;  %v2662_v49 = vshra.s32 %v6886_v45, 16  ;;  %v8536_v6 = vld [vmem:[#allocation117_spill] sm:$0xff] }
 0x4d8   :  { %vm1924_vm4 = vcmp.eq.f32.partialorder %v8536_v6, %v8535_v21  ;;  %v8537_v22 = vld [vmem:[#allocation185_spill] sm:$0xff]  ;;  %v8538_v21 = vld [vmem:[#allocation206_spill] sm:$0xff] }
 0x4d9   :  { %v6856_v18 = vpop.xlane.xlu0 %2553  ;;  %vm1925_vm5 = vcmp.eq.f32.partialorder %v8451_v59, %v8537_v22  ;;  %v8539_v59 = vld [vmem:[#allocation139_spill] sm:$0xff] }
 0x4da   :  { %8528 = vst [vmem:[#allocation32_spill] sm:$0xff] %v6856_v18  ;;  %vm1928_vm6 = vcmp.eq.f32.partialorder %v8539_v59, %v8538_v21  ;;  %v8544_v59 = vld [vmem:[#allocation193_spill] sm:$0xff]  ;;  %vm2555_vm12 = vcmp.eq.f32.partialorder %v6730_v52, %v6856_v18 }
 0x4db   :  { %2581 = vmin.xlane.f32.xlu2 %v6858_v40  ;;  %v6922_v6 = vsel %vm1928_vm6, %v4778_v39, 128  ;;  %v2556_v46 = vsel %vm2555_vm12, %v2551_v28, inf  ;;  %v2532_v28 = vcvt.f32.s32 %v6828_v50  ;;  %v8557_v50 = vld [vmem:[#allocation20_spill] sm:$0xff] }
 0x4dc   :  { %2567 = vmin.xlane.f32.xlu1 %v6860_v15  ;;  %v2746_v22 = vshra.s32 %v6922_v6, 16 }
 0x4dd   :  { %v2533_v37 = vshll.u32 %v2532_v28, 16 }
 0x4de   :  { %v6931_v21 = vcvt.s32.f32 %v2746_v22  ;;  %v6950_v22 = vsel %vm1930_vm9, %v4778_v39, 128 }
 0x4e1   :  { %v6872_v47 = vpop.xlane.xlu0 %2595 }
 0x4e2   :  { %8529 = vst [vmem:[#allocation231_spill] sm:$0xff] %v6872_v47  ;;  %vm2597_vm13 = vcmp.eq.f32.partialorder %v6737_v56, %v6872_v47 }
 0x4e3   :  { %2623 = vmin.xlane.f32.xlu2 %v6874_v2 }
 0x4e4   :  { %2609 = vmin.xlane.f32.xlu1 %v6876_v38 }
 0x4e9   :  { %v2418_v1 = vpop.xlane.xlu0 %2417 }
 0x4ea   :  { %v2419_v58 = vcvt.f32.s32 %v2418_v1  ;;  %v6901_v1 = vcvt.s32.f32 %v2662_v49 }
 0x4eb   :  { %2431 = vmin.xlane.f32.xlu2 %v8533_v62 }
 0x4ec   :  { %v6891_v33 = vadd.s32 %v2421_v4, %v2419_v58  ;;  %2403 = vmin.xlane.f32.xlu1 %v8534_v41  ;;  %v6906_v4 = vsel %vm1925_vm5, %v4778_v39, 128  ;;  %v6909_v58 = vsel %vm1924_vm4, %v4778_v39, 128  ;;  %vm1938_vm4 = vcmp.eq.f32.partialorder %v8499_v48, %v8493_v10 }
 0x4ed   :  { %v2704_v62 = vshra.s32 %v6906_v4, 16  ;;  %v2690_v41 = vshra.s32 %v6909_v58, 16  ;;  %v7030_v10 = vsel %vm1937_vm3, %v4778_v39, 128  ;;  %v7033_v24 = vsel %vm1938_vm4, %v4778_v39, 128 }
 0x4ee   :  { %vm2928_vm10 = vcmp.eq.s32.totalorder %v4778_v39, %v6891_v33 }
 0x4ef   :  { %v6917_v49 = vcvt.s32.f32 %v2704_v62  ;;  %v6919_v53 = vcvt.s32.f32 %v2690_v41  ;;  %v6934_v62 = vsel %vm1931_vm8, %v4778_v39, 128  ;;  %v6937_v41 = vsel %vm1927_vm7, %v4778_v39, 128 }
 0x4f0   :  { %v2788_v16 = vshra.s32 %v6934_v62, 16  ;;  %v2732_v29 = vshra.s32 %v6937_v41, 16  ;;  %v3658_v33 = vsel %vm2928_vm10, 1.0, %v8154_v17 }
 0x4f2   :  { %v6945_v19 = vcvt.s32.f32 %v2788_v16  ;;  %v6947_v14 = vcvt.s32.f32 %v2732_v29  ;;  %v2816_v29 = vshra.s32 %v6960_v9, 16 }
 0x4f3   :  { %2665 = vmin.xlane.f32.xlu2 %v6901_v1 }
 0x4f4   :  { %2651 = vmin.xlane.f32.xlu1 %v6903_v34  ;;  %8547 = vst [vmem:[#allocation220_spill] sm:$0xff] %v6947_v14  ;;  %v6964_v16 = vcvt.s32.f32 %v2816_v29 }
 0x4f6   :  { %8551 = vst [vmem:[#allocation154_spill] sm:$0xff] %v6964_v16 }
 0x4fb   :  { %2707 = vmin.xlane.f32.xlu2 %v6917_v49 }
 0x4fc   :  { %2693 = vmin.xlane.f32.xlu1 %v6919_v53 }
 0x503   :  { %2749 = vmin.xlane.f32.xlu2 %v6931_v21 }
 0x504   :  { %2445 = vmin.xlane.f32.xlu1 %v8544_v59  ;;  %v2774_v59 = vshra.s32 %v6950_v22, 16 }
 0x506   :  { %v6957_v20 = vcvt.s32.f32 %v2774_v59 }
 0x50b   :  { %2791 = vmin.xlane.f32.xlu2 %v6945_v19 }
 0x50c   :  { %2735 = vmin.xlane.f32.xlu1 %v6947_v14  ;;  %v8552_v14 = vld [vmem:[#allocation35_spill] sm:$0xff] }
 0x50d   :  { %vm1936_vm11 = vcmp.eq.f32.partialorder %v8492_v61, %v8552_v14  ;;  %v2593_v61 = vcvt.s32.f32 %v2591_v3 }
 0x50e   :  { %v6973_v59 = vsel %vm1936_vm11, %v4778_v39, 128 }
 0x50f   :  { %8553 = vst [vmem:[#allocation37_spill] sm:$0xff] %v6973_v59  ;;  %v2858_v9 = vshra.s32 %v6973_v59, 16  ;;  %v2598_v14 = vsel %vm2597_vm13, %v2593_v61, inf  ;;  %v2537_v59 = vcvt.s32.f32 %v2535_v5 }
 0x511   :  { %v6976_v29 = vcvt.s32.f32 %v2858_v9 }
 0x513   :  { %8554 = vst [vmem:[#allocation31_spill] sm:$0xff] %v6976_v29 }
 0x514   :  { %2777 = vmin.xlane.f32.xlu1 %v6957_v20 }
 0x51c   :  { %2819 = vmin.xlane.f32.xlu1 %v6964_v16 }
 0x524   :  { %2557 = vmin.xlane.f32.xlu1 %v2556_v46  ;;  %v8555_v46 = vld [vmem:[#allocation145_spill] sm:$0xff] }
 0x525   :  { %vm1935_vm14 = vcmp.eq.f32.partialorder %v8489_v30, %v8555_v46  ;;  %v2364_v30 = vcvt.f32.s32 %v8557_v50  ;;  %v8558_v46 = vld [vmem:[#allocation165_spill] sm:$0xff] }
 0x526   :  { %v6993_v3 = vsel %vm1935_vm14, %v4778_v39, 128  ;;  %v2392_v47 = vcvt.f32.s32 %v8558_v46 }
 0x527   :  { %v2844_v27 = vshra.s32 %v6993_v3, 16  ;;  %v2365_v16 = vshll.u32 %v2364_v30, 16  ;;  %v8561_v30 = vld [vmem:[#allocation102_spill] sm:$0xff] }
 0x529   :  { %v7000_v28 = vcvt.s32.f32 %v2844_v27  ;;  %v3655_v27 = vsel %vm2925_vm0, 1.0, %v8154_v17 }
 0x52a   :  { %v3117_v46 = vmul.f32 %v3655_v27, %v8561_v30  ;;  %v8564_v27 = vld [vmem:[#allocation14_spill] sm:$0xff] }
 0x52c   :  { %2861 = vmin.xlane.f32.xlu1 %v6976_v29 }
 0x534   :  { %2599 = vmin.xlane.f32.xlu1 %v2598_v14 }
 0x536   :  { %v6982_v52 = vpop.xlane.xlu2 %2515 }
 0x53e   :  { %v6988_v9 = vpop.xlane.xlu2 %2539 }
 0x53f   :  { %8556 = vst [vmem:[#allocation36_spill] sm:$0xff] %v6988_v9  ;;  %v2530_v29 = vpop.xlane.xlu1 %2529  ;;  %vm2541_vm15 = vcmp.eq.f32.partialorder %v6832_v0, %v6988_v9  ;;  %v2393_v0 = vshll.u32 %v2392_v47, 16 }
 0x540   :  { %v2531_v56 = vcvt.f32.s32 %v2530_v29  ;;  %v2542_v61 = vsel %vm2541_vm15, %v2537_v59, inf }
 0x541   :  { %2543 = vmin.xlane.f32.xlu2 %v2542_v61  ;;  %v2563_v61 = vand.u32 65535, %v6844_v42 }
 0x542   :  { %v6995_v14 = vadd.s32 %v2533_v37, %v2531_v56  ;;  %v2577_v56 = vand.u32 65535, %v6841_v13 }
 0x543   :  { %v2565_v50 = vcvt.s32.f32 %v2563_v61  ;;  %v8563_v61 = vld [vmem:[#allocation8_spill] sm:$0xff] }
 0x546   :  { %v2390_v18 = vpop.xlane.xlu2 %2389 }
 0x547   :  { %v2362_v5 = vpop.xlane.xlu1 %2361  ;;  %v2391_v29 = vcvt.f32.s32 %v2390_v18 }
 0x548   :  { %v2363_v9 = vcvt.f32.s32 %v2362_v5  ;;  %v7022_v5 = vpop.xlane.xlu0 %2637 }
 0x549   :  { %v2394_v59 = vadd.s32 %v2393_v0, %v2391_v29  ;;  %2847 = vmin.xlane.f32.xlu2 %v7000_v28  ;;  %v8562_v29 = vld [vmem:[#allocation109_spill] sm:$0xff]  ;;  %vm2639_vm8 = vcmp.eq.f32.partialorder %v6749_v12, %v7022_v5 }
 0x54a   :  { %v2366_v37 = vadd.s32 %v2365_v16, %v2363_v9  ;;  %v2579_v9 = vcvt.s32.f32 %v2577_v56  ;;  %v2872_v56 = vshra.s32 %v7030_v10, 16 }
 0x54b   :  { %vm2926_vm1 = vcmp.eq.s32.totalorder %v4778_v39, %v2394_v59 }
 0x54c   :  { %vm2924_vm2 = vcmp.eq.s32.totalorder %v4778_v39, %v2366_v37  ;;  %v3656_v13 = vsel %vm2926_vm1, 1.0, %v8154_v17 }
 0x54d   :  { %v3654_v18 = vsel %vm2924_vm2, 1.0, %v8154_v17  ;;  %v3118_v59 = vmul.f32 %v3656_v13, %v8562_v29 }
 0x54e   :  { %v3116_v47 = vmul.f32 %v3654_v18, %v8559_v11  ;;  %v7017_v16 = vpop.xlane.xlu2 %2581  ;;  %v3421_v18 = vadd.f32 %v8564_v27, %v8563_v61 }
 0x54f   :  { %v7019_v42 = vpop.xlane.xlu1 %2567  ;;  %vm2583_vm5 = vcmp.eq.f32.partialorder %v6858_v40, %v7017_v16  ;;  %v2886_v40 = vshra.s32 %v7033_v24, 16 }
 0x550   :  { %8560 = vst [vmem:[#allocation34_spill] sm:$0xff] %v7019_v42  ;;  %v3376_v0 = vadd.f32 %v6826_v8, %v3116_v47  ;;  %vm2569_vm6 = vcmp.eq.f32.partialorder %v6860_v15, %v7019_v42  ;;  %v2584_v36 = vsel %vm2583_vm5, %v2579_v9, inf  ;;  %v2619_v8 = vand.u32 65535, %v6863_v31  ;;  %v8568_v31 = vld [vmem:[#allocation10_spill] sm:$0xff] }
 0x551   :  { %v2570_v48 = vsel %vm2569_vm6, %v2565_v50, inf  ;;  %2585 = vmin.xlane.f32.xlu2 %v2584_v36  ;;  %v7047_v13 = vcvt.s32.f32 %v2886_v40  ;;  %v7049_v50 = vcvt.s32.f32 %v2872_v56  ;;  %v7052_v36 = vpop.xlane.xlu0 %2679  ;;  %v8571_v56 = vld [vmem:[#allocation9_spill] sm:$0xff]  ;;  %vm2931_vm5 = vcmp.eq.s32.totalorder %v4778_v39, %v6688_v7 }
 0x552   :  { %v3377_v37 = vadd.f32 %v3376_v0, %v3117_v46  ;;  %2571 = vmin.xlane.f32.xlu0 %v2570_v48  ;;  %v2621_v9 = vcvt.s32.f32 %v2619_v8  ;;  %v3422_v46 = vadd.f32 %v8568_v31, %v3421_v18  ;;  %v2605_v48 = vand.u32 65535, %v6866_v63  ;;  %v8570_v8 = vld [vmem:[#allocation127_spill] sm:$0xff] }
 0x553   :  { %8566 = vst [vmem:[#allocation42_spill] sm:$0xff] %v7047_v13  ;;  %v2406_v40 = vcvt.f32.s32 %v8570_v8  ;;  %vm2681_vm13 = vcmp.eq.f32.partialorder %v6758_v35, %v7052_v36  ;;  %v3661_v7 = vsel %vm2931_vm5, 1.0, %v8154_v17 }
 0x554   :  { %v3378_v15 = vadd.f32 %v3377_v37, %v3118_v59  ;;  %8567 = vst [vmem:[#allocation39_spill] sm:$0xff] %v7049_v50  ;;  %v2633_v59 = vand.u32 65535, %v6743_v51  ;;  %v8569_v37 = vld [vmem:[#allocation230_spill] sm:$0xff]  ;;  %v3423_v61 = vadd.f32 %v8571_v56, %v3422_v46 }
 0x555   :  { %v2407_v63 = vshll.u32 %v2406_v40, 16 }
 0x556   :  { %v7041_v47 = vpop.xlane.xlu2 %2623  ;;  %v2635_v31 = vcvt.s32.f32 %v2633_v59  ;;  %v2675_v59 = vand.u32 65535, %v6752_v43 }
 0x557   :  { %8565 = vst [vmem:[#allocation40_spill] sm:$0xff] %v7041_v47  ;;  %v7043_v42 = vpop.xlane.xlu1 %2609  ;;  %vm2625_vm7 = vcmp.eq.f32.partialorder %v6874_v2, %v7041_v47  ;;  %v2434_v2 = vcvt.f32.s32 %v8569_v37 }
 0x558   :  { %v2626_v0 = vsel %vm2625_vm7, %v2621_v9, inf  ;;  %vm2611_vm9 = vcmp.eq.f32.partialorder %v6876_v38, %v7043_v42  ;;  %v2607_v9 = vcvt.s32.f32 %v2605_v48  ;;  %v2640_v8 = vsel %vm2639_vm8, %v2635_v31, inf }
 0x559   :  { %2889 = vmin.xlane.f32.xlu2 %v7047_v13  ;;  %2627 = vmin.xlane.f32.xlu1 %v2626_v0  ;;  %v2435_v0 = vshll.u32 %v2434_v2, 16  ;;  %v8572_v13 = vld [vmem:[#allocation11_spill] sm:$0xff]  ;;  %v2647_v38 = vand.u32 65535, %v6889_v32  ;;  %v2661_v48 = vand.u32 65535, %v6886_v45  ;;  %v7071_v2 = vpop.xlane.xlu0 %2721  ;;  %vm2933_vm8 = vcmp.eq.s32.totalorder %v4778_v39, %v6798_v25 }
 0x55a   :  { %2875 = vmin.xlane.f32.xlu0 %v7049_v50  ;;  %v3424_v37 = vadd.f32 %v8572_v13, %v3423_v61  ;;  %v2612_v47 = vsel %vm2611_vm9, %v2607_v9, inf  ;;  %v8573_v13 = vld [vmem:[#allocation13_spill] sm:$0xff]  ;;  %vm2723_vm0 = vcmp.eq.f32.partialorder %v6767_v60, %v7071_v2 }
 0x55b   :  { %v2649_v61 = vcvt.s32.f32 %v2647_v38  ;;  %v8575_v9 = vld [vmem:[#allocation213_spill] sm:$0xff] }
 0x55c   :  { %v3425_v40 = vadd.f32 %v8573_v13, %v3424_v37  ;;  %v3120_v31 = vmul.f32 %v3658_v33, %v8575_v9  ;;  %v8578_v13 = vld [vmem:[#allocation16_spill] sm:$0xff] }
 0x55e   :  { %v2432_v27 = vpop.xlane.xlu2 %2431 }
 0x55f   :  { %v2404_v18 = vpop.xlane.xlu1 %2403  ;;  %v2433_v50 = vcvt.f32.s32 %v2432_v27  ;;  %v2663_v27 = vcvt.s32.f32 %v2661_v48 }
 0x560   :  { %v2405_v51 = vcvt.f32.s32 %v2404_v18  ;;  %v2677_v18 = vcvt.s32.f32 %v2675_v59 }
 0x561   :  { %v2436_v46 = vadd.s32 %v2435_v0, %v2433_v50  ;;  %2641 = vmin.xlane.f32.xlu2 %v2640_v8  ;;  %v7102_v33 = vpop.xlane.xlu0 %2763 }
 0x562   :  { %v2408_v12 = vadd.s32 %v2407_v63, %v2405_v51  ;;  %2613 = vmin.xlane.f32.xlu0 %v2612_v47  ;;  %v8574_v47 = vld [vmem:[#allocation30_spill] sm:$0xff]  ;;  %v8576_v63 = vld [vmem:[#allocation15_spill] sm:$0xff]  ;;  %v2682_v48 = vsel %vm2681_vm13, %v2677_v18, inf  ;;  %vm2765_vm3 = vcmp.eq.f32.partialorder %v6776_v26, %v7102_v33 }
 0x563   :  { %vm2929_vm11 = vcmp.eq.s32.totalorder %v4778_v39, %v2436_v46  ;;  %v3426_v51 = vadd.f32 %v8576_v63, %v3425_v40  ;;  %v8577_v46 = vld [vmem:[#allocation217_spill] sm:$0xff]  ;;  %v8580_v18 = vld [vmem:[#allocation203_spill] sm:$0xff] }
 0x564   :  { %vm2927_vm12 = vcmp.eq.s32.totalorder %v4778_v39, %v2408_v12  ;;  %v3659_v43 = vsel %vm2929_vm11, 1.0, %v8154_v17 }
 0x565   :  { %v3657_v50 = vsel %vm2927_vm12, 1.0, %v8154_v17  ;;  %v3121_v12 = vmul.f32 %v3659_v43, %v8577_v46  ;;  %v3427_v40 = vadd.f32 %v8578_v13, %v3426_v51  ;;  %v2745_v51 = vand.u32 65535, %v6922_v6 }
 0x566   :  { %v3119_v56 = vmul.f32 %v3657_v50, %v8574_v47  ;;  %v7082_v45 = vpop.xlane.xlu2 %2665 }
 0x567   :  { %v7084_v32 = vpop.xlane.xlu1 %2651  ;;  %vm2667_vm14 = vcmp.eq.f32.partialorder %v6901_v1, %v7082_v45  ;;  %v2703_v1 = vand.u32 65535, %v6906_v4  ;;  %v8579_v4 = vld [vmem:[#allocation17_spill] sm:$0xff] }
 0x568   :  { %v3379_v0 = vadd.f32 %v3378_v15, %v3119_v56  ;;  %vm2653_vm15 = vcmp.eq.f32.partialorder %v6903_v34, %v7084_v32  ;;  %v2668_v8 = vsel %vm2667_vm14, %v2663_v27, inf  ;;  %v2689_v15 = vand.u32 65535, %v6909_v58 }
 0x569   :  { %v2654_v37 = vsel %vm2653_vm15, %v2649_v61, inf  ;;  %2669 = vmin.xlane.f32.xlu1 %v2668_v8  ;;  %2683 = vmin.xlane.f32.xlu2 %v2682_v48  ;;  %v2717_v34 = vand.u32 65535, %v6761_v57  ;;  %v2705_v61 = vcvt.s32.f32 %v2703_v1  ;;  %v3428_v58 = vadd.f32 %v8579_v4, %v3427_v40 }
 0x56a   :  { %v3380_v38 = vadd.f32 %v3379_v0, %v3120_v31  ;;  %2655 = vmin.xlane.f32.xlu0 %v2654_v37  ;;  %v2691_v56 = vcvt.s32.f32 %v2689_v15  ;;  %v2476_v31 = vcvt.f32.s32 %v8580_v18  ;;  %v8581_v0 = vld [vmem:[#allocation242_spill] sm:$0xff]  ;;  %v2475_v37 = vcvt.f32.s32 %v6697_v54  ;;  %v8583_v54 = vld [vmem:[#allocation156_spill] sm:$0xff] }
 0x56b   :  { %v2719_v57 = vcvt.s32.f32 %v2717_v34  ;;  %v2448_v63 = vcvt.f32.s32 %v8581_v0  ;;  %v2747_v1 = vcvt.s32.f32 %v2745_v51  ;;  %v2518_v40 = vcvt.f32.s32 %v6813_v44 }
 0x56c   :  { %v7099_v59 = vadd.f32 %v3380_v38, %v3121_v12  ;;  %v2477_v12 = vshll.u32 %v2476_v31, 16  ;;  %v2517_v4 = vcvt.f32.s32 %v6982_v52  ;;  %vm2936_vm14 = vcmp.eq.s32.totalorder %v4778_v39, %v6995_v14 }
 0x56d   :  { %v2724_v60 = vsel %vm2723_vm0, %v2719_v57, inf  ;;  %v2449_v38 = vshll.u32 %v2448_v63, 16  ;;  %v2731_v57 = vand.u32 65535, %v6937_v41  ;;  %v8584_v41 = vld [vmem:[#allocation103_spill] sm:$0xff] }
 0x56e   :  { %v7106_v50 = vpop.xlane.xlu2 %2707  ;;  %v2478_v13 = vadd.s32 %v2477_v12, %v2475_v37  ;;  %v8588_v12 = vld [vmem:[#allocation149_spill] sm:$0xff] }
 0x56f   :  { %v7108_v35 = vpop.xlane.xlu1 %2693  ;;  %vm2709_vm1 = vcmp.eq.f32.partialorder %v6917_v49, %v7106_v50  ;;  %v2759_v49 = vand.u32 65535, %v6770_v23  ;;  %v2733_v31 = vcvt.s32.f32 %v2731_v57  ;;  %vm2934_vm10 = vcmp.eq.s32.totalorder %v4778_v39, %v8588_v12 }
 0x570   :  { %vm2695_vm2 = vcmp.eq.f32.partialorder %v6919_v53, %v7108_v35  ;;  %v2710_v27 = vsel %vm2709_vm1, %v2705_v61, inf  ;;  %v8582_v53 = vld [vmem:[#allocation244_spill] sm:$0xff]  ;;  %vm2932_vm6 = vcmp.eq.s32.totalorder %v4778_v39, %v2478_v13 }
 0x571   :  { %v2696_v43 = vsel %vm2695_vm2, %v2691_v56, inf  ;;  %2711 = vmin.xlane.f32.xlu1 %v2710_v27  ;;  %2725 = vmin.xlane.f32.xlu2 %v2724_v60  ;;  %v3429_v8 = vadd.f32 %v8582_v53, %v3428_v58  ;;  %v2761_v34 = vcvt.s32.f32 %v2759_v49  ;;  %v7131_v56 = vpop.xlane.xlu0 %2805  ;;  %v2519_v27 = vshll.u32 %v2518_v40, 16  ;;  %v8587_v49 = vld [vmem:[#allocation99_spill] sm:$0xff]  ;;  %v8590_v13 = vld [vmem:[#allocation216_spill] sm:$0xff] }
 0x572   :  { %2697 = vmin.xlane.f32.xlu0 %v2696_v43  ;;  %v2801_v43 = vand.u32 65535, %v6779_v55  ;;  %v8586_v55 = vld [vmem:[#allocation197_spill] sm:$0xff]  ;;  %v3662_v51 = vsel %vm2932_vm6, 1.0, %v8154_v17  ;;  %vm2807_vm9 = vcmp.eq.f32.partialorder %v8587_v49, %v7131_v56 }
 0x573   :  { %v3430_v6 = vadd.f32 %v8583_v54, %v3429_v8  ;;  %v2766_v44 = vsel %vm2765_vm3, %v2761_v34, inf  ;;  %v2520_v26 = vadd.s32 %v2519_v27, %v2517_v4  ;;  %v3123_v63 = vmul.f32 %v3661_v7, %v8586_v55  ;;  %v8592_v4 = vld [vmem:[#allocation21_spill] sm:$0xff] }
 0x574   :  { %v2803_v8 = vcvt.s32.f32 %v2801_v43  ;;  %v3124_v40 = vmul.f32 %v3662_v51, %v8590_v13  ;;  %v8594_v27 = vld [vmem:[#allocation113_spill] sm:$0xff]  ;;  %v8597_v51 = vld [vmem:[#allocation194_spill] sm:$0xff] }
 0x575   :  { %v3431_v52 = vadd.f32 %v8584_v41, %v3430_v6  ;;  %vm2935_vm13 = vcmp.eq.s32.totalorder %v4778_v39, %v2520_v26  ;;  %v2773_v6 = vand.u32 65535, %v6950_v22  ;;  %v3666_v22 = vsel %vm2936_vm14, 1.0, %v8154_v17 }
 0x576   :  { %v7123_v48 = vpop.xlane.xlu2 %2749  ;;  %v3665_v7 = vsel %vm2935_vm13, 1.0, %v8154_v17 }
 0x577   :  { %v2446_v15 = vpop.xlane.xlu1 %2445  ;;  %vm2751_vm4 = vcmp.eq.f32.partialorder %v6931_v21, %v7123_v48  ;;  %v2787_v21 = vand.u32 65535, %v6934_v62  ;;  %v8585_v62 = vld [vmem:[#allocation171_spill] sm:$0xff]  ;;  %v3127_v49 = vmul.f32 %v3665_v7, %v8597_v51 }
 0x578   :  { %v2447_v23 = vcvt.f32.s32 %v2446_v15  ;;  %v2752_v61 = vsel %vm2751_vm4, %v2747_v1, inf  ;;  %v3663_v15 = vsel %vm2933_vm8, 1.0, %v8154_v17 }
 0x579   :  { %2753 = vmin.xlane.f32.xlu1 %v2752_v61  ;;  %2767 = vmin.xlane.f32.xlu2 %v2766_v44  ;;  %v2789_v0 = vcvt.s32.f32 %v2787_v21  ;;  %v7170_v54 = vpop.xlane.xlu0 %2833  ;;  %v8591_v61 = vld [vmem:[#allocation28_spill] sm:$0xff]  ;;  %v8593_v44 = vld [vmem:[#allocation209_spill] sm:$0xff] }
 0x57a   :  { %v2450_v58 = vadd.s32 %v2449_v38, %v2447_v23  ;;  %v8589_v38 = vld [vmem:[#allocation220_spill] sm:$0xff]  ;;  %v2829_v57 = vand.u32 65535, %v8591_v61  ;;  %v3125_v21 = vmul.f32 %v3663_v15, %v8593_v44  ;;  %v8601_v61 = vld [vmem:[#allocation43_spill] sm:$0xff] }
 0x57c   :  { %vm2930_vm7 = vcmp.eq.s32.totalorder %v4778_v39, %v2450_v58  ;;  %v3432_v58 = vadd.f32 %v8592_v4, %v3431_v52  ;;  %v2831_v52 = vcvt.s32.f32 %v2829_v57 }
 0x57d   :  { %v3660_v18 = vsel %vm2930_vm7, 1.0, %v8154_v17 }
 0x57e   :  { %v3122_v60 = vmul.f32 %v3660_v18, %v8585_v62  ;;  %v7152_v37 = vpop.xlane.xlu2 %2791  ;;  %v8595_v18 = vld [vmem:[#allocation225_spill] sm:$0xff] }
 0x57f   :  { %v7154_v53 = vpop.xlane.xlu1 %2735  ;;  %vm2793_vm11 = vcmp.eq.f32.partialorder %v6945_v19, %v7152_v37  ;;  %v3664_v19 = vsel %vm2934_vm10, 1.0, %v8154_v17  ;;  %vm2835_vm15 = vcmp.eq.f32.partialorder %v8595_v18, %v7170_v54  ;;  %v8605_v18 = vld [vmem:[#allocation112_spill] sm:$0xff] }
 0x580   :  { %v3382_v25 = vadd.f32 %v7099_v59, %v3122_v60  ;;  %vm2737_vm12 = vcmp.eq.f32.partialorder %v8589_v38, %v7154_v53  ;;  %v2794_v34 = vsel %vm2793_vm11, %v2789_v0, inf  ;;  %v2808_v59 = vsel %vm2807_vm9, %v2803_v8, inf  ;;  %v8596_v0 = vld [vmem:[#allocation48_spill] sm:$0xff] }
 0x581   :  { %v2738_v1 = vsel %vm2737_vm12, %v2733_v31, inf  ;;  %2795 = vmin.xlane.f32.xlu1 %v2794_v34  ;;  %2809 = vmin.xlane.f32.xlu2 %v2808_v59  ;;  %v3126_v41 = vmul.f32 %v3664_v19, %v8594_v27  ;;  %v2775_v60 = vcvt.s32.f32 %v2773_v6  ;;  %v2836_v12 = vsel %vm2835_vm15, %v2831_v52, inf }
 0x582   :  { %v3383_v23 = vadd.f32 %v3382_v25, %v3123_v63  ;;  %2739 = vmin.xlane.f32.xlu0 %v2738_v1  ;;  %v3433_v63 = vadd.f32 %v8596_v0, %v3432_v58  ;;  %v8598_v25 = vld [vmem:[#allocation176_spill] sm:$0xff]  ;;  %v8606_v0 = vld [vmem:[#allocation37_spill] sm:$0xff] }
 0x583   :  { %v3128_v38 = vmul.f32 %v3666_v22, %v8598_v25  ;;  %v8599_v1 = vld [vmem:[#allocation168_spill] sm:$0xff] }
 0x584   :  { %v3384_v43 = vadd.f32 %v3383_v23, %v3124_v40  ;;  %v2815_v34 = vand.u32 65535, %v8599_v1  ;;  %v8600_v40 = vld [vmem:[#allocation106_spill] sm:$0xff]  ;;  %v8603_v58 = vld [vmem:[#allocation120_spill] sm:$0xff]  ;;  %v8609_v1 = vld [vmem:[#allocation31_spill] sm:$0xff] }
 0x585   :  { %v3434_v23 = vadd.f32 %v8600_v40, %v3433_v63  ;;  %v2857_v63 = vand.u32 65535, %v8606_v0  ;;  %v8610_v40 = vld [vmem:[#allocation140_spill] sm:$0xff] }
 0x586   :  { %v3385_v31 = vadd.f32 %v3384_v43, %v3125_v21  ;;  %v2817_v6 = vcvt.s32.f32 %v2815_v34  ;;  %v8604_v43 = vld [vmem:[#allocation32_spill] sm:$0xff] }
 0x587   :  { %v7183_v26 = vpop.xlane.xlu1 %2777  ;;  %v3435_v57 = vadd.f32 %v8601_v61, %v3434_v23  ;;  %v2560_v7 = vcvt.f32.s32 %v8604_v43 }
 0x588   :  { %vm2779_vm0 = vcmp.eq.f32.partialorder %v6957_v20, %v7183_v26  ;;  %v3386_v14 = vadd.f32 %v3385_v31, %v3126_v41  ;;  %v8602_v20 = vld [vmem:[#allocation154_spill] sm:$0xff] }
 0x589   :  { %v2780_v8 = vsel %vm2779_vm0, %v2775_v60, inf  ;;  %2837 = vmin.xlane.f32.xlu1 %v2836_v12  ;;  %v3436_v21 = vadd.f32 %v8603_v58, %v3435_v57  ;;  %v2561_v22 = vshll.u32 %v2560_v7, 16  ;;  %v2859_v12 = vcvt.s32.f32 %v2857_v63  ;;  %v8612_v57 = vld [vmem:[#allocation196_spill] sm:$0xff]  ;;  %v8615_v7 = vld [vmem:[#allocation97_spill] sm:$0xff] }
 0x58a   :  { %2781 = vmin.xlane.f32.xlu0 %v2780_v8  ;;  %v3387_v15 = vadd.f32 %v3386_v14, %v3127_v49  ;;  %v8607_v49 = vld [vmem:[#allocation177_spill] sm:$0xff]  ;;  %v2843_v63 = vand.u32 65535, %v6993_v3 }
 0x58b   :  { %v3437_v31 = vadd.f32 %v8605_v18, %v3436_v21  ;;  %v8614_v21 = vld [vmem:[#allocation36_spill] sm:$0xff] }
 0x58c   :  { %v3388_v59 = vadd.f32 %v3387_v15, %v3128_v38  ;;  %v8608_v38 = vld [vmem:[#allocation173_spill] sm:$0xff]  ;;  %v2546_v43 = vcvt.f32.s32 %v8614_v21 }
 0x58d   :  { %v3438_v14 = vadd.f32 %v8607_v49, %v3437_v31 }
 0x58e   :  { %v2547_v31 = vshll.u32 %v2546_v43, 16 }
 0x58f   :  { %v7192_v19 = vpop.xlane.xlu1 %2819  ;;  %v3439_v15 = vadd.f32 %v8608_v38, %v3438_v14  ;;  %v8616_v38 = vld [vmem:[#allocation221_spill] sm:$0xff] }
 0x590   :  { %vm2821_vm1 = vcmp.eq.f32.partialorder %v8602_v20, %v7192_v19 }
 0x591   :  { %v2822_v4 = vsel %vm2821_vm1, %v2817_v6, inf  ;;  %v3440_v23 = vadd.f32 %v8610_v40, %v3439_v15  ;;  %v8611_v6 = vld [vmem:[#allocation195_spill] sm:$0xff]  ;;  %v8617_v40 = vld [vmem:[#allocation188_spill] sm:$0xff] }
 0x592   :  { %2823 = vmin.xlane.f32.xlu0 %v2822_v4  ;;  %v8613_v4 = vld [vmem:[#allocation93_spill] sm:$0xff] }
 0x593   :  { %v3441_v61 = vadd.f32 %v8611_v6, %v3440_v23 }
 0x595   :  { %v3442_v20 = vadd.f32 %v8612_v57, %v3441_v61  ;;  %v8618_v61 = vld [vmem:[#allocation231_spill] sm:$0xff] }
 0x596   :  { %v2602_v57 = vcvt.f32.s32 %v8618_v61 }
 0x597   :  { %v2558_v41 = vpop.xlane.xlu1 %2557  ;;  %v3443_v58 = vadd.f32 %v8613_v4, %v3442_v20  ;;  %v8619_v4 = vld [vmem:[#allocation34_spill] sm:$0xff] }
 0x598   :  { %v2559_v60 = vcvt.f32.s32 %v2558_v41 }
 0x599   :  { %v3444_v41 = vadd.f32 %v8615_v7, %v3443_v58  ;;  %v2574_v58 = vcvt.f32.s32 %v8619_v4  ;;  %v2603_v7 = vshll.u32 %v2602_v57, 16 }
 0x59a   :  { %v2562_v52 = vadd.s32 %v2561_v22, %v2559_v60 }
 0x59b   :  { %v3445_v60 = vadd.f32 %v8559_v11, %v3444_v41 }
 0x59c   :  { %vm2938_vm3 = vcmp.eq.s32.totalorder %v4778_v39, %v2562_v52 }
 0x59d   :  { %v3668_v49 = vsel %vm2938_vm3, 1.0, %v8154_v17 }
 0x59e   :  { %v3130_v11 = vmul.f32 %v3668_v49, %v8617_v40  ;;  %v2885_v49 = vand.u32 65535, %v7033_v24 }
 0x59f   :  { %v7202_v8 = vpop.xlane.xlu1 %2861 }
 0x5a0   :  { %vm2863_vm2 = vcmp.eq.f32.partialorder %v8609_v1, %v7202_v8 }
 0x5a1   :  { %v2864_v34 = vsel %vm2863_vm2, %v2859_v12, inf  ;;  %v3446_v12 = vadd.f32 %v8561_v30, %v3445_v60  ;;  %v2588_v30 = vcvt.f32.s32 %v7017_v16  ;;  %v2871_v16 = vand.u32 65535, %v7030_v10 }
 0x5a2   :  { %2865 = vmin.xlane.f32.xlu0 %v2864_v34  ;;  %v2845_v34 = vcvt.s32.f32 %v2843_v63 }
 0x5a3   :  { %v3447_v6 = vadd.f32 %v8562_v29, %v3446_v12 }
 0x5a5   :  { %v3448_v43 = vadd.f32 %v8574_v47, %v3447_v6  ;;  %v8622_v6 = vld [vmem:[#allocation123_spill] sm:$0xff] }
 0x5a7   :  { %v2600_v3 = vpop.xlane.xlu1 %2599  ;;  %v3449_v29 = vadd.f32 %v8575_v9, %v3448_v43  ;;  %v8625_v43 = vld [vmem:[#allocation115_spill] sm:$0xff] }
 0x5a8   :  { %v2601_v21 = vcvt.f32.s32 %v2600_v3  ;;  %v2887_v3 = vcvt.s32.f32 %v2885_v49 }
 0x5a9   :  { %v3450_v12 = vadd.f32 %v8577_v46, %v3449_v29  ;;  %v8624_v46 = vld [vmem:[#allocation39_spill] sm:$0xff] }
 0x5b4   :  { %v2544_v18 = vpop.xlane.xlu2 %2543 }
 0x5b5   :  { %v2545_v22 = vcvt.f32.s32 %v2544_v18 }
 0x5b7   :  { %v2548_v0 = vadd.s32 %v2547_v31, %v2545_v22  ;;  %v2604_v31 = vadd.s32 %v2603_v7, %v2601_v21 }
 0x5b9   :  { %vm2937_vm4 = vcmp.eq.s32.totalorder %v4778_v39, %v2548_v0  ;;  %vm2941_vm6 = vcmp.eq.s32.totalorder %v4778_v39, %v2604_v31  ;;  %v2616_v31 = vcvt.f32.s32 %v7043_v42  ;;  %v2658_v42 = vcvt.f32.s32 %v7084_v32 }
 0x5ba   :  { %v3667_v14 = vsel %vm2937_vm4, 1.0, %v8154_v17  ;;  %v3671_v24 = vsel %vm2941_vm6, 1.0, %v8154_v17 }
 0x5bb   :  { %v3129_v15 = vmul.f32 %v3667_v14, %v8616_v38  ;;  %v3133_v7 = vmul.f32 %v3671_v24, %v8625_v43  ;;  %v8626_v24 = vld [vmem:[#allocation45_spill] sm:$0xff] }
 0x5bc   :  { %v7221_v1 = vpop.xlane.xlu2 %2847 }
 0x5bd   :  { %v3389_v23 = vadd.f32 %v3388_v59, %v3129_v15  ;;  %vm2849_vm5 = vcmp.eq.f32.partialorder %v7000_v28, %v7221_v1  ;;  %v2589_v59 = vshll.u32 %v2588_v30, 16  ;;  %v2575_v28 = vshll.u32 %v2574_v58, 16  ;;  %v8620_v15 = vld [vmem:[#allocation105_spill] sm:$0xff]  ;;  %v8623_v30 = vld [vmem:[#allocation42_spill] sm:$0xff] }
 0x5be   :  { %v2850_v52 = vsel %vm2849_vm5, %v2845_v34, inf  ;;  %v8621_v34 = vld [vmem:[#allocation40_spill] sm:$0xff] }
 0x5bf   :  { %2851 = vmin.xlane.f32.xlu2 %v2850_v52  ;;  %v3390_v20 = vadd.f32 %v3389_v23, %v3130_v11  ;;  %v2630_v11 = vcvt.f32.s32 %v8621_v34  ;;  %v2873_v52 = vcvt.s32.f32 %v2871_v16  ;;  %v2617_v16 = vshll.u32 %v2616_v31, 16 }
 0x5c4   :  { %v2586_v41 = vpop.xlane.xlu2 %2585 }
 0x5c5   :  { %v2572_v18 = vpop.xlane.xlu0 %2571  ;;  %v2587_v22 = vcvt.f32.s32 %v2586_v41 }
 0x5c6   :  { %v2573_v60 = vcvt.f32.s32 %v2572_v18  ;;  %v3451_v18 = vadd.f32 %v8585_v62, %v3450_v12 }
 0x5c7   :  { %v2590_v0 = vadd.s32 %v2589_v59, %v2587_v22 }
 0x5c8   :  { %v2576_v63 = vadd.s32 %v2575_v28, %v2573_v60  ;;  %v2644_v28 = vcvt.f32.s32 %v7022_v5  ;;  %v3452_v29 = vadd.f32 %v8586_v55, %v3451_v18  ;;  %v2672_v5 = vcvt.f32.s32 %v7082_v45 }
 0x5c9   :  { %vm2940_vm7 = vcmp.eq.s32.totalorder %v4778_v39, %v2590_v0  ;;  %v2686_v55 = vcvt.f32.s32 %v7052_v36 }
 0x5ca   :  { %vm2939_vm8 = vcmp.eq.s32.totalorder %v4778_v39, %v2576_v63  ;;  %v3670_v47 = vsel %vm2940_vm7, 1.0, %v8154_v17  ;;  %v2645_v49 = vshll.u32 %v2644_v28, 16  ;;  %v3453_v62 = vadd.f32 %v8590_v13, %v3452_v29 }
 0x5cb   :  { %v3669_v14 = vsel %vm2939_vm8, 1.0, %v8154_v17  ;;  %v3132_v61 = vmul.f32 %v3670_v47, %v8622_v6  ;;  %v2659_v13 = vshll.u32 %v2658_v42, 16  ;;  %v2700_v29 = vcvt.f32.s32 %v7108_v35 }
 0x5cc   :  { %v3131_v9 = vmul.f32 %v3669_v14, %v8620_v15  ;;  %v7243_v23 = vpop.xlane.xlu2 %2889  ;;  %v2628_v4 = vpop.xlane.xlu1 %2627 }
 0x5cd   :  { %v7245_v10 = vpop.xlane.xlu0 %2875  ;;  %vm2891_vm9 = vcmp.eq.f32.partialorder %v8623_v30, %v7243_v23  ;;  %v2629_v41 = vcvt.f32.s32 %v2628_v4  ;;  %v8627_v30 = vld [vmem:[#allocation41_spill] sm:$0xff]  ;;  %v2701_v35 = vshll.u32 %v2700_v29, 16  ;;  %v2770_v29 = vcvt.f32.s32 %v7102_v33 }
 0x5ce   :  { %v3391_v57 = vadd.f32 %v3390_v20, %v3131_v9  ;;  %vm2877_vm10 = vcmp.eq.f32.partialorder %v8624_v46, %v7245_v10  ;;  %v2892_v58 = vsel %vm2891_vm9, %v2887_v3, inf  ;;  %v2631_v20 = vshll.u32 %v2630_v11, 16 }
 0x5cf   :  { %v2878_v21 = vsel %vm2877_vm10, %v2873_v52, inf  ;;  %2893 = vmin.xlane.f32.xlu2 %v2892_v58  ;;  %v3454_v52 = vadd.f32 %v8593_v44, %v3453_v62 }
 0x5d0   :  { %v3392_v59 = vadd.f32 %v3391_v57, %v3132_v61  ;;  %2879 = vmin.xlane.f32.xlu1 %v2878_v21  ;;  %v2632_v60 = vadd.s32 %v2631_v20, %v2629_v41  ;;  %v2673_v61 = vshll.u32 %v2672_v5, 16  ;;  %v8628_v41 = vld [vmem:[#allocation110_spill] sm:$0xff] }
 0x5d1   :  { %v3455_v44 = vadd.f32 %v8594_v27, %v3454_v52  ;;  %v8630_v5 = vld [vmem:[#allocation226_spill] sm:$0xff] }
 0x5d2   :  { %v3393_v22 = vadd.f32 %v3392_v59, %v3133_v7  ;;  %vm2943_vm11 = vcmp.eq.s32.totalorder %v4778_v39, %v2632_v60  ;;  %v2687_v7 = vshll.u32 %v2686_v55, 16  ;;  %v2714_v60 = vcvt.f32.s32 %v7106_v50 }
 0x5d3   :  { %v3673_v12 = vsel %vm2943_vm11, 1.0, %v8154_v17  ;;  %v3456_v50 = vadd.f32 %v8597_v51, %v3455_v44 }
 0x5d4   :  { %v2642_v0 = vpop.xlane.xlu2 %2641  ;;  %v3135_v4 = vmul.f32 %v3673_v12, %v8627_v30 }
 0x5d5   :  { %v2614_v63 = vpop.xlane.xlu0 %2613  ;;  %v2643_v47 = vcvt.f32.s32 %v2642_v0  ;;  %v3457_v51 = vadd.f32 %v8598_v25, %v3456_v50  ;;  %v2756_v25 = vcvt.f32.s32 %v7123_v48 }
 0x5d6   :  { %v2615_v14 = vcvt.f32.s32 %v2614_v63  ;;  %v2728_v63 = vcvt.f32.s32 %v7071_v2 }
 0x5d7   :  { %v2646_v9 = vadd.s32 %v2645_v49, %v2643_v47  ;;  %v8629_v47 = vld [vmem:[#allocation238_spill] sm:$0xff] }
 0x5d8   :  { %v2618_v34 = vadd.s32 %v2617_v16, %v2615_v14  ;;  %v2715_v14 = vshll.u32 %v2714_v60, 16 }
 0x5d9   :  { %vm2944_vm12 = vcmp.eq.s32.totalorder %v4778_v39, %v2646_v9 }
 0x5da   :  { %vm2942_vm13 = vcmp.eq.s32.totalorder %v4778_v39, %v2618_v34  ;;  %v3674_v45 = vsel %vm2944_vm12, 1.0, %v8154_v17 }
 0x5db   :  { %v3672_v11 = vsel %vm2942_vm13, 1.0, %v8154_v17  ;;  %v3136_v18 = vmul.f32 %v3674_v45, %v8628_v41 }
 0x5dc   :  { %v3134_v3 = vmul.f32 %v3672_v11, %v8626_v24  ;;  %v2670_v57 = vpop.xlane.xlu1 %2669  ;;  %v2684_v21 = vpop.xlane.xlu2 %2683 }
 0x5dd   :  { %v2656_v32 = vpop.xlane.xlu0 %2655  ;;  %v2671_v58 = vcvt.f32.s32 %v2670_v57  ;;  %v2685_v59 = vcvt.f32.s32 %v2684_v21 }
 0x5de   :  { %v3394_v46 = vadd.f32 %v3393_v22, %v3134_v3  ;;  %v2657_v36 = vcvt.f32.s32 %v2656_v32  ;;  %v2729_v3 = vshll.u32 %v2728_v63, 16 }
 0x5df   :  { %v2674_v20 = vadd.s32 %v2673_v61, %v2671_v58  ;;  %v2688_v0 = vadd.s32 %v2687_v7, %v2685_v59  ;;  %v8631_v61 = vld [vmem:[#allocation234_spill] sm:$0xff]  ;;  %v3458_v59 = vadd.f32 %v8616_v38, %v3457_v51  ;;  %v2742_v38 = vcvt.f32.s32 %v7154_v53 }
 0x5e0   :  { %v3395_v28 = vadd.f32 %v3394_v46, %v3135_v4  ;;  %v2660_v31 = vadd.s32 %v2659_v13, %v2657_v36  ;;  %v8632_v36 = vld [vmem:[#allocation218_spill] sm:$0xff] }
 0x5e1   :  { %vm2946_vm14 = vcmp.eq.s32.totalorder %v4778_v39, %v2674_v20  ;;  %vm2947_vm0 = vcmp.eq.s32.totalorder %v4778_v39, %v2688_v0  ;;  %v8633_v20 = vld [vmem:[#allocation229_spill] sm:$0xff]  ;;  %v8634_v0 = vld [vmem:[#allocation126_spill] sm:$0xff]  ;;  %v2743_v33 = vshll.u32 %v2742_v38, 16 }
 0x5e2   :  { %v3396_v22 = vadd.f32 %v3395_v28, %v3136_v18  ;;  %vm2945_vm15 = vcmp.eq.s32.totalorder %v4778_v39, %v2660_v31  ;;  %v3676_v49 = vsel %vm2946_vm14, 1.0, %v8154_v17  ;;  %v3677_v9 = vsel %vm2947_vm0, 1.0, %v8154_v17 }
 0x5e3   :  { %v3675_v16 = vsel %vm2945_vm15, 1.0, %v8154_v17  ;;  %v3138_v42 = vmul.f32 %v3676_v49, %v8630_v5  ;;  %v3139_v13 = vmul.f32 %v3677_v9, %v8631_v61  ;;  %vm3490_vm0 = vcmask 1040384  }
 0x5e4   :  { %v3137_v27 = vmul.f32 %v3675_v16, %v8629_v47  ;;  %v2712_v34 = vpop.xlane.xlu1 %2711  ;;  %v2726_v12 = vpop.xlane.xlu2 %2725  ;;  %v3459_v16 = vadd.f32 %v8617_v40, %v3458_v59 }
 0x5e5   :  { %v2698_v62 = vpop.xlane.xlu0 %2697  ;;  %v2713_v2 = vcvt.f32.s32 %v2712_v34  ;;  %v2727_v52 = vcvt.f32.s32 %v2726_v12 }
 0x5e6   :  { %v3397_v55 = vadd.f32 %v3396_v22, %v3137_v27  ;;  %v2699_v11 = vcvt.f32.s32 %v2698_v62  ;;  %v2757_v27 = vshll.u32 %v2756_v25, 16  ;;  %v3460_v48 = vadd.f32 %v8620_v15, %v3459_v16  ;;  %v8637_v25 = vld [vmem:[#allocation210_spill] sm:$0xff] }
 0x5e7   :  { %v2716_v57 = vadd.s32 %v2715_v14, %v2713_v2  ;;  %v2730_v4 = vadd.s32 %v2729_v3, %v2727_v52  ;;  %v2784_v52 = vcvt.f32.s32 %v7183_v26 }
 0x5e8   :  { %v3398_v45 = vadd.f32 %v3397_v55, %v3138_v42  ;;  %v2702_v32 = vadd.s32 %v2701_v35, %v2699_v11  ;;  %v2771_v35 = vshll.u32 %v2770_v29, 16  ;;  %v2798_v42 = vcvt.f32.s32 %v7152_v37 }
 0x5e9   :  { %vm2949_vm1 = vcmp.eq.s32.totalorder %v4778_v39, %v2716_v57  ;;  %vm2950_vm3 = vcmp.eq.s32.totalorder %v4778_v39, %v2730_v4  ;;  %v2812_v11 = vcvt.f32.s32 %v7131_v56  ;;  %v3461_v3 = vadd.f32 %v8622_v6, %v3460_v48 }
 0x5ea   :  { %v3399_v46 = vadd.f32 %v3398_v45, %v3139_v13  ;;  %vm2948_vm2 = vcmp.eq.s32.totalorder %v4778_v39, %v2702_v32  ;;  %v3679_v58 = vsel %vm2949_vm1, 1.0, %v8154_v17  ;;  %v3680_v18 = vsel %vm2950_vm3, 1.0, %v8154_v17  ;;  %v8635_v32 = vld [vmem:[#allocation136_spill] sm:$0xff] }
 0x5eb   :  { %v3678_v21 = vsel %vm2948_vm2, 1.0, %v8154_v17  ;;  %v3141_v31 = vmul.f32 %v3679_v58, %v8633_v20  ;;  %v3142_v22 = vmul.f32 %v3680_v18, %v8634_v0  ;;  %v2799_v13 = vshll.u32 %v2798_v42, 16  ;;  %v8636_v58 = vld [vmem:[#allocation29_spill] sm:$0xff] }
 0x5ec   :  { %v3140_v7 = vmul.f32 %v3678_v21, %v8632_v36  ;;  %v2754_v28 = vpop.xlane.xlu1 %2753  ;;  %v2768_v60 = vpop.xlane.xlu2 %2767  ;;  %v2813_v57 = vshll.u32 %v2812_v11, 16  ;;  %v3462_v4 = vadd.f32 %v8625_v43, %v3461_v3  ;;  %v2826_v29 = vcvt.f32.s32 %v7192_v19 }
 0x5ed   :  { %v2755_v49 = vcvt.f32.s32 %v2754_v28  ;;  %v2769_v50 = vcvt.f32.s32 %v2768_v60  ;;  %vm3492_vm1 = vcmask 1041408  }
 0x5ee   :  { %v3400_v44 = vadd.f32 %v3399_v46, %v3140_v7  ;;  %v2785_v46 = vshll.u32 %v2784_v52, 16  ;;  %v3463_v28 = vadd.f32 %v8626_v24, %v3462_v4  ;;  %v8638_v24 = vld [vmem:[#allocation215_spill] sm:$0xff] }
 0x5ef   :  { %v2758_v9 = vadd.s32 %v2757_v27, %v2755_v49  ;;  %v2772_v55 = vadd.s32 %v2771_v35, %v2769_v50  ;;  %v2827_v50 = vshll.u32 %v2826_v29, 16 }
 0x5f0   :  { %v3401_v63 = vadd.f32 %v3400_v44, %v3141_v31 }
 0x5f1   :  { %vm2952_vm4 = vcmp.eq.s32.totalorder %v4778_v39, %v2758_v9  ;;  %vm2953_vm5 = vcmp.eq.s32.totalorder %v4778_v39, %v2772_v55 }
 0x5f2   :  { %v3402_v14 = vadd.f32 %v3401_v63, %v3142_v22  ;;  %v3682_v37 = vsel %vm2952_vm4, 1.0, %v8154_v17  ;;  %v3683_v6 = vsel %vm2953_vm5, 1.0, %v8154_v17  ;;  %v3464_v22 = vadd.f32 %v8627_v30, %v3463_v28 }
 0x5f3   :  { %v3144_v21 = vmul.f32 %v3682_v37, %v8636_v58  ;;  %v3145_v31 = vmul.f32 %v3683_v6, %v8637_v25  ;;  %v2854_v6 = vcvt.f32.s32 %v7221_v1  ;;  %v8643_v1 = vld [vmem:[#allocation33_spill] sm:$0xff] }
 0x5f4   :  { %v2796_v34 = vpop.xlane.xlu1 %2795  ;;  %v2810_v12 = vpop.xlane.xlu2 %2809  ;;  %v3465_v48 = vadd.f32 %v8628_v41, %v3464_v22  ;;  %v8644_v22 = vld [vmem:[#allocation150_spill] sm:$0xff] }
 0x5f5   :  { %v2740_v62 = vpop.xlane.xlu0 %2739  ;;  %v2797_v40 = vcvt.f32.s32 %v2796_v34  ;;  %v2811_v15 = vcvt.f32.s32 %v2810_v12  ;;  %v8640_v34 = vld [vmem:[#allocation143_spill] sm:$0xff] }
 0x5f6   :  { %v2741_v2 = vcvt.f32.s32 %v2740_v62  ;;  %v8641_v12 = vld [vmem:[#allocation155_spill] sm:$0xff] }
 0x5f7   :  { %v2800_v56 = vadd.s32 %v2799_v13, %v2797_v40  ;;  %v2814_v7 = vadd.s32 %v2813_v57, %v2811_v15 }
 0x5f8   :  { %v2744_v53 = vadd.s32 %v2743_v33, %v2741_v2  ;;  %v3466_v33 = vadd.f32 %v8629_v47, %v3465_v48 }
 0x5f9   :  { %vm2955_vm7 = vcmp.eq.s32.totalorder %v4778_v39, %v2800_v56  ;;  %vm2956_vm8 = vcmp.eq.s32.totalorder %v4778_v39, %v2814_v7 }
 0x5fa   :  { %vm2951_vm6 = vcmp.eq.s32.totalorder %v4778_v39, %v2744_v53  ;;  %v3685_v63 = vsel %vm2955_vm7, 1.0, %v8154_v17  ;;  %v3686_v27 = vsel %vm2956_vm8, 1.0, %v8154_v17  ;;  %v3467_v40 = vadd.f32 %v8630_v5, %v3466_v33  ;;  %v8647_v33 = vld [vmem:[#allocation214_spill] sm:$0xff] }
 0x5fb   :  { %v3681_v45 = vsel %vm2951_vm6, 1.0, %v8154_v17  ;;  %v3148_v62 = vmul.f32 %v3686_v27, %v8640_v34  ;;  %v2840_v5 = vcvt.f32.s32 %v7170_v54  ;;  %v8645_v27 = vld [vmem:[#allocation12_spill] sm:$0xff] }
 0x5fc   :  { %v3143_v51 = vmul.f32 %v3681_v45, %v8635_v32  ;;  %v3468_v3 = vadd.f32 %v8631_v61, %v3467_v40  ;;  %v2838_v57 = vpop.xlane.xlu1 %2837 }
 0x5fd   :  { %v2782_v26 = vpop.xlane.xlu0 %2781  ;;  %v2839_v56 = vcvt.f32.s32 %v2838_v57 }
 0x5fe   :  { %v3403_v59 = vadd.f32 %v3402_v14, %v3143_v51  ;;  %v2783_v18 = vcvt.f32.s32 %v2782_v26  ;;  %v8639_v14 = vld [vmem:[#allocation199_spill] sm:$0xff]  ;;  %v3469_v41 = vadd.f32 %v8632_v36, %v3468_v3  ;;  %v2841_v36 = vshll.u32 %v2840_v5, 16 }
 0x5ff   :  { %v3147_v35 = vmul.f32 %v3685_v63, %v8639_v14 }
 0x600   :  { %v3404_v44 = vadd.f32 %v3403_v59, %v3144_v21  ;;  %v2786_v60 = vadd.s32 %v2785_v46, %v2783_v18  ;;  %v3470_v52 = vadd.f32 %v8633_v20, %v3469_v41  ;;  %v2868_v20 = vcvt.f32.s32 %v7202_v8  ;;  %v8642_v59 = vld [vmem:[#allocation132_spill] sm:$0xff] }
 0x601   :  { %v2842_v4 = vadd.s32 %v2841_v36, %v2839_v56  ;;  %v2855_v21 = vshll.u32 %v2854_v6, 16 }
 0x602   :  { %v3405_v43 = vadd.f32 %v3404_v44, %v3145_v31  ;;  %vm2954_vm9 = vcmp.eq.s32.totalorder %v4778_v39, %v2786_v60  ;;  %v3471_v13 = vadd.f32 %v8634_v0, %v3470_v52  ;;  %v2869_v46 = vshll.u32 %v2868_v20, 16 }
 0x603   :  { %v3684_v49 = vsel %vm2954_vm9, 1.0, %v8154_v17  ;;  %vm2958_vm11 = vcmp.eq.s32.totalorder %v4778_v39, %v2842_v4 }
 0x604   :  { %v3146_v16 = vmul.f32 %v3684_v49, %v8638_v24  ;;  %v3472_v47 = vadd.f32 %v8635_v32, %v3471_v13  ;;  %v3688_v28 = vsel %vm2958_vm11, 1.0, %v8154_v17 }
 0x605   :  { %v2824_v38 = vpop.xlane.xlu0 %2823 }
 0x606   :  { %v3406_v19 = vadd.f32 %v3405_v43, %v3146_v16  ;;  %v2825_v9 = vcvt.f32.s32 %v2824_v38  ;;  %v3473_v15 = vadd.f32 %v8636_v58, %v3472_v47 }
 0x608   :  { %v3407_v42 = vadd.f32 %v3406_v19, %v3147_v35  ;;  %v2828_v30 = vadd.s32 %v2827_v50, %v2825_v9  ;;  %v3474_v37 = vadd.f32 %v8637_v25, %v3473_v15  ;;  %v3150_v25 = vmul.f32 %v3688_v28, %v8642_v59  ;;  %v8646_v35 = vld [vmem:[#allocation19_spill] sm:$0xff] }
 0x609   :  { %v2896_v50 = vcvt.f32.s32 %v7243_v23 }
 0x60a   :  { %v3408_v55 = vadd.f32 %v3407_v42, %v3148_v62  ;;  %vm2957_vm10 = vcmp.eq.s32.totalorder %v4778_v39, %v2828_v30  ;;  %v3475_v45 = vadd.f32 %v8638_v24, %v3474_v37 }
 0x60b   :  { %v3687_v2 = vsel %vm2957_vm10, 1.0, %v8154_v17 }
 0x60c   :  { %v3149_v11 = vmul.f32 %v3687_v2, %v8641_v12  ;;  %v3476_v61 = vadd.f32 %v8639_v14, %v3475_v45  ;;  %v2882_v14 = vcvt.f32.s32 %v7245_v10 }
 0x60e   :  { %v3409_v53 = vadd.f32 %v3408_v55, %v3149_v11  ;;  %v3477_v32 = vadd.f32 %v8640_v34, %v3476_v61  ;;  %v2897_v34 = vshll.u32 %v2896_v50, 16  ;;  %v2883_v62 = vshll.u32 %v2882_v14, 16 }
 0x60f   :  { %v3346_v55 = vrot.slane %v8647_v33, 4 }
 0x610   :  { %v3478_v26 = vadd.f32 %v8641_v12, %v3477_v32  ;;  %v3410_v43 = vadd.f32 %v3409_v53, %v3150_v25 }
 0x611   :  { %v3347_v40 = vadd.f32 %v3346_v55, %v8647_v33 }
 0x612   :  { %v3479_v18 = vadd.f32 %v8642_v59, %v3478_v26 }
 0x613   :  { %v3348_v13 = vrot.slane %v3347_v40, 2 }
 0x614   :  { %v3480_v31 = vadd.f32 %v8643_v1, %v3479_v18 }
 0x615   :  { %v2866_v51 = vpop.xlane.xlu0 %2865  ;;  %v3349_v45 = vadd.f32 %v3348_v13, %v3347_v40 }
 0x616   :  { %v2867_v0 = vcvt.f32.s32 %v2866_v51  ;;  %v3481_v63 = vadd.f32 %v8644_v22, %v3480_v31 }
 0x617   :  { %v3350_v56 = vrot.slane %v3349_v45, 1 }
 0x618   :  { %v2870_v58 = vadd.s32 %v2869_v46, %v2867_v0  ;;  %v3482_v38 = vadd.f32 %v8645_v27, %v3481_v63 }
 0x619   :  { %v3351_v36 = vadd.f32 %v3350_v56, %v3349_v45 }
 0x61a   :  { %vm2960_vm12 = vcmp.eq.s32.totalorder %v4778_v39, %v2870_v58  ;;  %v3483_v19 = vadd.f32 %v8646_v35, %v3482_v38 }
 0x61b   :  { %v3690_v44 = vsel %vm2960_vm12, 1.0, %v8154_v17 }
 0x61c   :  { %v3152_v49 = vmul.f32 %v3690_v44, %v8644_v22  ;;  %v3484_v11 = vrot.slane %v3483_v19, 4 }
 0x61e   :  { %v3485_v3 = vadd.f32 %v3484_v11, %v3483_v19 }
 0x620   :  { %v3486_v15 = vrot.slane %v3485_v3, 2 }
 0x622   :  { %v3487_v5 = vadd.f32 %v3486_v15, %v3485_v3 }
 0x624   :  { %v3488_v51 = vrot.slane %v3487_v5, 1 }
 0x626   :  { %v3489_v4 = vadd.f32 %v3488_v51, %v3487_v5 }
 0x632   :  { %v2852_v54 = vpop.xlane.xlu2 %2851 }
 0x633   :  { %v2853_v7 = vcvt.f32.s32 %v2852_v54 }
 0x635   :  { %v2856_v8 = vadd.s32 %v2855_v21, %v2853_v7 }
 0x637   :  { %vm2959_vm13 = vcmp.eq.s32.totalorder %v4778_v39, %v2856_v8 }
 0x638   :  { %v3689_v60 = vsel %vm2959_vm13, 1.0, %v8154_v17 }
 0x639   :  { %v3151_v29 = vmul.f32 %v3689_v60, %v8643_v1 }
 0x63b   :  { %v3411_v24 = vadd.f32 %v3410_v43, %v3151_v29 }
 0x63d   :  { %v3412_v16 = vadd.f32 %v3411_v24, %v3152_v49 }
 0x642   :  { %v2894_v9 = vpop.xlane.xlu2 %2893 }
 0x643   :  { %v2880_v48 = vpop.xlane.xlu1 %2879  ;;  %v2895_v42 = vcvt.f32.s32 %v2894_v9 }
 0x644   :  { %v2881_v30 = vcvt.f32.s32 %v2880_v48 }
 0x645   :  { %v2898_v2 = vadd.s32 %v2897_v34, %v2895_v42 }
 0x646   :  { %v2884_v12 = vadd.s32 %v2883_v62, %v2881_v30 }
 0x647   :  { %vm2962_vm14 = vcmp.eq.s32.totalorder %v4778_v39, %v2898_v2 }
 0x648   :  { %vm2961_vm15 = vcmp.eq.s32.totalorder %v4778_v39, %v2884_v12  ;;  %v3692_v23 = vsel %vm2962_vm14, 1.0, %v8154_v17 }
 0x649   :  { %v3691_v10 = vsel %vm2961_vm15, 1.0, %v8154_v17  ;;  %v3154_v41 = vmul.f32 %v3692_v23, %v8646_v35 }
 0x64a   :  { %v3153_v53 = vmul.f32 %v3691_v10, %v8645_v27 }
 0x64c   :  { %v3413_v52 = vadd.f32 %v3412_v16, %v3153_v53 }
 0x64e   :  { %v3414_v47 = vadd.f32 %v3413_v52, %v3154_v41 }
 0x650   :  { %v3415_v37 = vrot.slane %v3414_v47, 4 }
 0x652   :  { %v3416_v57 = vadd.f32 %v3415_v37, %v3414_v47 }
 0x654   :  { %v3417_v39 = vrot.slane %v3416_v57, 2 }
 0x656   :  { %v3418_v61 = vadd.f32 %v3417_v39, %v3416_v57 }
 0x658   :  { %v3419_v17 = vrot.slane %v3418_v61, 1 }
 0x65a   :  { %v3420_v20 = vadd.f32 %v3419_v17, %v3418_v61 }
 0x65c   :  { %v3491_v0 = vsel %vm3490_vm0, %v3351_v36, %v3420_v20 }
 0x65d   :  { %v3493_v32 = vsel %vm3492_vm1, %v3491_v0, %v3489_v4 }
 0x65e   :  { %3494 = vst [vmem:[%s7380_s6] sm:$0x7] %v3493_v32 }
 0x65f   :  { %3499 = vsyncpa [#allocation3], 1 }
 0x660   :  { %3500 = vsyncpa [#allocation5], 1 }

</bundles_post_ra>
